<compile_context>
chip_gen: v5e
topology: v5e:2x2
jax: 0.10.0
libtpu: 0.0.40
codegen_flags: <defaults>
</compile_context>

<pallas_src>
import functools

import numpy as np

import jax
import jax.numpy as jnp
from jax.experimental import pallas as pl
from jax.experimental.pallas import tpu as pltpu

EPS = 1e-5
NUM_CLASS_PAD = 128   # lane-dense padded FC output rows (sliced to num_class outside)
OUT_LANES = 128       # lane-dense padded per-tile output columns (>= batch_tile)


def _lane_pad(n):
    return max(((n + 127) // 128) * 128, 128)


# --------------------------------------------------------------------------------------
# The single fused kernel: whole ShuffleNet forward for one batch-tile per grid step.
# Every activation is a (C, lanes) f32 matrix, lanes = batch*H*W padded to 128k.
# --------------------------------------------------------------------------------------
def _shufflenet_kernel(*refs, meta):
    col_ref = refs[0]                 # (27, L0) bf16 im2col'd stem input, lane = b*HW + i*W + j
    o_ref = refs[-1]                  # (NUM_CLASS_PAD, OUT_LANES) f32
    it = iter(refs[1:-1])

    # stem conv1: 3x3 s1 p1, 3 -> 24, bias (no BN / ReLU in the reference forward()).
    w1 = next(it)[...]                # (24, 27) bf16
    b1 = next(it)[...]                # (24, 1)  f32
    a = jnp.dot(w1, col_ref[...], preferred_element_type=jnp.float32) + b1   # (24, L0)

    for win, stride, has_res in meta:
        wc1 = next(it)[...]           # (planes, Cin) bf16: block-diag * bn1, rows pre-shuffled
        sh1 = next(it)[...]           # (planes, 1)
        wdw = next(it)[...]           # (planes, 9)   depthwise taps * bn2 scale (f32)
        sh2 = next(it)[...]           # (planes, 1)
        msk_ref = next(it)            # (9, Lin)      0/1 zero-padding boundary masks

        # grouped 1x1 conv + BN + ReLU (channel shuffle folded into wc1 rows).
        t = jnp.maximum(
            jnp.dot(wc1, a.astype(wc1.dtype), preferred_element_type=jnp.float32) + sh1,
            0.0)

        # depthwise 3x3 (pad=1) at full input resolution:
        # per tap: XLU lane roll + boundary mask + per-channel FMA on the VPU (no MXU).
        lanes = t.shape[1]
        acc = jnp.zeros_like(t)
        for kh in range(3):
            for kw in range(3):
                tap = kh * 3 + kw
                delta = (kh - 1) * win + (kw - 1)          # flat-space offset of this tap
                src = pltpu.roll(t, (-delta) % lanes, 1) if delta else t
                acc = acc + (src * msk_ref[tap:tap + 1, :]) * wdw[:, tap:tap + 1]

        if stride == 2:               # downsample to even rows/cols via one 0/1 selection matmul
            dsel = next(it)[...]      # (Lin, Lout) f32
            acc = jnp.dot(acc, dsel, preferred_element_type=jnp.float32)
        d = jnp.maximum(acc + sh2, 0.0)

        # grouped 1x1 conv + BN (no ReLU), with fused pass_by (1x1 conv + BN) residual.
        wc3 = next(it)[...]           # (Cout, planes) bf16
        sh3 = next(it)[...]           # (Cout, 1)
        z = jnp.dot(wc3, d.astype(wc3.dtype), preferred_element_type=jnp.float32) + sh3
        if has_res:
            wpb = next(it)[...]       # (Cout, Cin) bf16  dense pass_by conv * bn scale
            shpb = next(it)[...]      # (Cout, 1)
            z = z + jnp.dot(wpb, a.astype(wpb.dtype),
                            preferred_element_type=jnp.float32) + shpb
        a = z

    # head: per-image AvgPool as a tiny 1/HW matmul (reduce-then-matmul), then FC.
    poolm = next(it)[...]             # (Lf, OUT_LANES) f32
    wfc = next(it)[...]               # (NUM_CLASS_PAD, Cf) bf16
    bfc = next(it)[...]               # (NUM_CLASS_PAD, 1)  f32
    pooled = jnp.dot(a, poolm, preferred_element_type=jnp.float32)          # (Cf, OUT_LANES)
    o_ref[...] = jnp.dot(wfc, pooled.astype(wfc.dtype),
                         preferred_element_type=jnp.float32) + bfc


# --------------------------------------------------------------------------------------
# Parameter preparation: fold BN / shuffle / pooling / grouping, build constant tables.
# --------------------------------------------------------------------------------------
def fold_bn(bn):
    gamma, beta, mean, var = (jnp.asarray(v, jnp.float32).reshape(-1) for v in bn)
    scale = gamma / jnp.sqrt(var + EPS)
    shift = beta - mean * scale
    return scale, shift


def _block_diag(wg):
    """(G, Cin/G, Cout/G) grouped 1x1 weight -> dense block-diagonal (Cin, Cout)."""
    g, cig, cog = wg.shape
    out = jnp.zeros((g * cig, g * cog), jnp.float32)
    for gi in range(g):
        out = out.at[gi * cig:(gi + 1) * cig, gi * cog:(gi + 1) * cog].set(wg[gi])
    return out


def _boundary_masks(h, w, bt, lanes):
    """(9, lanes) 0/1 masks: tap (kh,kw) is valid at output (i,j) iff it stays inside the image."""
    m = np.zeros((9, lanes), np.float32)
    for kh in range(3):
        for kw in range(3):
            t = kh * 3 + kw
            valid = np.zeros((h, w), np.float32)
            i0, i1 = max(0, 1 - kh), min(h, h + 1 - kh)
            j0, j1 = max(0, 1 - kw), min(w, w + 1 - kw)
            valid[i0:i1, j0:j1] = 1.0
            for b in range(bt):
                m[t, b * h * w:(b + 1) * h * w] = valid.reshape(-1)
    return m


def _downsample_matrix(h, w, bt, lanes_in, lanes_out):
    """(lanes_in, lanes_out) 0/1 selection of even rows/cols (stride-2), per image in the tile."""
    ho, wo = (h - 1) // 2 + 1, (w - 1) // 2 + 1
    d = np.zeros((lanes_in, lanes_out), np.float32)
    for b in range(bt):
        for oi in range(ho):
            for oj in range(wo):
                d[b * h * w + 2 * oi * w + 2 * oj, b * ho * wo + oi * wo + oj] = 1.0
    return d, ho, wo


def _pool_matrix(hw, bt, lanes_in, out_lanes):
    """(lanes_in, out_lanes): per-image average pool (1/hw) into column b of the output tile."""
    p = np.zeros((lanes_in, out_lanes), np.float32)
    for b in range(bt):
        p[b * hw:(b + 1) * hw, b] = 1.0 / hw
    return p


def prepare_shufflenet(params, group=3, num_class=10, in_hw=16, batch_tile=2):
    bt = batch_tile
    h = w = in_hw
    l_in = _lane_pad(bt * h * w)
    l0 = l_in

    w1t = jnp.asarray(params["conv1_w"]).reshape(-1, params["conv1_w"].shape[-1]).T
    args = [w1t.astype(jnp.bfloat16),                               # (24, 27)
            jnp.asarray(params["conv1_b"], jnp.float32).reshape(-1, 1)]
    meta = []

    for bp, stride in zip(params["blocks"], params["strides"]):
        s1, sh1 = fold_bn(bp["bn1"])
        s2, sh2 = fold_bn(bp["bn2"])
        s3, sh3 = fold_bn(bp["bn3"])
        planes = int(s1.shape[0])

        wc1t = _block_diag(bp["c1_w"]).T * s1[:, None]              # (planes, Cin)
        # fold the channel shuffle into conv1's output rows (and its BN shift)
        perm = np.array([(j % group) * (planes // group) + j // group for j in range(planes)])
        wc1t = wc1t[perm, :]
        sh1 = sh1[perm]
        wdwt = (jnp.asarray(bp["dw_w"], jnp.float32).reshape(9, planes) * s2[None, :]).T
        wc3t = _block_diag(bp["c3_w"]).T * s3[:, None]               # (Cout, planes)

        mask = _boundary_masks(h, w, bt, l_in)
        blk_args = [wc1t.astype(jnp.bfloat16), sh1.reshape(-1, 1),
                    wdwt, sh2.reshape(-1, 1), jnp.asarray(mask)]
        meta.append((w, stride, stride == 1))

        if stride == 2:
            l_out = _lane_pad(bt * ((h - 1) // 2 + 1) * ((w - 1) // 2 + 1))
            dsel, h, w = _downsample_matrix(h, w, bt, l_in, l_out)
            blk_args.append(jnp.asarray(dsel))
            l_in = l_out

        blk_args += [wc3t.astype(jnp.bfloat16), sh3.reshape(-1, 1)]
        if stride == 1:
            spb, shpb = fold_bn(bp["pb_bn"])
            wpbt = jnp.asarray(bp["pb_w"][0], jnp.float32).T * spb[:, None]
            blk_args += [wpbt.astype(jnp.bfloat16), shpb.reshape(-1, 1)]
        args += blk_args

    # head: AvgPool folded into a tiny 1/HW matmul; FC padded to 128 lane-dense rows.
    cf = int(params["fc_w"].shape[0])
    poolm = _pool_matrix(h * w, bt, l_in, OUT_LANES)
    wfct = jnp.zeros((NUM_CLASS_PAD, cf), jnp.float32)
    wfct = wfct.at[:num_class, :].set(jnp.asarray(params["fc_w"], jnp.float32).T)
    bfc = jnp.zeros((NUM_CLASS_PAD, 1), jnp.float32)
    bfc = bfc.at[:num_class, 0].set(jnp.asarray(params["fc_b"], jnp.float32).reshape(-1))
    args += [jnp.asarray(poolm), wfct.astype(jnp.bfloat16), bfc]

    return {"args": args, "meta": tuple(meta), "num_class": num_class,
            "batch_tile": bt, "in_hw": in_hw, "l0": l0}


# --------------------------------------------------------------------------------------
# Wrapper.
# --------------------------------------------------------------------------------------
def shufflenet_forward(x_nchw, prep):
    """x_nchw: (N, 3, H, W) float input (PyTorch layout); prep: prepare_shufflenet() output."""
    x = jnp.transpose(x_nchw, (0, 2, 3, 1)).astype(jnp.float32)     # NCHW -> NHWC
    n, h, w, cin = x.shape
    bt = prep["batch_tile"]
    assert h == prep["in_hw"] and w == prep["in_hw"] and n % bt == 0
    nt = n // bt
    l0 = prep["l0"]

    # wrapper-side im2col for the 3x3 stem conv, laid out (27, lanes), lane = b*HW + i*W + j.
    xp = jnp.pad(x, ((0, 0), (1, 1), (1, 1), (0, 0)))
    cols = jnp.concatenate(
        [xp[:, kh:kh + h, kw:kw + w, :] for kh in range(3) for kw in range(3)], axis=-1)
    cols = cols.reshape(nt, bt * h * w, 9 * cin)
    if bt * h * w < l0:
        cols = jnp.pad(cols, ((0, 0), (0, l0 - bt * h * w), (0, 0)))
    cols = jnp.transpose(cols, (2, 0, 1)).reshape(9 * cin, nt * l0).astype(jnp.bfloat16)

    weight_args = list(prep["args"])
    in_specs = [pl.BlockSpec((9 * cin, l0), lambda i: (0, i))]
    in_specs += [pl.BlockSpec(a.shape, lambda i: (0, 0)) for a in weight_args]

    out = pl.pallas_call(
        functools.partial(_shufflenet_kernel, meta=prep["meta"]),
        grid=(nt,),
        in_specs=in_specs,
        out_specs=pl.BlockSpec((NUM_CLASS_PAD, OUT_LANES), lambda i: (0, i)),
        out_shape=jax.ShapeDtypeStruct((NUM_CLASS_PAD, nt * OUT_LANES), jnp.float32),
        compiler_params=pltpu.CompilerParams(
            dimension_semantics=("parallel",),
            vmem_limit_bytes=32 * 1024 * 1024),
    )(cols, *weight_args)

    out = out.reshape(NUM_CLASS_PAD, nt, OUT_LANES)[:, :, :bt]      # (NC_PAD, nt, bt)
    out = jnp.transpose(out, (1, 2, 0)).reshape(n, NUM_CLASS_PAD)
    return out[:, :prep["num_class"]]


# --------------------------------------------------------------------------------------
# Parameter initialization (deterministic, JAX-native layouts).
# --------------------------------------------------------------------------------------
def init_params(key, cfg=(24, 48), group=3, num_class=10, num_layer=2):
    keys = iter(jax.random.split(key, 256))

    def nrm(shape, s=0.1):
        return s * jax.random.normal(next(keys), shape, jnp.float32)

    def bn(c):
        gamma = 0.5 + jax.random.uniform(next(keys), (1, c), jnp.float32)
        beta = nrm((1, c))
        mean = nrm((1, c))
        var = 0.5 + jax.random.uniform(next(keys), (1, c), jnp.float32)
        return (gamma, beta, mean, var)

    params = {
        "conv1_w": nrm((3, 3, 3, 24)),   # (kh, kw, Cin, Cout)
        "conv1_b": nrm((1, 24)),
    }
    blocks, strides = [], []
    inplane = 24
    for plane in cfg:
        stride = 2
        for _ in range(num_layer):
            planes = plane // 4
            bp = {
                "c1_w": nrm((group, inplane // group, planes // group)),
                "bn1": bn(planes),
                "dw_w": nrm((3, 3, planes)),
                "bn2": bn(planes),
                "c3_w": nrm((group, planes // group, plane // group)),
                "bn3": bn(plane),
            }
            if stride == 1:
                bp["pb_w"] = nrm((1, inplane, plane))
                bp["pb_bn"] = bn(plane)
            blocks.append(bp)
            strides.append(stride)
            inplane = plane
            stride = 1
    params["blocks"] = blocks
    params["strides"] = strides
    params["fc_w"] = nrm((cfg[-1], num_class))
    params["fc_b"] = nrm((1, num_class))
    return params


if __name__ == "__main__":
    key = jax.random.PRNGKey(0)
    kx, kp = jax.random.split(key)
    # Input spatial 16x16: two stride-2 stages -> 4x4 before AvgPool2d(4) -> 1x1.
    x = jax.random.normal(kx, (2, 3, 16, 16), jnp.float32)   # NCHW, as in PyTorch
    params = init_params(kp, cfg=(24, 48), group=3, num_class=10)
    prep = prepare_shufflenet(params, group=3, num_class=10, in_hw=16, batch_tile=2)
    out = shufflenet_forward(x, prep)
    out = jax.block_until_ready(out)
    assert out.shape == (2, 10) and out.dtype == jnp.float32
    print("KERNEL_OK")
</pallas_src>

<mosaic_0001>
module attributes {stable_mosaic.version = 11 : i64} {
  func.func @_shufflenet_kernel(%arg0: i32, %arg1: memref<27x512xbf16, #tpu.memory_space<vmem>>, %arg2: memref<24x27xbf16, #tpu.memory_space<vmem>>, %arg3: memref<24x1xf32, #tpu.memory_space<vmem>>, %arg4: memref<6x24xbf16, #tpu.memory_space<vmem>>, %arg5: memref<6x1xf32, #tpu.memory_space<vmem>>, %arg6: memref<6x9xf32, #tpu.memory_space<vmem>>, %arg7: memref<6x1xf32, #tpu.memory_space<vmem>>, %arg8: memref<9x512xf32, #tpu.memory_space<vmem>>, %arg9: memref<512x128xf32, #tpu.memory_space<vmem>>, %arg10: memref<24x6xbf16, #tpu.memory_space<vmem>>, %arg11: memref<24x1xf32, #tpu.memory_space<vmem>>, %arg12: memref<6x24xbf16, #tpu.memory_space<vmem>>, %arg13: memref<6x1xf32, #tpu.memory_space<vmem>>, %arg14: memref<6x9xf32, #tpu.memory_space<vmem>>, %arg15: memref<6x1xf32, #tpu.memory_space<vmem>>, %arg16: memref<9x128xf32, #tpu.memory_space<vmem>>, %arg17: memref<24x6xbf16, #tpu.memory_space<vmem>>, %arg18: memref<24x1xf32, #tpu.memory_space<vmem>>, %arg19: memref<24x24xbf16, #tpu.memory_space<vmem>>, %arg20: memref<24x1xf32, #tpu.memory_space<vmem>>, %arg21: memref<12x24xbf16, #tpu.memory_space<vmem>>, %arg22: memref<12x1xf32, #tpu.memory_space<vmem>>, %arg23: memref<12x9xf32, #tpu.memory_space<vmem>>, %arg24: memref<12x1xf32, #tpu.memory_space<vmem>>, %arg25: memref<9x128xf32, #tpu.memory_space<vmem>>, %arg26: memref<128x128xf32, #tpu.memory_space<vmem>>, %arg27: memref<48x12xbf16, #tpu.memory_space<vmem>>, %arg28: memref<48x1xf32, #tpu.memory_space<vmem>>, %arg29: memref<12x48xbf16, #tpu.memory_space<vmem>>, %arg30: memref<12x1xf32, #tpu.memory_space<vmem>>, %arg31: memref<12x9xf32, #tpu.memory_space<vmem>>, %arg32: memref<12x1xf32, #tpu.memory_space<vmem>>, %arg33: memref<9x128xf32, #tpu.memory_space<vmem>>, %arg34: memref<48x12xbf16, #tpu.memory_space<vmem>>, %arg35: memref<48x1xf32, #tpu.memory_space<vmem>>, %arg36: memref<48x48xbf16, #tpu.memory_space<vmem>>, %arg37: memref<48x1xf32, #tpu.memory_space<vmem>>, %arg38: memref<128x128xf32, #tpu.memory_space<vmem>>, %arg39: memref<128x48xbf16, #tpu.memory_space<vmem>>, %arg40: memref<128x1xf32, #tpu.memory_space<vmem>>, %arg41: memref<128x128xf32, #tpu.memory_space<vmem>>) attributes {dimension_semantics = [#tpu.dimension_semantics<parallel>], iteration_bounds = array<i64: 1>, scalar_prefetch = 0 : i64, scratch_operands = 0 : i64, tpu.core_type = #tpu.core_type<tc>, window_params = [{transform_indices = @transform_0, window_bounds = array<i64: 27, 512>}, {pipeline_mode = #tpu.pipeline_mode<synchronous>, transform_indices = @transform_1, window_bounds = array<i64: 24, 27>}, {pipeline_mode = #tpu.pipeline_mode<synchronous>, transform_indices = @transform_2, window_bounds = array<i64: 24, 1>}, {pipeline_mode = #tpu.pipeline_mode<synchronous>, transform_indices = @transform_3, window_bounds = array<i64: 6, 24>}, {pipeline_mode = #tpu.pipeline_mode<synchronous>, transform_indices = @transform_4, window_bounds = array<i64: 6, 1>}, {pipeline_mode = #tpu.pipeline_mode<synchronous>, transform_indices = @transform_5, window_bounds = array<i64: 6, 9>}, {pipeline_mode = #tpu.pipeline_mode<synchronous>, transform_indices = @transform_6, window_bounds = array<i64: 6, 1>}, {pipeline_mode = #tpu.pipeline_mode<synchronous>, transform_indices = @transform_7, window_bounds = array<i64: 9, 512>}, {pipeline_mode = #tpu.pipeline_mode<synchronous>, transform_indices = @transform_8, window_bounds = array<i64: 512, 128>}, {pipeline_mode = #tpu.pipeline_mode<synchronous>, transform_indices = @transform_9, window_bounds = array<i64: 24, 6>}, {pipeline_mode = #tpu.pipeline_mode<synchronous>, transform_indices = @transform_10, window_bounds = array<i64: 24, 1>}, {pipeline_mode = #tpu.pipeline_mode<synchronous>, transform_indices = @transform_11, window_bounds = array<i64: 6, 24>}, {pipeline_mode = #tpu.pipeline_mode<synchronous>, transform_indices = @transform_12, window_bounds = array<i64: 6, 1>}, {pipeline_mode = #tpu.pipeline_mode<synchronous>, transform_indices = @transform_13, window_bounds = array<i64: 6, 9>}, {pipeline_mode = #tpu.pipeline_mode<synchronous>, transform_indices = @transform_14, window_bounds = array<i64: 6, 1>}, {pipeline_mode = #tpu.pipeline_mode<synchronous>, transform_indices = @transform_15, window_bounds = array<i64: 9, 128>}, {pipeline_mode = #tpu.pipeline_mode<synchronous>, transform_indices = @transform_16, window_bounds = array<i64: 24, 6>}, {pipeline_mode = #tpu.pipeline_mode<synchronous>, transform_indices = @transform_17, window_bounds = array<i64: 24, 1>}, {pipeline_mode = #tpu.pipeline_mode<synchronous>, transform_indices = @transform_18, window_bounds = array<i64: 24, 24>}, {pipeline_mode = #tpu.pipeline_mode<synchronous>, transform_indices = @transform_19, window_bounds = array<i64: 24, 1>}, {pipeline_mode = #tpu.pipeline_mode<synchronous>, transform_indices = @transform_20, window_bounds = array<i64: 12, 24>}, {pipeline_mode = #tpu.pipeline_mode<synchronous>, transform_indices = @transform_21, window_bounds = array<i64: 12, 1>}, {pipeline_mode = #tpu.pipeline_mode<synchronous>, transform_indices = @transform_22, window_bounds = array<i64: 12, 9>}, {pipeline_mode = #tpu.pipeline_mode<synchronous>, transform_indices = @transform_23, window_bounds = array<i64: 12, 1>}, {pipeline_mode = #tpu.pipeline_mode<synchronous>, transform_indices = @transform_24, window_bounds = array<i64: 9, 128>}, {pipeline_mode = #tpu.pipeline_mode<synchronous>, transform_indices = @transform_25, window_bounds = array<i64: 128, 128>}, {pipeline_mode = #tpu.pipeline_mode<synchronous>, transform_indices = @transform_26, window_bounds = array<i64: 48, 12>}, {pipeline_mode = #tpu.pipeline_mode<synchronous>, transform_indices = @transform_27, window_bounds = array<i64: 48, 1>}, {pipeline_mode = #tpu.pipeline_mode<synchronous>, transform_indices = @transform_28, window_bounds = array<i64: 12, 48>}, {pipeline_mode = #tpu.pipeline_mode<synchronous>, transform_indices = @transform_29, window_bounds = array<i64: 12, 1>}, {pipeline_mode = #tpu.pipeline_mode<synchronous>, transform_indices = @transform_30, window_bounds = array<i64: 12, 9>}, {pipeline_mode = #tpu.pipeline_mode<synchronous>, transform_indices = @transform_31, window_bounds = array<i64: 12, 1>}, {pipeline_mode = #tpu.pipeline_mode<synchronous>, transform_indices = @transform_32, window_bounds = array<i64: 9, 128>}, {pipeline_mode = #tpu.pipeline_mode<synchronous>, transform_indices = @transform_33, window_bounds = array<i64: 48, 12>}, {pipeline_mode = #tpu.pipeline_mode<synchronous>, transform_indices = @transform_34, window_bounds = array<i64: 48, 1>}, {pipeline_mode = #tpu.pipeline_mode<synchronous>, transform_indices = @transform_35, window_bounds = array<i64: 48, 48>}, {pipeline_mode = #tpu.pipeline_mode<synchronous>, transform_indices = @transform_36, window_bounds = array<i64: 48, 1>}, {pipeline_mode = #tpu.pipeline_mode<synchronous>, transform_indices = @transform_37, window_bounds = array<i64: 128, 128>}, {pipeline_mode = #tpu.pipeline_mode<synchronous>, transform_indices = @transform_38, window_bounds = array<i64: 128, 48>}, {pipeline_mode = #tpu.pipeline_mode<synchronous>, transform_indices = @transform_39, window_bounds = array<i64: 128, 1>}, {transform_indices = @transform_40, window_bounds = array<i64: 128, 128>}]} {
    %c0 = arith.constant 0 : index
    %c0_0 = arith.constant 0 : index
    %0 = vector.load %arg2[%c0, %c0_0] : memref<24x27xbf16, #tpu.memory_space<vmem>>, vector<24x27xbf16>
    %c0_1 = arith.constant 0 : index
    %c0_2 = arith.constant 0 : index
    %1 = vector.load %arg3[%c0_1, %c0_2] : memref<24x1xf32, #tpu.memory_space<vmem>>, vector<24x1xf32>
    %c0_3 = arith.constant 0 : index
    %c0_4 = arith.constant 0 : index
    %2 = vector.load %arg1[%c0_3, %c0_4] : memref<27x512xbf16, #tpu.memory_space<vmem>>, vector<27x512xbf16>
    %cst = arith.constant dense<0.000000e+00> : vector<24x512xf32>
    %3 = tpu.matmul %0, %2, %cst {dimension_numbers = #tpu.dot_dimension_numbers<[1], [0], [0], [1], [0, 0, 1, 1], [], []>} : vector<24x27xbf16>, vector<27x512xbf16>, vector<24x512xf32> -> vector<24x512xf32>
    %4 = vector.broadcast %1 : vector<24x1xf32> to vector<24x512xf32>
    %5 = arith.addf %3, %4 : vector<24x512xf32>
    %c0_5 = arith.constant 0 : index
    %c0_6 = arith.constant 0 : index
    %6 = vector.load %arg4[%c0_5, %c0_6] : memref<6x24xbf16, #tpu.memory_space<vmem>>, vector<6x24xbf16>
    %c0_7 = arith.constant 0 : index
    %c0_8 = arith.constant 0 : index
    %7 = vector.load %arg5[%c0_7, %c0_8] : memref<6x1xf32, #tpu.memory_space<vmem>>, vector<6x1xf32>
    %c0_9 = arith.constant 0 : index
    %c0_10 = arith.constant 0 : index
    %8 = vector.load %arg6[%c0_9, %c0_10] : memref<6x9xf32, #tpu.memory_space<vmem>>, vector<6x9xf32>
    %c0_11 = arith.constant 0 : index
    %c0_12 = arith.constant 0 : index
    %9 = vector.load %arg7[%c0_11, %c0_12] : memref<6x1xf32, #tpu.memory_space<vmem>>, vector<6x1xf32>
    %10 = arith.truncf %5 : vector<24x512xf32> to vector<24x512xbf16>
    %cst_13 = arith.constant dense<0.000000e+00> : vector<6x512xf32>
    %11 = tpu.matmul %6, %10, %cst_13 {dimension_numbers = #tpu.dot_dimension_numbers<[1], [0], [0], [1], [0, 0, 1, 1], [], []>} : vector<6x24xbf16>, vector<24x512xbf16>, vector<6x512xf32> -> vector<6x512xf32>
    %12 = vector.broadcast %7 : vector<6x1xf32> to vector<6x512xf32>
    %13 = arith.addf %11, %12 : vector<6x512xf32>
    %cst_14 = arith.constant 0.000000e+00 : f32
    %14 = vector.broadcast %cst_14 : f32 to vector<6x512xf32>
    %15 = arith.maximumf %13, %14 : vector<6x512xf32>
    %cst_15 = arith.constant 0.000000e+00 : f32
    %16 = vector.broadcast %cst_15 : f32 to vector<6x512xf32>
    %c17_i32 = arith.constant 17 : i32
    %17 = tpu.dynamic_rotate %15 by %c17_i32 dim 1 : vector<6x512xf32>, i32 -> vector<6x512xf32>
    %c0_16 = arith.constant 0 : index
    %c0_17 = arith.constant 0 : index
    %18 = vector.load %arg8[%c0_16, %c0_17] : memref<9x512xf32, #tpu.memory_space<vmem>>, vector<1x512xf32>
    %19 = vector.broadcast %18 : vector<1x512xf32> to vector<6x512xf32>
    %20 = arith.mulf %17, %19 : vector<6x512xf32>
    %21 = vector.extract_strided_slice %8 {offsets = [0, 0], sizes = [6, 1], strides = [1, 1]} : vector<6x9xf32> to vector<6x1xf32>
    %22 = vector.broadcast %21 : vector<6x1xf32> to vector<6x512xf32>
    %23 = arith.mulf %20, %22 : vector<6x512xf32>
    %24 = arith.addf %16, %23 : vector<6x512xf32>
    %c16_i32 = arith.constant 16 : i32
    %25 = tpu.dynamic_rotate %15 by %c16_i32 dim 1 : vector<6x512xf32>, i32 -> vector<6x512xf32>
    %c1 = arith.constant 1 : index
    %c0_18 = arith.constant 0 : index
    %26 = vector.load %arg8[%c1, %c0_18] : memref<9x512xf32, #tpu.memory_space<vmem>>, vector<1x512xf32>
    %27 = vector.broadcast %26 : vector<1x512xf32> to vector<6x512xf32>
    %28 = arith.mulf %25, %27 : vector<6x512xf32>
    %29 = vector.extract_strided_slice %8 {offsets = [0, 1], sizes = [6, 1], strides = [1, 1]} : vector<6x9xf32> to vector<6x1xf32>
    %30 = vector.broadcast %29 : vector<6x1xf32> to vector<6x512xf32>
    %31 = arith.mulf %28, %30 : vector<6x512xf32>
    %32 = arith.addf %24, %31 : vector<6x512xf32>
    %c15_i32 = arith.constant 15 : i32
    %33 = tpu.dynamic_rotate %15 by %c15_i32 dim 1 : vector<6x512xf32>, i32 -> vector<6x512xf32>
    %c2 = arith.constant 2 : index
    %c0_19 = arith.constant 0 : index
    %34 = vector.load %arg8[%c2, %c0_19] : memref<9x512xf32, #tpu.memory_space<vmem>>, vector<1x512xf32>
    %35 = vector.broadcast %34 : vector<1x512xf32> to vector<6x512xf32>
    %36 = arith.mulf %33, %35 : vector<6x512xf32>
    %37 = vector.extract_strided_slice %8 {offsets = [0, 2], sizes = [6, 1], strides = [1, 1]} : vector<6x9xf32> to vector<6x1xf32>
    %38 = vector.broadcast %37 : vector<6x1xf32> to vector<6x512xf32>
    %39 = arith.mulf %36, %38 : vector<6x512xf32>
    %40 = arith.addf %32, %39 : vector<6x512xf32>
    %c1_i32 = arith.constant 1 : i32
    %41 = tpu.dynamic_rotate %15 by %c1_i32 dim 1 : vector<6x512xf32>, i32 -> vector<6x512xf32>
    %c3 = arith.constant 3 : index
    %c0_20 = arith.constant 0 : index
    %42 = vector.load %arg8[%c3, %c0_20] : memref<9x512xf32, #tpu.memory_space<vmem>>, vector<1x512xf32>
    %43 = vector.broadcast %42 : vector<1x512xf32> to vector<6x512xf32>
    %44 = arith.mulf %41, %43 : vector<6x512xf32>
    %45 = vector.extract_strided_slice %8 {offsets = [0, 3], sizes = [6, 1], strides = [1, 1]} : vector<6x9xf32> to vector<6x1xf32>
    %46 = vector.broadcast %45 : vector<6x1xf32> to vector<6x512xf32>
    %47 = arith.mulf %44, %46 : vector<6x512xf32>
    %48 = arith.addf %40, %47 : vector<6x512xf32>
    %c4 = arith.constant 4 : index
    %c0_21 = arith.constant 0 : index
    %49 = vector.load %arg8[%c4, %c0_21] : memref<9x512xf32, #tpu.memory_space<vmem>>, vector<1x512xf32>
    %50 = vector.broadcast %49 : vector<1x512xf32> to vector<6x512xf32>
    %51 = arith.mulf %15, %50 : vector<6x512xf32>
    %52 = vector.extract_strided_slice %8 {offsets = [0, 4], sizes = [6, 1], strides = [1, 1]} : vector<6x9xf32> to vector<6x1xf32>
    %53 = vector.broadcast %52 : vector<6x1xf32> to vector<6x512xf32>
    %54 = arith.mulf %51, %53 : vector<6x512xf32>
    %55 = arith.addf %48, %54 : vector<6x512xf32>
    %c511_i32 = arith.constant 511 : i32
    %56 = tpu.dynamic_rotate %15 by %c511_i32 dim 1 : vector<6x512xf32>, i32 -> vector<6x512xf32>
    %c5 = arith.constant 5 : index
    %c0_22 = arith.constant 0 : index
    %57 = vector.load %arg8[%c5, %c0_22] : memref<9x512xf32, #tpu.memory_space<vmem>>, vector<1x512xf32>
    %58 = vector.broadcast %57 : vector<1x512xf32> to vector<6x512xf32>
    %59 = arith.mulf %56, %58 : vector<6x512xf32>
    %60 = vector.extract_strided_slice %8 {offsets = [0, 5], sizes = [6, 1], strides = [1, 1]} : vector<6x9xf32> to vector<6x1xf32>
    %61 = vector.broadcast %60 : vector<6x1xf32> to vector<6x512xf32>
    %62 = arith.mulf %59, %61 : vector<6x512xf32>
    %63 = arith.addf %55, %62 : vector<6x512xf32>
    %c497_i32 = arith.constant 497 : i32
    %64 = tpu.dynamic_rotate %15 by %c497_i32 dim 1 : vector<6x512xf32>, i32 -> vector<6x512xf32>
    %c6 = arith.constant 6 : index
    %c0_23 = arith.constant 0 : index
    %65 = vector.load %arg8[%c6, %c0_23] : memref<9x512xf32, #tpu.memory_space<vmem>>, vector<1x512xf32>
    %66 = vector.broadcast %65 : vector<1x512xf32> to vector<6x512xf32>
    %67 = arith.mulf %64, %66 : vector<6x512xf32>
    %68 = vector.extract_strided_slice %8 {offsets = [0, 6], sizes = [6, 1], strides = [1, 1]} : vector<6x9xf32> to vector<6x1xf32>
    %69 = vector.broadcast %68 : vector<6x1xf32> to vector<6x512xf32>
    %70 = arith.mulf %67, %69 : vector<6x512xf32>
    %71 = arith.addf %63, %70 : vector<6x512xf32>
    %c496_i32 = arith.constant 496 : i32
    %72 = tpu.dynamic_rotate %15 by %c496_i32 dim 1 : vector<6x512xf32>, i32 -> vector<6x512xf32>
    %c7 = arith.constant 7 : index
    %c0_24 = arith.constant 0 : index
    %73 = vector.load %arg8[%c7, %c0_24] : memref<9x512xf32, #tpu.memory_space<vmem>>, vector<1x512xf32>
    %74 = vector.broadcast %73 : vector<1x512xf32> to vector<6x512xf32>
    %75 = arith.mulf %72, %74 : vector<6x512xf32>
    %76 = vector.extract_strided_slice %8 {offsets = [0, 7], sizes = [6, 1], strides = [1, 1]} : vector<6x9xf32> to vector<6x1xf32>
    %77 = vector.broadcast %76 : vector<6x1xf32> to vector<6x512xf32>
    %78 = arith.mulf %75, %77 : vector<6x512xf32>
    %79 = arith.addf %71, %78 : vector<6x512xf32>
    %c495_i32 = arith.constant 495 : i32
    %80 = tpu.dynamic_rotate %15 by %c495_i32 dim 1 : vector<6x512xf32>, i32 -> vector<6x512xf32>
    %c8 = arith.constant 8 : index
    %c0_25 = arith.constant 0 : index
    %81 = vector.load %arg8[%c8, %c0_25] : memref<9x512xf32, #tpu.memory_space<vmem>>, vector<1x512xf32>
    %82 = vector.broadcast %81 : vector<1x512xf32> to vector<6x512xf32>
    %83 = arith.mulf %80, %82 : vector<6x512xf32>
    %84 = vector.extract_strided_slice %8 {offsets = [0, 8], sizes = [6, 1], strides = [1, 1]} : vector<6x9xf32> to vector<6x1xf32>
    %85 = vector.broadcast %84 : vector<6x1xf32> to vector<6x512xf32>
    %86 = arith.mulf %83, %85 : vector<6x512xf32>
    %87 = arith.addf %79, %86 : vector<6x512xf32>
    %c0_26 = arith.constant 0 : index
    %c0_27 = arith.constant 0 : index
    %88 = vector.load %arg9[%c0_26, %c0_27] : memref<512x128xf32, #tpu.memory_space<vmem>>, vector<512x128xf32>
    %cst_28 = arith.constant dense<0.000000e+00> : vector<6x128xf32>
    %89 = tpu.matmul %87, %88, %cst_28 {dimension_numbers = #tpu.dot_dimension_numbers<[1], [0], [0], [1], [0, 0, 1, 1], [], []>} : vector<6x512xf32>, vector<512x128xf32>, vector<6x128xf32> -> vector<6x128xf32>
    %90 = vector.broadcast %9 : vector<6x1xf32> to vector<6x128xf32>
    %91 = arith.addf %89, %90 : vector<6x128xf32>
    %cst_29 = arith.constant 0.000000e+00 : f32
    %92 = vector.broadcast %cst_29 : f32 to vector<6x128xf32>
    %93 = arith.maximumf %91, %92 : vector<6x128xf32>
    %c0_30 = arith.constant 0 : index
    %c0_31 = arith.constant 0 : index
    %94 = vector.load %arg10[%c0_30, %c0_31] : memref<24x6xbf16, #tpu.memory_space<vmem>>, vector<24x6xbf16>
    %c0_32 = arith.constant 0 : index
    %c0_33 = arith.constant 0 : index
    %95 = vector.load %arg11[%c0_32, %c0_33] : memref<24x1xf32, #tpu.memory_space<vmem>>, vector<24x1xf32>
    %96 = arith.truncf %93 : vector<6x128xf32> to vector<6x128xbf16>
    %cst_34 = arith.constant dense<0.000000e+00> : vector<24x128xf32>
    %97 = tpu.matmul %94, %96, %cst_34 {dimension_numbers = #tpu.dot_dimension_numbers<[1], [0], [0], [1], [0, 0, 1, 1], [], []>} : vector<24x6xbf16>, vector<6x128xbf16>, vector<24x128xf32> -> vector<24x128xf32>
    %98 = vector.broadcast %95 : vector<24x1xf32> to vector<24x128xf32>
    %99 = arith.addf %97, %98 : vector<24x128xf32>
    %c0_35 = arith.constant 0 : index
    %c0_36 = arith.constant 0 : index
    %100 = vector.load %arg12[%c0_35, %c0_36] : memref<6x24xbf16, #tpu.memory_space<vmem>>, vector<6x24xbf16>
    %c0_37 = arith.constant 0 : index
    %c0_38 = arith.constant 0 : index
    %101 = vector.load %arg13[%c0_37, %c0_38] : memref<6x1xf32, #tpu.memory_space<vmem>>, vector<6x1xf32>
    %c0_39 = arith.constant 0 : index
    %c0_40 = arith.constant 0 : index
    %102 = vector.load %arg14[%c0_39, %c0_40] : memref<6x9xf32, #tpu.memory_space<vmem>>, vector<6x9xf32>
    %c0_41 = arith.constant 0 : index
    %c0_42 = arith.constant 0 : index
    %103 = vector.load %arg15[%c0_41, %c0_42] : memref<6x1xf32, #tpu.memory_space<vmem>>, vector<6x1xf32>
    %104 = arith.truncf %99 : vector<24x128xf32> to vector<24x128xbf16>
    %cst_43 = arith.constant dense<0.000000e+00> : vector<6x128xf32>
    %105 = tpu.matmul %100, %104, %cst_43 {dimension_numbers = #tpu.dot_dimension_numbers<[1], [0], [0], [1], [0, 0, 1, 1], [], []>} : vector<6x24xbf16>, vector<24x128xbf16>, vector<6x128xf32> -> vector<6x128xf32>
    %106 = vector.broadcast %101 : vector<6x1xf32> to vector<6x128xf32>
    %107 = arith.addf %105, %106 : vector<6x128xf32>
    %cst_44 = arith.constant 0.000000e+00 : f32
    %108 = vector.broadcast %cst_44 : f32 to vector<6x128xf32>
    %109 = arith.maximumf %107, %108 : vector<6x128xf32>
    %cst_45 = arith.constant 0.000000e+00 : f32
    %110 = vector.broadcast %cst_45 : f32 to vector<6x128xf32>
    %c9_i32 = arith.constant 9 : i32
    %111 = tpu.dynamic_rotate %109 by %c9_i32 dim 1 : vector<6x128xf32>, i32 -> vector<6x128xf32>
    %c0_46 = arith.constant 0 : index
    %c0_47 = arith.constant 0 : index
    %112 = vector.load %arg16[%c0_46, %c0_47] : memref<9x128xf32, #tpu.memory_space<vmem>>, vector<1x128xf32>
    %113 = vector.broadcast %112 : vector<1x128xf32> to vector<6x128xf32>
    %114 = arith.mulf %111, %113 : vector<6x128xf32>
    %115 = vector.extract_strided_slice %102 {offsets = [0, 0], sizes = [6, 1], strides = [1, 1]} : vector<6x9xf32> to vector<6x1xf32>
    %116 = vector.broadcast %115 : vector<6x1xf32> to vector<6x128xf32>
    %117 = arith.mulf %114, %116 : vector<6x128xf32>
    %118 = arith.addf %110, %117 : vector<6x128xf32>
    %c8_i32 = arith.constant 8 : i32
    %119 = tpu.dynamic_rotate %109 by %c8_i32 dim 1 : vector<6x128xf32>, i32 -> vector<6x128xf32>
    %c1_48 = arith.constant 1 : index
    %c0_49 = arith.constant 0 : index
    %120 = vector.load %arg16[%c1_48, %c0_49] : memref<9x128xf32, #tpu.memory_space<vmem>>, vector<1x128xf32>
    %121 = vector.broadcast %120 : vector<1x128xf32> to vector<6x128xf32>
    %122 = arith.mulf %119, %121 : vector<6x128xf32>
    %123 = vector.extract_strided_slice %102 {offsets = [0, 1], sizes = [6, 1], strides = [1, 1]} : vector<6x9xf32> to vector<6x1xf32>
    %124 = vector.broadcast %123 : vector<6x1xf32> to vector<6x128xf32>
    %125 = arith.mulf %122, %124 : vector<6x128xf32>
    %126 = arith.addf %118, %125 : vector<6x128xf32>
    %c7_i32 = arith.constant 7 : i32
    %127 = tpu.dynamic_rotate %109 by %c7_i32 dim 1 : vector<6x128xf32>, i32 -> vector<6x128xf32>
    %c2_50 = arith.constant 2 : index
    %c0_51 = arith.constant 0 : index
    %128 = vector.load %arg16[%c2_50, %c0_51] : memref<9x128xf32, #tpu.memory_space<vmem>>, vector<1x128xf32>
    %129 = vector.broadcast %128 : vector<1x128xf32> to vector<6x128xf32>
    %130 = arith.mulf %127, %129 : vector<6x128xf32>
    %131 = vector.extract_strided_slice %102 {offsets = [0, 2], sizes = [6, 1], strides = [1, 1]} : vector<6x9xf32> to vector<6x1xf32>
    %132 = vector.broadcast %131 : vector<6x1xf32> to vector<6x128xf32>
    %133 = arith.mulf %130, %132 : vector<6x128xf32>
    %134 = arith.addf %126, %133 : vector<6x128xf32>
    %c1_i32_52 = arith.constant 1 : i32
    %135 = tpu.dynamic_rotate %109 by %c1_i32_52 dim 1 : vector<6x128xf32>, i32 -> vector<6x128xf32>
    %c3_53 = arith.constant 3 : index
    %c0_54 = arith.constant 0 : index
    %136 = vector.load %arg16[%c3_53, %c0_54] : memref<9x128xf32, #tpu.memory_space<vmem>>, vector<1x128xf32>
    %137 = vector.broadcast %136 : vector<1x128xf32> to vector<6x128xf32>
    %138 = arith.mulf %135, %137 : vector<6x128xf32>
    %139 = vector.extract_strided_slice %102 {offsets = [0, 3], sizes = [6, 1], strides = [1, 1]} : vector<6x9xf32> to vector<6x1xf32>
    %140 = vector.broadcast %139 : vector<6x1xf32> to vector<6x128xf32>
    %141 = arith.mulf %138, %140 : vector<6x128xf32>
    %142 = arith.addf %134, %141 : vector<6x128xf32>
    %c4_55 = arith.constant 4 : index
    %c0_56 = arith.constant 0 : index
    %143 = vector.load %arg16[%c4_55, %c0_56] : memref<9x128xf32, #tpu.memory_space<vmem>>, vector<1x128xf32>
    %144 = vector.broadcast %143 : vector<1x128xf32> to vector<6x128xf32>
    %145 = arith.mulf %109, %144 : vector<6x128xf32>
    %146 = vector.extract_strided_slice %102 {offsets = [0, 4], sizes = [6, 1], strides = [1, 1]} : vector<6x9xf32> to vector<6x1xf32>
    %147 = vector.broadcast %146 : vector<6x1xf32> to vector<6x128xf32>
    %148 = arith.mulf %145, %147 : vector<6x128xf32>
    %149 = arith.addf %142, %148 : vector<6x128xf32>
    %c127_i32 = arith.constant 127 : i32
    %150 = tpu.dynamic_rotate %109 by %c127_i32 dim 1 : vector<6x128xf32>, i32 -> vector<6x128xf32>
    %c5_57 = arith.constant 5 : index
    %c0_58 = arith.constant 0 : index
    %151 = vector.load %arg16[%c5_57, %c0_58] : memref<9x128xf32, #tpu.memory_space<vmem>>, vector<1x128xf32>
    %152 = vector.broadcast %151 : vector<1x128xf32> to vector<6x128xf32>
    %153 = arith.mulf %150, %152 : vector<6x128xf32>
    %154 = vector.extract_strided_slice %102 {offsets = [0, 5], sizes = [6, 1], strides = [1, 1]} : vector<6x9xf32> to vector<6x1xf32>
    %155 = vector.broadcast %154 : vector<6x1xf32> to vector<6x128xf32>
    %156 = arith.mulf %153, %155 : vector<6x128xf32>
    %157 = arith.addf %149, %156 : vector<6x128xf32>
    %c121_i32 = arith.constant 121 : i32
    %158 = tpu.dynamic_rotate %109 by %c121_i32 dim 1 : vector<6x128xf32>, i32 -> vector<6x128xf32>
    %c6_59 = arith.constant 6 : index
    %c0_60 = arith.constant 0 : index
    %159 = vector.load %arg16[%c6_59, %c0_60] : memref<9x128xf32, #tpu.memory_space<vmem>>, vector<1x128xf32>
    %160 = vector.broadcast %159 : vector<1x128xf32> to vector<6x128xf32>
    %161 = arith.mulf %158, %160 : vector<6x128xf32>
    %162 = vector.extract_strided_slice %102 {offsets = [0, 6], sizes = [6, 1], strides = [1, 1]} : vector<6x9xf32> to vector<6x1xf32>
    %163 = vector.broadcast %162 : vector<6x1xf32> to vector<6x128xf32>
    %164 = arith.mulf %161, %163 : vector<6x128xf32>
    %165 = arith.addf %157, %164 : vector<6x128xf32>
    %c120_i32 = arith.constant 120 : i32
    %166 = tpu.dynamic_rotate %109 by %c120_i32 dim 1 : vector<6x128xf32>, i32 -> vector<6x128xf32>
    %c7_61 = arith.constant 7 : index
    %c0_62 = arith.constant 0 : index
    %167 = vector.load %arg16[%c7_61, %c0_62] : memref<9x128xf32, #tpu.memory_space<vmem>>, vector<1x128xf32>
    %168 = vector.broadcast %167 : vector<1x128xf32> to vector<6x128xf32>
    %169 = arith.mulf %166, %168 : vector<6x128xf32>
    %170 = vector.extract_strided_slice %102 {offsets = [0, 7], sizes = [6, 1], strides = [1, 1]} : vector<6x9xf32> to vector<6x1xf32>
    %171 = vector.broadcast %170 : vector<6x1xf32> to vector<6x128xf32>
    %172 = arith.mulf %169, %171 : vector<6x128xf32>
    %173 = arith.addf %165, %172 : vector<6x128xf32>
    %c119_i32 = arith.constant 119 : i32
    %174 = tpu.dynamic_rotate %109 by %c119_i32 dim 1 : vector<6x128xf32>, i32 -> vector<6x128xf32>
    %c8_63 = arith.constant 8 : index
    %c0_64 = arith.constant 0 : index
    %175 = vector.load %arg16[%c8_63, %c0_64] : memref<9x128xf32, #tpu.memory_space<vmem>>, vector<1x128xf32>
    %176 = vector.broadcast %175 : vector<1x128xf32> to vector<6x128xf32>
    %177 = arith.mulf %174, %176 : vector<6x128xf32>
    %178 = vector.extract_strided_slice %102 {offsets = [0, 8], sizes = [6, 1], strides = [1, 1]} : vector<6x9xf32> to vector<6x1xf32>
    %179 = vector.broadcast %178 : vector<6x1xf32> to vector<6x128xf32>
    %180 = arith.mulf %177, %179 : vector<6x128xf32>
    %181 = arith.addf %173, %180 : vector<6x128xf32>
    %182 = vector.broadcast %103 : vector<6x1xf32> to vector<6x128xf32>
    %183 = arith.addf %181, %182 : vector<6x128xf32>
    %cst_65 = arith.constant 0.000000e+00 : f32
    %184 = vector.broadcast %cst_65 : f32 to vector<6x128xf32>
    %185 = arith.maximumf %183, %184 : vector<6x128xf32>
    %c0_66 = arith.constant 0 : index
    %c0_67 = arith.constant 0 : index
    %186 = vector.load %arg17[%c0_66, %c0_67] : memref<24x6xbf16, #tpu.memory_space<vmem>>, vector<24x6xbf16>
    %c0_68 = arith.constant 0 : index
    %c0_69 = arith.constant 0 : index
    %187 = vector.load %arg18[%c0_68, %c0_69] : memref<24x1xf32, #tpu.memory_space<vmem>>, vector<24x1xf32>
    %188 = arith.truncf %185 : vector<6x128xf32> to vector<6x128xbf16>
    %cst_70 = arith.constant dense<0.000000e+00> : vector<24x128xf32>
    %189 = tpu.matmul %186, %188, %cst_70 {dimension_numbers = #tpu.dot_dimension_numbers<[1], [0], [0], [1], [0, 0, 1, 1], [], []>} : vector<24x6xbf16>, vector<6x128xbf16>, vector<24x128xf32> -> vector<24x128xf32>
    %190 = vector.broadcast %187 : vector<24x1xf32> to vector<24x128xf32>
    %191 = arith.addf %189, %190 : vector<24x128xf32>
    %c0_71 = arith.constant 0 : index
    %c0_72 = arith.constant 0 : index
    %192 = vector.load %arg19[%c0_71, %c0_72] : memref<24x24xbf16, #tpu.memory_space<vmem>>, vector<24x24xbf16>
    %c0_73 = arith.constant 0 : index
    %c0_74 = arith.constant 0 : index
    %193 = vector.load %arg20[%c0_73, %c0_74] : memref<24x1xf32, #tpu.memory_space<vmem>>, vector<24x1xf32>
    %194 = arith.truncf %99 : vector<24x128xf32> to vector<24x128xbf16>
    %cst_75 = arith.constant dense<0.000000e+00> : vector<24x128xf32>
    %195 = tpu.matmul %192, %194, %cst_75 {dimension_numbers = #tpu.dot_dimension_numbers<[1], [0], [0], [1], [0, 0, 1, 1], [], []>} : vector<24x24xbf16>, vector<24x128xbf16>, vector<24x128xf32> -> vector<24x128xf32>
    %196 = arith.addf %191, %195 : vector<24x128xf32>
    %197 = vector.broadcast %193 : vector<24x1xf32> to vector<24x128xf32>
    %198 = arith.addf %196, %197 : vector<24x128xf32>
    %c0_76 = arith.constant 0 : index
    %c0_77 = arith.constant 0 : index
    %199 = vector.load %arg21[%c0_76, %c0_77] : memref<12x24xbf16, #tpu.memory_space<vmem>>, vector<12x24xbf16>
    %c0_78 = arith.constant 0 : index
    %c0_79 = arith.constant 0 : index
    %200 = vector.load %arg22[%c0_78, %c0_79] : memref<12x1xf32, #tpu.memory_space<vmem>>, vector<12x1xf32>
    %c0_80 = arith.constant 0 : index
    %c0_81 = arith.constant 0 : index
    %201 = vector.load %arg23[%c0_80, %c0_81] : memref<12x9xf32, #tpu.memory_space<vmem>>, vector<12x9xf32>
    %c0_82 = arith.constant 0 : index
    %c0_83 = arith.constant 0 : index
    %202 = vector.load %arg24[%c0_82, %c0_83] : memref<12x1xf32, #tpu.memory_space<vmem>>, vector<12x1xf32>
    %203 = arith.truncf %198 : vector<24x128xf32> to vector<24x128xbf16>
    %cst_84 = arith.constant dense<0.000000e+00> : vector<12x128xf32>
    %204 = tpu.matmul %199, %203, %cst_84 {dimension_numbers = #tpu.dot_dimension_numbers<[1], [0], [0], [1], [0, 0, 1, 1], [], []>} : vector<12x24xbf16>, vector<24x128xbf16>, vector<12x128xf32> -> vector<12x128xf32>
    %205 = vector.broadcast %200 : vector<12x1xf32> to vector<12x128xf32>
    %206 = arith.addf %204, %205 : vector<12x128xf32>
    %cst_85 = arith.constant 0.000000e+00 : f32
    %207 = vector.broadcast %cst_85 : f32 to vector<12x128xf32>
    %208 = arith.maximumf %206, %207 : vector<12x128xf32>
    %cst_86 = arith.constant 0.000000e+00 : f32
    %209 = vector.broadcast %cst_86 : f32 to vector<12x128xf32>
    %c9_i32_87 = arith.constant 9 : i32
    %210 = tpu.dynamic_rotate %208 by %c9_i32_87 dim 1 : vector<12x128xf32>, i32 -> vector<12x128xf32>
    %c0_88 = arith.constant 0 : index
    %c0_89 = arith.constant 0 : index
    %211 = vector.load %arg25[%c0_88, %c0_89] : memref<9x128xf32, #tpu.memory_space<vmem>>, vector<1x128xf32>
    %212 = vector.broadcast %211 : vector<1x128xf32> to vector<12x128xf32>
    %213 = arith.mulf %210, %212 : vector<12x128xf32>
    %214 = vector.extract_strided_slice %201 {offsets = [0, 0], sizes = [12, 1], strides = [1, 1]} : vector<12x9xf32> to vector<12x1xf32>
    %215 = vector.broadcast %214 : vector<12x1xf32> to vector<12x128xf32>
    %216 = arith.mulf %213, %215 : vector<12x128xf32>
    %217 = arith.addf %209, %216 : vector<12x128xf32>
    %c8_i32_90 = arith.constant 8 : i32
    %218 = tpu.dynamic_rotate %208 by %c8_i32_90 dim 1 : vector<12x128xf32>, i32 -> vector<12x128xf32>
    %c1_91 = arith.constant 1 : index
    %c0_92 = arith.constant 0 : index
    %219 = vector.load %arg25[%c1_91, %c0_92] : memref<9x128xf32, #tpu.memory_space<vmem>>, vector<1x128xf32>
    %220 = vector.broadcast %219 : vector<1x128xf32> to vector<12x128xf32>
    %221 = arith.mulf %218, %220 : vector<12x128xf32>
    %222 = vector.extract_strided_slice %201 {offsets = [0, 1], sizes = [12, 1], strides = [1, 1]} : vector<12x9xf32> to vector<12x1xf32>
    %223 = vector.broadcast %222 : vector<12x1xf32> to vector<12x128xf32>
    %224 = arith.mulf %221, %223 : vector<12x128xf32>
    %225 = arith.addf %217, %224 : vector<12x128xf32>
    %c7_i32_93 = arith.constant 7 : i32
    %226 = tpu.dynamic_rotate %208 by %c7_i32_93 dim 1 : vector<12x128xf32>, i32 -> vector<12x128xf32>
    %c2_94 = arith.constant 2 : index
    %c0_95 = arith.constant 0 : index
    %227 = vector.load %arg25[%c2_94, %c0_95] : memref<9x128xf32, #tpu.memory_space<vmem>>, vector<1x128xf32>
    %228 = vector.broadcast %227 : vector<1x128xf32> to vector<12x128xf32>
    %229 = arith.mulf %226, %228 : vector<12x128xf32>
    %230 = vector.extract_strided_slice %201 {offsets = [0, 2], sizes = [12, 1], strides = [1, 1]} : vector<12x9xf32> to vector<12x1xf32>
    %231 = vector.broadcast %230 : vector<12x1xf32> to vector<12x128xf32>
    %232 = arith.mulf %229, %231 : vector<12x128xf32>
    %233 = arith.addf %225, %232 : vector<12x128xf32>
    %c1_i32_96 = arith.constant 1 : i32
    %234 = tpu.dynamic_rotate %208 by %c1_i32_96 dim 1 : vector<12x128xf32>, i32 -> vector<12x128xf32>
    %c3_97 = arith.constant 3 : index
    %c0_98 = arith.constant 0 : index
    %235 = vector.load %arg25[%c3_97, %c0_98] : memref<9x128xf32, #tpu.memory_space<vmem>>, vector<1x128xf32>
    %236 = vector.broadcast %235 : vector<1x128xf32> to vector<12x128xf32>
    %237 = arith.mulf %234, %236 : vector<12x128xf32>
    %238 = vector.extract_strided_slice %201 {offsets = [0, 3], sizes = [12, 1], strides = [1, 1]} : vector<12x9xf32> to vector<12x1xf32>
    %239 = vector.broadcast %238 : vector<12x1xf32> to vector<12x128xf32>
    %240 = arith.mulf %237, %239 : vector<12x128xf32>
    %241 = arith.addf %233, %240 : vector<12x128xf32>
    %c4_99 = arith.constant 4 : index
    %c0_100 = arith.constant 0 : index
    %242 = vector.load %arg25[%c4_99, %c0_100] : memref<9x128xf32, #tpu.memory_space<vmem>>, vector<1x128xf32>
    %243 = vector.broadcast %242 : vector<1x128xf32> to vector<12x128xf32>
    %244 = arith.mulf %208, %243 : vector<12x128xf32>
    %245 = vector.extract_strided_slice %201 {offsets = [0, 4], sizes = [12, 1], strides = [1, 1]} : vector<12x9xf32> to vector<12x1xf32>
    %246 = vector.broadcast %245 : vector<12x1xf32> to vector<12x128xf32>
    %247 = arith.mulf %244, %246 : vector<12x128xf32>
    %248 = arith.addf %241, %247 : vector<12x128xf32>
    %c127_i32_101 = arith.constant 127 : i32
    %249 = tpu.dynamic_rotate %208 by %c127_i32_101 dim 1 : vector<12x128xf32>, i32 -> vector<12x128xf32>
    %c5_102 = arith.constant 5 : index
    %c0_103 = arith.constant 0 : index
    %250 = vector.load %arg25[%c5_102, %c0_103] : memref<9x128xf32, #tpu.memory_space<vmem>>, vector<1x128xf32>
    %251 = vector.broadcast %250 : vector<1x128xf32> to vector<12x128xf32>
    %252 = arith.mulf %249, %251 : vector<12x128xf32>
    %253 = vector.extract_strided_slice %201 {offsets = [0, 5], sizes = [12, 1], strides = [1, 1]} : vector<12x9xf32> to vector<12x1xf32>
    %254 = vector.broadcast %253 : vector<12x1xf32> to vector<12x128xf32>
    %255 = arith.mulf %252, %254 : vector<12x128xf32>
    %256 = arith.addf %248, %255 : vector<12x128xf32>
    %c121_i32_104 = arith.constant 121 : i32
    %257 = tpu.dynamic_rotate %208 by %c121_i32_104 dim 1 : vector<12x128xf32>, i32 -> vector<12x128xf32>
    %c6_105 = arith.constant 6 : index
    %c0_106 = arith.constant 0 : index
    %258 = vector.load %arg25[%c6_105, %c0_106] : memref<9x128xf32, #tpu.memory_space<vmem>>, vector<1x128xf32>
    %259 = vector.broadcast %258 : vector<1x128xf32> to vector<12x128xf32>
    %260 = arith.mulf %257, %259 : vector<12x128xf32>
    %261 = vector.extract_strided_slice %201 {offsets = [0, 6], sizes = [12, 1], strides = [1, 1]} : vector<12x9xf32> to vector<12x1xf32>
    %262 = vector.broadcast %261 : vector<12x1xf32> to vector<12x128xf32>
    %263 = arith.mulf %260, %262 : vector<12x128xf32>
    %264 = arith.addf %256, %263 : vector<12x128xf32>
    %c120_i32_107 = arith.constant 120 : i32
    %265 = tpu.dynamic_rotate %208 by %c120_i32_107 dim 1 : vector<12x128xf32>, i32 -> vector<12x128xf32>
    %c7_108 = arith.constant 7 : index
    %c0_109 = arith.constant 0 : index
    %266 = vector.load %arg25[%c7_108, %c0_109] : memref<9x128xf32, #tpu.memory_space<vmem>>, vector<1x128xf32>
    %267 = vector.broadcast %266 : vector<1x128xf32> to vector<12x128xf32>
    %268 = arith.mulf %265, %267 : vector<12x128xf32>
    %269 = vector.extract_strided_slice %201 {offsets = [0, 7], sizes = [12, 1], strides = [1, 1]} : vector<12x9xf32> to vector<12x1xf32>
    %270 = vector.broadcast %269 : vector<12x1xf32> to vector<12x128xf32>
    %271 = arith.mulf %268, %270 : vector<12x128xf32>
    %272 = arith.addf %264, %271 : vector<12x128xf32>
    %c119_i32_110 = arith.constant 119 : i32
    %273 = tpu.dynamic_rotate %208 by %c119_i32_110 dim 1 : vector<12x128xf32>, i32 -> vector<12x128xf32>
    %c8_111 = arith.constant 8 : index
    %c0_112 = arith.constant 0 : index
    %274 = vector.load %arg25[%c8_111, %c0_112] : memref<9x128xf32, #tpu.memory_space<vmem>>, vector<1x128xf32>
    %275 = vector.broadcast %274 : vector<1x128xf32> to vector<12x128xf32>
    %276 = arith.mulf %273, %275 : vector<12x128xf32>
    %277 = vector.extract_strided_slice %201 {offsets = [0, 8], sizes = [12, 1], strides = [1, 1]} : vector<12x9xf32> to vector<12x1xf32>
    %278 = vector.broadcast %277 : vector<12x1xf32> to vector<12x128xf32>
    %279 = arith.mulf %276, %278 : vector<12x128xf32>
    %280 = arith.addf %272, %279 : vector<12x128xf32>
    %c0_113 = arith.constant 0 : index
    %c0_114 = arith.constant 0 : index
    %281 = vector.load %arg26[%c0_113, %c0_114] : memref<128x128xf32, #tpu.memory_space<vmem>>, vector<128x128xf32>
    %cst_115 = arith.constant dense<0.000000e+00> : vector<12x128xf32>
    %282 = tpu.matmul %280, %281, %cst_115 {dimension_numbers = #tpu.dot_dimension_numbers<[1], [0], [0], [1], [0, 0, 1, 1], [], []>} : vector<12x128xf32>, vector<128x128xf32>, vector<12x128xf32> -> vector<12x128xf32>
    %283 = vector.broadcast %202 : vector<12x1xf32> to vector<12x128xf32>
    %284 = arith.addf %282, %283 : vector<12x128xf32>
    %cst_116 = arith.constant 0.000000e+00 : f32
    %285 = vector.broadcast %cst_116 : f32 to vector<12x128xf32>
    %286 = arith.maximumf %284, %285 : vector<12x128xf32>
    %c0_117 = arith.constant 0 : index
    %c0_118 = arith.constant 0 : index
    %287 = vector.load %arg27[%c0_117, %c0_118] : memref<48x12xbf16, #tpu.memory_space<vmem>>, vector<48x12xbf16>
    %c0_119 = arith.constant 0 : index
    %c0_120 = arith.constant 0 : index
    %288 = vector.load %arg28[%c0_119, %c0_120] : memref<48x1xf32, #tpu.memory_space<vmem>>, vector<48x1xf32>
    %289 = arith.truncf %286 : vector<12x128xf32> to vector<12x128xbf16>
    %cst_121 = arith.constant dense<0.000000e+00> : vector<48x128xf32>
    %290 = tpu.matmul %287, %289, %cst_121 {dimension_numbers = #tpu.dot_dimension_numbers<[1], [0], [0], [1], [0, 0, 1, 1], [], []>} : vector<48x12xbf16>, vector<12x128xbf16>, vector<48x128xf32> -> vector<48x128xf32>
    %291 = vector.broadcast %288 : vector<48x1xf32> to vector<48x128xf32>
    %292 = arith.addf %290, %291 : vector<48x128xf32>
    %c0_122 = arith.constant 0 : index
    %c0_123 = arith.constant 0 : index
    %293 = vector.load %arg29[%c0_122, %c0_123] : memref<12x48xbf16, #tpu.memory_space<vmem>>, vector<12x48xbf16>
    %c0_124 = arith.constant 0 : index
    %c0_125 = arith.constant 0 : index
    %294 = vector.load %arg30[%c0_124, %c0_125] : memref<12x1xf32, #tpu.memory_space<vmem>>, vector<12x1xf32>
    %c0_126 = arith.constant 0 : index
    %c0_127 = arith.constant 0 : index
    %295 = vector.load %arg31[%c0_126, %c0_127] : memref<12x9xf32, #tpu.memory_space<vmem>>, vector<12x9xf32>
    %c0_128 = arith.constant 0 : index
    %c0_129 = arith.constant 0 : index
    %296 = vector.load %arg32[%c0_128, %c0_129] : memref<12x1xf32, #tpu.memory_space<vmem>>, vector<12x1xf32>
    %297 = arith.truncf %292 : vector<48x128xf32> to vector<48x128xbf16>
    %cst_130 = arith.constant dense<0.000000e+00> : vector<12x128xf32>
    %298 = tpu.matmul %293, %297, %cst_130 {dimension_numbers = #tpu.dot_dimension_numbers<[1], [0], [0], [1], [0, 0, 1, 1], [], []>} : vector<12x48xbf16>, vector<48x128xbf16>, vector<12x128xf32> -> vector<12x128xf32>
    %299 = vector.broadcast %294 : vector<12x1xf32> to vector<12x128xf32>
    %300 = arith.addf %298, %299 : vector<12x128xf32>
    %cst_131 = arith.constant 0.000000e+00 : f32
    %301 = vector.broadcast %cst_131 : f32 to vector<12x128xf32>
    %302 = arith.maximumf %300, %301 : vector<12x128xf32>
    %cst_132 = arith.constant 0.000000e+00 : f32
    %303 = vector.broadcast %cst_132 : f32 to vector<12x128xf32>
    %c5_i32 = arith.constant 5 : i32
    %304 = tpu.dynamic_rotate %302 by %c5_i32 dim 1 : vector<12x128xf32>, i32 -> vector<12x128xf32>
    %c0_133 = arith.constant 0 : index
    %c0_134 = arith.constant 0 : index
    %305 = vector.load %arg33[%c0_133, %c0_134] : memref<9x128xf32, #tpu.memory_space<vmem>>, vector<1x128xf32>
    %306 = vector.broadcast %305 : vector<1x128xf32> to vector<12x128xf32>
    %307 = arith.mulf %304, %306 : vector<12x128xf32>
    %308 = vector.extract_strided_slice %295 {offsets = [0, 0], sizes = [12, 1], strides = [1, 1]} : vector<12x9xf32> to vector<12x1xf32>
    %309 = vector.broadcast %308 : vector<12x1xf32> to vector<12x128xf32>
    %310 = arith.mulf %307, %309 : vector<12x128xf32>
    %311 = arith.addf %303, %310 : vector<12x128xf32>
    %c4_i32 = arith.constant 4 : i32
    %312 = tpu.dynamic_rotate %302 by %c4_i32 dim 1 : vector<12x128xf32>, i32 -> vector<12x128xf32>
    %c1_135 = arith.constant 1 : index
    %c0_136 = arith.constant 0 : index
    %313 = vector.load %arg33[%c1_135, %c0_136] : memref<9x128xf32, #tpu.memory_space<vmem>>, vector<1x128xf32>
    %314 = vector.broadcast %313 : vector<1x128xf32> to vector<12x128xf32>
    %315 = arith.mulf %312, %314 : vector<12x128xf32>
    %316 = vector.extract_strided_slice %295 {offsets = [0, 1], sizes = [12, 1], strides = [1, 1]} : vector<12x9xf32> to vector<12x1xf32>
    %317 = vector.broadcast %316 : vector<12x1xf32> to vector<12x128xf32>
    %318 = arith.mulf %315, %317 : vector<12x128xf32>
    %319 = arith.addf %311, %318 : vector<12x128xf32>
    %c3_i32 = arith.constant 3 : i32
    %320 = tpu.dynamic_rotate %302 by %c3_i32 dim 1 : vector<12x128xf32>, i32 -> vector<12x128xf32>
    %c2_137 = arith.constant 2 : index
    %c0_138 = arith.constant 0 : index
    %321 = vector.load %arg33[%c2_137, %c0_138] : memref<9x128xf32, #tpu.memory_space<vmem>>, vector<1x128xf32>
    %322 = vector.broadcast %321 : vector<1x128xf32> to vector<12x128xf32>
    %323 = arith.mulf %320, %322 : vector<12x128xf32>
    %324 = vector.extract_strided_slice %295 {offsets = [0, 2], sizes = [12, 1], strides = [1, 1]} : vector<12x9xf32> to vector<12x1xf32>
    %325 = vector.broadcast %324 : vector<12x1xf32> to vector<12x128xf32>
    %326 = arith.mulf %323, %325 : vector<12x128xf32>
    %327 = arith.addf %319, %326 : vector<12x128xf32>
    %c1_i32_139 = arith.constant 1 : i32
    %328 = tpu.dynamic_rotate %302 by %c1_i32_139 dim 1 : vector<12x128xf32>, i32 -> vector<12x128xf32>
    %c3_140 = arith.constant 3 : index
    %c0_141 = arith.constant 0 : index
    %329 = vector.load %arg33[%c3_140, %c0_141] : memref<9x128xf32, #tpu.memory_space<vmem>>, vector<1x128xf32>
    %330 = vector.broadcast %329 : vector<1x128xf32> to vector<12x128xf32>
    %331 = arith.mulf %328, %330 : vector<12x128xf32>
    %332 = vector.extract_strided_slice %295 {offsets = [0, 3], sizes = [12, 1], strides = [1, 1]} : vector<12x9xf32> to vector<12x1xf32>
    %333 = vector.broadcast %332 : vector<12x1xf32> to vector<12x128xf32>
    %334 = arith.mulf %331, %333 : vector<12x128xf32>
    %335 = arith.addf %327, %334 : vector<12x128xf32>
    %c4_142 = arith.constant 4 : index
    %c0_143 = arith.constant 0 : index
    %336 = vector.load %arg33[%c4_142, %c0_143] : memref<9x128xf32, #tpu.memory_space<vmem>>, vector<1x128xf32>
    %337 = vector.broadcast %336 : vector<1x128xf32> to vector<12x128xf32>
    %338 = arith.mulf %302, %337 : vector<12x128xf32>
    %339 = vector.extract_strided_slice %295 {offsets = [0, 4], sizes = [12, 1], strides = [1, 1]} : vector<12x9xf32> to vector<12x1xf32>
    %340 = vector.broadcast %339 : vector<12x1xf32> to vector<12x128xf32>
    %341 = arith.mulf %338, %340 : vector<12x128xf32>
    %342 = arith.addf %335, %341 : vector<12x128xf32>
    %c127_i32_144 = arith.constant 127 : i32
    %343 = tpu.dynamic_rotate %302 by %c127_i32_144 dim 1 : vector<12x128xf32>, i32 -> vector<12x128xf32>
    %c5_145 = arith.constant 5 : index
    %c0_146 = arith.constant 0 : index
    %344 = vector.load %arg33[%c5_145, %c0_146] : memref<9x128xf32, #tpu.memory_space<vmem>>, vector<1x128xf32>
    %345 = vector.broadcast %344 : vector<1x128xf32> to vector<12x128xf32>
    %346 = arith.mulf %343, %345 : vector<12x128xf32>
    %347 = vector.extract_strided_slice %295 {offsets = [0, 5], sizes = [12, 1], strides = [1, 1]} : vector<12x9xf32> to vector<12x1xf32>
    %348 = vector.broadcast %347 : vector<12x1xf32> to vector<12x128xf32>
    %349 = arith.mulf %346, %348 : vector<12x128xf32>
    %350 = arith.addf %342, %349 : vector<12x128xf32>
    %c125_i32 = arith.constant 125 : i32
    %351 = tpu.dynamic_rotate %302 by %c125_i32 dim 1 : vector<12x128xf32>, i32 -> vector<12x128xf32>
    %c6_147 = arith.constant 6 : index
    %c0_148 = arith.constant 0 : index
    %352 = vector.load %arg33[%c6_147, %c0_148] : memref<9x128xf32, #tpu.memory_space<vmem>>, vector<1x128xf32>
    %353 = vector.broadcast %352 : vector<1x128xf32> to vector<12x128xf32>
    %354 = arith.mulf %351, %353 : vector<12x128xf32>
    %355 = vector.extract_strided_slice %295 {offsets = [0, 6], sizes = [12, 1], strides = [1, 1]} : vector<12x9xf32> to vector<12x1xf32>
    %356 = vector.broadcast %355 : vector<12x1xf32> to vector<12x128xf32>
    %357 = arith.mulf %354, %356 : vector<12x128xf32>
    %358 = arith.addf %350, %357 : vector<12x128xf32>
    %c124_i32 = arith.constant 124 : i32
    %359 = tpu.dynamic_rotate %302 by %c124_i32 dim 1 : vector<12x128xf32>, i32 -> vector<12x128xf32>
    %c7_149 = arith.constant 7 : index
    %c0_150 = arith.constant 0 : index
    %360 = vector.load %arg33[%c7_149, %c0_150] : memref<9x128xf32, #tpu.memory_space<vmem>>, vector<1x128xf32>
    %361 = vector.broadcast %360 : vector<1x128xf32> to vector<12x128xf32>
    %362 = arith.mulf %359, %361 : vector<12x128xf32>
    %363 = vector.extract_strided_slice %295 {offsets = [0, 7], sizes = [12, 1], strides = [1, 1]} : vector<12x9xf32> to vector<12x1xf32>
    %364 = vector.broadcast %363 : vector<12x1xf32> to vector<12x128xf32>
    %365 = arith.mulf %362, %364 : vector<12x128xf32>
    %366 = arith.addf %358, %365 : vector<12x128xf32>
    %c123_i32 = arith.constant 123 : i32
    %367 = tpu.dynamic_rotate %302 by %c123_i32 dim 1 : vector<12x128xf32>, i32 -> vector<12x128xf32>
    %c8_151 = arith.constant 8 : index
    %c0_152 = arith.constant 0 : index
    %368 = vector.load %arg33[%c8_151, %c0_152] : memref<9x128xf32, #tpu.memory_space<vmem>>, vector<1x128xf32>
    %369 = vector.broadcast %368 : vector<1x128xf32> to vector<12x128xf32>
    %370 = arith.mulf %367, %369 : vector<12x128xf32>
    %371 = vector.extract_strided_slice %295 {offsets = [0, 8], sizes = [12, 1], strides = [1, 1]} : vector<12x9xf32> to vector<12x1xf32>
    %372 = vector.broadcast %371 : vector<12x1xf32> to vector<12x128xf32>
    %373 = arith.mulf %370, %372 : vector<12x128xf32>
    %374 = arith.addf %366, %373 : vector<12x128xf32>
    %375 = vector.broadcast %296 : vector<12x1xf32> to vector<12x128xf32>
    %376 = arith.addf %374, %375 : vector<12x128xf32>
    %cst_153 = arith.constant 0.000000e+00 : f32
    %377 = vector.broadcast %cst_153 : f32 to vector<12x128xf32>
    %378 = arith.maximumf %376, %377 : vector<12x128xf32>
    %c0_154 = arith.constant 0 : index
    %c0_155 = arith.constant 0 : index
    %379 = vector.load %arg34[%c0_154, %c0_155] : memref<48x12xbf16, #tpu.memory_space<vmem>>, vector<48x12xbf16>
    %c0_156 = arith.constant 0 : index
    %c0_157 = arith.constant 0 : index
    %380 = vector.load %arg35[%c0_156, %c0_157] : memref<48x1xf32, #tpu.memory_space<vmem>>, vector<48x1xf32>
    %381 = arith.truncf %378 : vector<12x128xf32> to vector<12x128xbf16>
    %cst_158 = arith.constant dense<0.000000e+00> : vector<48x128xf32>
    %382 = tpu.matmul %379, %381, %cst_158 {dimension_numbers = #tpu.dot_dimension_numbers<[1], [0], [0], [1], [0, 0, 1, 1], [], []>} : vector<48x12xbf16>, vector<12x128xbf16>, vector<48x128xf32> -> vector<48x128xf32>
    %383 = vector.broadcast %380 : vector<48x1xf32> to vector<48x128xf32>
    %384 = arith.addf %382, %383 : vector<48x128xf32>
    %c0_159 = arith.constant 0 : index
    %c0_160 = arith.constant 0 : index
    %385 = vector.load %arg36[%c0_159, %c0_160] : memref<48x48xbf16, #tpu.memory_space<vmem>>, vector<48x48xbf16>
    %c0_161 = arith.constant 0 : index
    %c0_162 = arith.constant 0 : index
    %386 = vector.load %arg37[%c0_161, %c0_162] : memref<48x1xf32, #tpu.memory_space<vmem>>, vector<48x1xf32>
    %387 = arith.truncf %292 : vector<48x128xf32> to vector<48x128xbf16>
    %cst_163 = arith.constant dense<0.000000e+00> : vector<48x128xf32>
    %388 = tpu.matmul %385, %387, %cst_163 {dimension_numbers = #tpu.dot_dimension_numbers<[1], [0], [0], [1], [0, 0, 1, 1], [], []>} : vector<48x48xbf16>, vector<48x128xbf16>, vector<48x128xf32> -> vector<48x128xf32>
    %389 = arith.addf %384, %388 : vector<48x128xf32>
    %390 = vector.broadcast %386 : vector<48x1xf32> to vector<48x128xf32>
    %391 = arith.addf %389, %390 : vector<48x128xf32>
    %c0_164 = arith.constant 0 : index
    %c0_165 = arith.constant 0 : index
    %392 = vector.load %arg38[%c0_164, %c0_165] : memref<128x128xf32, #tpu.memory_space<vmem>>, vector<128x128xf32>
    %c0_166 = arith.constant 0 : index
    %c0_167 = arith.constant 0 : index
    %393 = vector.load %arg39[%c0_166, %c0_167] : memref<128x48xbf16, #tpu.memory_space<vmem>>, vector<128x48xbf16>
    %c0_168 = arith.constant 0 : index
    %c0_169 = arith.constant 0 : index
    %394 = vector.load %arg40[%c0_168, %c0_169] : memref<128x1xf32, #tpu.memory_space<vmem>>, vector<128x1xf32>
    %cst_170 = arith.constant dense<0.000000e+00> : vector<48x128xf32>
    %395 = tpu.matmul %391, %392, %cst_170 {dimension_numbers = #tpu.dot_dimension_numbers<[1], [0], [0], [1], [0, 0, 1, 1], [], []>} : vector<48x128xf32>, vector<128x128xf32>, vector<48x128xf32> -> vector<48x128xf32>
    %396 = arith.truncf %395 : vector<48x128xf32> to vector<48x128xbf16>
    %cst_171 = arith.constant dense<0.000000e+00> : vector<128x128xf32>
    %397 = tpu.matmul %393, %396, %cst_171 {dimension_numbers = #tpu.dot_dimension_numbers<[1], [0], [0], [1], [0, 0, 1, 1], [], []>} : vector<128x48xbf16>, vector<48x128xbf16>, vector<128x128xf32> -> vector<128x128xf32>
    %398 = vector.broadcast %394 : vector<128x1xf32> to vector<128x128xf32>
    %399 = arith.addf %397, %398 : vector<128x128xf32>
    %c0_172 = arith.constant 0 : index
    %c0_173 = arith.constant 0 : index
    %400 = vector.load %arg41[%c0_172, %c0_173] : memref<128x128xf32, #tpu.memory_space<vmem>>, vector<128x128xf32>
    tpu.vector_store %arg41[%c0_172, %c0_173], %399 {strides = array<i32>} : memref<128x128xf32, #tpu.memory_space<vmem>>, vector<128x128xf32>,
    return
  }
  func.func @transform_0(%arg0: i32) -> (i32, i32) {
    %c0_i32 = arith.constant 0 : i32
    %c0_i32_0 = arith.constant 0 : i32
    return %c0_i32, %arg0 : i32, i32
  }
  func.func @transform_1(%arg0: i32) -> (i32, i32) {
    %c0_i32 = arith.constant 0 : i32
    %c0_i32_0 = arith.constant 0 : i32
    %c0_i32_1 = arith.constant 0 : i32
    return %c0_i32, %c0_i32_0 : i32, i32
  }
  func.func @transform_2(%arg0: i32) -> (i32, i32) {
    %c0_i32 = arith.constant 0 : i32
    %c0_i32_0 = arith.constant 0 : i32
    %c0_i32_1 = arith.constant 0 : i32
    return %c0_i32, %c0_i32_0 : i32, i32
  }
  func.func @transform_3(%arg0: i32) -> (i32, i32) {
    %c0_i32 = arith.constant 0 : i32
    %c0_i32_0 = arith.constant 0 : i32
    %c0_i32_1 = arith.constant 0 : i32
    return %c0_i32, %c0_i32_0 : i32, i32
  }
  func.func @transform_4(%arg0: i32) -> (i32, i32) {
    %c0_i32 = arith.constant 0 : i32
    %c0_i32_0 = arith.constant 0 : i32
    %c0_i32_1 = arith.constant 0 : i32
    return %c0_i32, %c0_i32_0 : i32, i32
  }
  func.func @transform_5(%arg0: i32) -> (i32, i32) {
    %c0_i32 = arith.constant 0 : i32
    %c0_i32_0 = arith.constant 0 : i32
    %c0_i32_1 = arith.constant 0 : i32
    return %c0_i32, %c0_i32_0 : i32, i32
  }
  func.func @transform_6(%arg0: i32) -> (i32, i32) {
    %c0_i32 = arith.constant 0 : i32
    %c0_i32_0 = arith.constant 0 : i32
    %c0_i32_1 = arith.constant 0 : i32
    return %c0_i32, %c0_i32_0 : i32, i32
  }
  func.func @transform_7(%arg0: i32) -> (i32, i32) {
    %c0_i32 = arith.constant 0 : i32
    %c0_i32_0 = arith.constant 0 : i32
    %c0_i32_1 = arith.constant 0 : i32
    return %c0_i32, %c0_i32_0 : i32, i32
  }
  func.func @transform_8(%arg0: i32) -> (i32, i32) {
    %c0_i32 = arith.constant 0 : i32
    %c0_i32_0 = arith.constant 0 : i32
    %c0_i32_1 = arith.constant 0 : i32
    return %c0_i32, %c0_i32_0 : i32, i32
  }
  func.func @transform_9(%arg0: i32) -> (i32, i32) {
    %c0_i32 = arith.constant 0 : i32
    %c0_i32_0 = arith.constant 0 : i32
    %c0_i32_1 = arith.constant 0 : i32
    return %c0_i32, %c0_i32_0 : i32, i32
  }
  func.func @transform_10(%arg0: i32) -> (i32, i32) {
    %c0_i32 = arith.constant 0 : i32
    %c0_i32_0 = arith.constant 0 : i32
    %c0_i32_1 = arith.constant 0 : i32
    return %c0_i32, %c0_i32_0 : i32, i32
  }
  func.func @transform_11(%arg0: i32) -> (i32, i32) {
    %c0_i32 = arith.constant 0 : i32
    %c0_i32_0 = arith.constant 0 : i32
    %c0_i32_1 = arith.constant 0 : i32
    return %c0_i32, %c0_i32_0 : i32, i32
  }
  func.func @transform_12(%arg0: i32) -> (i32, i32) {
    %c0_i32 = arith.constant 0 : i32
    %c0_i32_0 = arith.constant 0 : i32
    %c0_i32_1 = arith.constant 0 : i32
    return %c0_i32, %c0_i32_0 : i32, i32
  }
  func.func @transform_13(%arg0: i32) -> (i32, i32) {
    %c0_i32 = arith.constant 0 : i32
    %c0_i32_0 = arith.constant 0 : i32
    %c0_i32_1 = arith.constant 0 : i32
    return %c0_i32, %c0_i32_0 : i32, i32
  }
  func.func @transform_14(%arg0: i32) -> (i32, i32) {
    %c0_i32 = arith.constant 0 : i32
    %c0_i32_0 = arith.constant 0 : i32
    %c0_i32_1 = arith.constant 0 : i32
    return %c0_i32, %c0_i32_0 : i32, i32
  }
  func.func @transform_15(%arg0: i32) -> (i32, i32) {
    %c0_i32 = arith.constant 0 : i32
    %c0_i32_0 = arith.constant 0 : i32
    %c0_i32_1 = arith.constant 0 : i32
    return %c0_i32, %c0_i32_0 : i32, i32
  }
  func.func @transform_16(%arg0: i32) -> (i32, i32) {
    %c0_i32 = arith.constant 0 : i32
    %c0_i32_0 = arith.constant 0 : i32
    %c0_i32_1 = arith.constant 0 : i32
    return %c0_i32, %c0_i32_0 : i32, i32
  }
  func.func @transform_17(%arg0: i32) -> (i32, i32) {
    %c0_i32 = arith.constant 0 : i32
    %c0_i32_0 = arith.constant 0 : i32
    %c0_i32_1 = arith.constant 0 : i32
    return %c0_i32, %c0_i32_0 : i32, i32
  }
  func.func @transform_18(%arg0: i32) -> (i32, i32) {
    %c0_i32 = arith.constant 0 : i32
    %c0_i32_0 = arith.constant 0 : i32
    %c0_i32_1 = arith.constant 0 : i32
    return %c0_i32, %c0_i32_0 : i32, i32
  }
  func.func @transform_19(%arg0: i32) -> (i32, i32) {
    %c0_i32 = arith.constant 0 : i32
    %c0_i32_0 = arith.constant 0 : i32
    %c0_i32_1 = arith.constant 0 : i32
    return %c0_i32, %c0_i32_0 : i32, i32
  }
  func.func @transform_20(%arg0: i32) -> (i32, i32) {
    %c0_i32 = arith.constant 0 : i32
    %c0_i32_0 = arith.constant 0 : i32
    %c0_i32_1 = arith.constant 0 : i32
    return %c0_i32, %c0_i32_0 : i32, i32
  }
  func.func @transform_21(%arg0: i32) -> (i32, i32) {
    %c0_i32 = arith.constant 0 : i32
    %c0_i32_0 = arith.constant 0 : i32
    %c0_i32_1 = arith.constant 0 : i32
    return %c0_i32, %c0_i32_0 : i32, i32
  }
  func.func @transform_22(%arg0: i32) -> (i32, i32) {
    %c0_i32 = arith.constant 0 : i32
    %c0_i32_0 = arith.constant 0 : i32
    %c0_i32_1 = arith.constant 0 : i32
    return %c0_i32, %c0_i32_0 : i32, i32
  }
  func.func @transform_23(%arg0: i32) -> (i32, i32) {
    %c0_i32 = arith.constant 0 : i32
    %c0_i32_0 = arith.constant 0 : i32
    %c0_i32_1 = arith.constant 0 : i32
    return %c0_i32, %c0_i32_0 : i32, i32
  }
  func.func @transform_24(%arg0: i32) -> (i32, i32) {
    %c0_i32 = arith.constant 0 : i32
    %c0_i32_0 = arith.constant 0 : i32
    %c0_i32_1 = arith.constant 0 : i32
    return %c0_i32, %c0_i32_0 : i32, i32
  }
  func.func @transform_25(%arg0: i32) -> (i32, i32) {
    %c0_i32 = arith.constant 0 : i32
    %c0_i32_0 = arith.constant 0 : i32
    %c0_i32_1 = arith.constant 0 : i32
    return %c0_i32, %c0_i32_0 : i32, i32
  }
  func.func @transform_26(%arg0: i32) -> (i32, i32) {
    %c0_i32 = arith.constant 0 : i32
    %c0_i32_0 = arith.constant 0 : i32
    %c0_i32_1 = arith.constant 0 : i32
    return %c0_i32, %c0_i32_0 : i32, i32
  }
  func.func @transform_27(%arg0: i32) -> (i32, i32) {
    %c0_i32 = arith.constant 0 : i32
    %c0_i32_0 = arith.constant 0 : i32
    %c0_i32_1 = arith.constant 0 : i32
    return %c0_i32, %c0_i32_0 : i32, i32
  }
  func.func @transform_28(%arg0: i32) -> (i32, i32) {
    %c0_i32 = arith.constant 0 : i32
    %c0_i32_0 = arith.constant 0 : i32
    %c0_i32_1 = arith.constant 0 : i32
    return %c0_i32, %c0_i32_0 : i32, i32
  }
  func.func @transform_29(%arg0: i32) -> (i32, i32) {
    %c0_i32 = arith.constant 0 : i32
    %c0_i32_0 = arith.constant 0 : i32
    %c0_i32_1 = arith.constant 0 : i32
    return %c0_i32, %c0_i32_0 : i32, i32
  }
  func.func @transform_30(%arg0: i32) -> (i32, i32) {
    %c0_i32 = arith.constant 0 : i32
    %c0_i32_0 = arith.constant 0 : i32
    %c0_i32_1 = arith.constant 0 : i32
    return %c0_i32, %c0_i32_0 : i32, i32
  }
  func.func @transform_31(%arg0: i32) -> (i32, i32) {
    %c0_i32 = arith.constant 0 : i32
    %c0_i32_0 = arith.constant 0 : i32
    %c0_i32_1 = arith.constant 0 : i32
    return %c0_i32, %c0_i32_0 : i32, i32
  }
  func.func @transform_32(%arg0: i32) -> (i32, i32) {
    %c0_i32 = arith.constant 0 : i32
    %c0_i32_0 = arith.constant 0 : i32
    %c0_i32_1 = arith.constant 0 : i32
    return %c0_i32, %c0_i32_0 : i32, i32
  }
  func.func @transform_33(%arg0: i32) -> (i32, i32) {
    %c0_i32 = arith.constant 0 : i32
    %c0_i32_0 = arith.constant 0 : i32
    %c0_i32_1 = arith.constant 0 : i32
    return %c0_i32, %c0_i32_0 : i32, i32
  }
  func.func @transform_34(%arg0: i32) -> (i32, i32) {
    %c0_i32 = arith.constant 0 : i32
    %c0_i32_0 = arith.constant 0 : i32
    %c0_i32_1 = arith.constant 0 : i32
    return %c0_i32, %c0_i32_0 : i32, i32
  }
  func.func @transform_35(%arg0: i32) -> (i32, i32) {
    %c0_i32 = arith.constant 0 : i32
    %c0_i32_0 = arith.constant 0 : i32
    %c0_i32_1 = arith.constant 0 : i32
    return %c0_i32, %c0_i32_0 : i32, i32
  }
  func.func @transform_36(%arg0: i32) -> (i32, i32) {
    %c0_i32 = arith.constant 0 : i32
    %c0_i32_0 = arith.constant 0 : i32
    %c0_i32_1 = arith.constant 0 : i32
    return %c0_i32, %c0_i32_0 : i32, i32
  }
  func.func @transform_37(%arg0: i32) -> (i32, i32) {
    %c0_i32 = arith.constant 0 : i32
    %c0_i32_0 = arith.constant 0 : i32
    %c0_i32_1 = arith.constant 0 : i32
    return %c0_i32, %c0_i32_0 : i32, i32
  }
  func.func @transform_38(%arg0: i32) -> (i32, i32) {
    %c0_i32 = arith.constant 0 : i32
    %c0_i32_0 = arith.constant 0 : i32
    %c0_i32_1 = arith.constant 0 : i32
    return %c0_i32, %c0_i32_0 : i32, i32
  }
  func.func @transform_39(%arg0: i32) -> (i32, i32) {
    %c0_i32 = arith.constant 0 : i32
    %c0_i32_0 = arith.constant 0 : i32
    %c0_i32_1 = arith.constant 0 : i32
    return %c0_i32, %c0_i32_0 : i32, i32
  }
  func.func @transform_40(%arg0: i32) -> (i32, i32) {
    %c0_i32 = arith.constant 0 : i32
    %c0_i32_0 = arith.constant 0 : i32
    return %c0_i32, %arg0 : i32, i32
  }
}

</mosaic_0001>

<bundles_post_ra>
// kernel: tpu_custom_call.1
= control target key start
LH: loop header
LB: loop body
LE: loop exit
PB: predicated region body
PF: predicated region fallthrough
CT: control target
= control target key end

     0   :  { %s2870_s6 = smov 1   ;;  %s2871_s10 = smov 2   ;;  %s4010_s0 = inlined_call_operand.smem [shape: u32[41], index: -1, kind: input, shape index: {}] }
   0x1   :  { %s2952_s5 = sld [smem:[%s4010_s0]]   ;;  %s2872_s14 = smov 3  }
   0x2   :  { %s2957_s9 = sld [smem:[%s4010_s0 + %s2870_s6]]   ;;  %s2873_s18 = smov 4  }
   0x3   :  { %s2962_s13 = sld [smem:[%s4010_s0 + %s2871_s10]]   ;;  %s2874_s22 = smov 5  }
   0x4   :  { %s2967_s17 = sld [smem:[%s4010_s0 + %s2872_s14]]   ;;  %s2875_s26 = smov 6  }
   0x5   :  { %s2972_s21 = sld [smem:[%s4010_s0 + %s2873_s18]]   ;;  %s2876_s30 = smov 7  }
   0x6   :  { %s2977_s25 = sld [smem:[%s4010_s0 + %s2874_s22]]   ;;  %s2877_s4 = smov 8  }
   0x7   :  { %s2982_s29 = sld [smem:[%s4010_s0 + %s2875_s26]]   ;;  %s2878_s10 = smov 9  }
   0x8   :  { %s2987_s3 = sld [smem:[%s4010_s0 + %s2876_s30]]   ;;  %s2879_s15 = smov 10  }
   0x9   :  { %s2992_s8 = sld [smem:[%s4010_s0 + %s2877_s4]]   ;;  %s2880_s20 = smov 11  }
   0xa   :  { %s2997_s14 = sld [smem:[%s4010_s0 + %s2878_s10]]   ;;  %s2881_s26 = smov 12  }
   0xb   :  { %s3002_s19 = sld [smem:[%s4010_s0 + %s2879_s15]]   ;;  %s2882_s1 = smov 13  }
   0xc   :  { %s3007_s24 = sld [smem:[%s4010_s0 + %s2880_s20]]   ;;  %s2883_s7 = smov 14  }
   0xd   :  { %s3012_s30 = sld [smem:[%s4010_s0 + %s2881_s26]]   ;;  %s2884_s15 = smov 15  }
   0xe   :  { %s3017_s6 = sld [smem:[%s4010_s0 + %s2882_s1]]   ;;  %s2885_s22 = smov 16  }
   0xf   :  { %s3022_s12 = sld [smem:[%s4010_s0 + %s2883_s7]]   ;;  %s2886_s28 = smov 17  }
  0x10   :  { %s3027_s20 = sld [smem:[%s4010_s0 + %s2884_s15]]   ;;  %s2887_s7 = smov 18  }
  0x11   :  { %s3032_s27 = sld [smem:[%s4010_s0 + %s2885_s22]]   ;;  %s2888_s15 = smov 19  }
  0x12   :  { %s3037_s4 = sld [smem:[%s4010_s0 + %s2886_s28]]   ;;  %s2889_s22 = smov 20  }
  0x13   :  { %s2890_s28 = smov 21  }
  0x15   :  { %4054 = sst [smem:[#allocation11_spill]] %s3022_s12 }
  0x16   :  { %4055 = sst [smem:[#allocation12_spill]] %s3027_s20 }
  0x17   :  { %4056 = sst [smem:[#allocation13_spill]] %s3032_s27 }
  0x18   :  { %4057 = sst [smem:[#allocation14_spill]] %s3037_s4 }
  0x19   :  { %s3042_s12 = sld [smem:[%s4010_s0 + %s2887_s7]]   ;;  %s2891_s7 = smov 22  }
  0x1a   :  { %s3047_s20 = sld [smem:[%s4010_s0 + %s2888_s15]]   ;;  %s2892_s15 = smov 23  }
  0x1b   :  { %s3052_s27 = sld [smem:[%s4010_s0 + %s2889_s22]]   ;;  %s2893_s22 = smov 24  }
  0x1c   :  { %s3057_s4 = sld [smem:[%s4010_s0 + %s2890_s28]]   ;;  %s2894_s28 = smov 25  }
  0x1f   :  { %4058 = sst [smem:[#allocation15_spill]] %s3042_s12 }
  0x20   :  { %4059 = sst [smem:[#allocation16_spill]] %s3047_s20 }
  0x21   :  { %4060 = sst [smem:[#allocation17_spill]] %s3052_s27 }
  0x22   :  { %4061 = sst [smem:[#allocation18_spill]] %s3057_s4 }
  0x23   :  { %s3062_s12 = sld [smem:[%s4010_s0 + %s2891_s7]]   ;;  %s2895_s7 = smov 26  }
  0x24   :  { %s3067_s20 = sld [smem:[%s4010_s0 + %s2892_s15]]   ;;  %s2896_s15 = smov 27  }
  0x25   :  { %s3072_s27 = sld [smem:[%s4010_s0 + %s2893_s22]]   ;;  %s2897_s22 = smov 28  }
  0x26   :  { %s3077_s4 = sld [smem:[%s4010_s0 + %s2894_s28]]   ;;  %s2898_s28 = smov 29  }
  0x29   :  { %4062 = sst [smem:[#allocation19_spill]] %s3062_s12 }
  0x2a   :  { %4063 = sst [smem:[#allocation20_spill]] %s3067_s20 }
  0x2b   :  { %4064 = sst [smem:[#allocation21_spill]] %s3072_s27 }
  0x2c   :  { %4065 = sst [smem:[#allocation22_spill]] %s3077_s4 }
  0x2d   :  { %s3082_s12 = sld [smem:[%s4010_s0 + %s2895_s7]]   ;;  %s2899_s7 = smov 30  }
  0x2e   :  { %s3087_s20 = sld [smem:[%s4010_s0 + %s2896_s15]]   ;;  %s2900_s15 = smov 31  }
  0x2f   :  { %s3092_s27 = sld [smem:[%s4010_s0 + %s2897_s22]]   ;;  %s2901_s22 = smov 32  }
  0x30   :  { %s3097_s4 = sld [smem:[%s4010_s0 + %s2898_s28]]   ;;  %s2902_s28 = smov 33  }
  0x33   :  { %4066 = sst [smem:[#allocation23_spill]] %s3082_s12 }
  0x34   :  { %4067 = sst [smem:[#allocation24_spill]] %s3087_s20 }
  0x35   :  { %4068 = sst [smem:[#allocation25_spill]] %s3092_s27 }
  0x36   :  { %4069 = sst [smem:[#allocation26_spill]] %s3097_s4 }
  0x37   :  { %s3102_s12 = sld [smem:[%s4010_s0 + %s2899_s7]]   ;;  %s2903_s7 = smov 34  }
  0x38   :  { %s3107_s20 = sld [smem:[%s4010_s0 + %s2900_s15]]   ;;  %s2904_s15 = smov 35  }
  0x39   :  { %s3112_s27 = sld [smem:[%s4010_s0 + %s2901_s22]]   ;;  %s2905_s22 = smov 36  }
  0x3a   :  { %s3117_s4 = sld [smem:[%s4010_s0 + %s2902_s28]]   ;;  %s2906_s28 = smov 37  }
  0x3d   :  { %4070 = sst [smem:[#allocation27_spill]] %s3102_s12 }
  0x3e   :  { %4071 = sst [smem:[#allocation28_spill]] %s3107_s20 }
  0x3f   :  { %4072 = sst [smem:[#allocation29_spill]] %s3112_s27 }
  0x40   :  { %4073 = sst [smem:[#allocation30_spill]] %s3117_s4 }
  0x41   :  { %s3122_s12 = sld [smem:[%s4010_s0 + %s2903_s7]]   ;;  %s2907_s7 = smov 38  }
  0x42   :  { %s3127_s20 = sld [smem:[%s4010_s0 + %s2904_s15]]   ;;  %s2908_s15 = smov 39  }
  0x43   :  { %s3132_s27 = sld [smem:[%s4010_s0 + %s2905_s22]]   ;;  %s2909_s22 = smov 40  }
  0x44   :  { %s3137_s4 = sld [smem:[%s4010_s0 + %s2906_s28]]  }
  0x47   :  { %4074 = sst [smem:[#allocation31_spill]] %s3122_s12 }
  0x48   :  { %4075 = sst [smem:[#allocation32_spill]] %s3127_s20 }
  0x49   :  { %4076 = sst [smem:[#allocation33_spill]] %s3132_s27 }
  0x4a   :  { %s3142_s12 = sld [smem:[%s4010_s0 + %s2907_s7]]  }
  0x4b   :  { %s3147_s20 = sld [smem:[%s4010_s0 + %s2908_s15]]  }
  0x4c   :  { %s3152_s27 = sld [smem:[%s4010_s0 + %s2909_s22]]  }
  0x4d   :  { %86 = vsyncpa [#allocation3], 0 }
  0x4e   :  { %87 = vsyncpa [#allocation6], 0 }
  0x4f   :  { %88 = vsyncpa [#allocation4], 0  ;;  %s109_s28 = sshll.u32 %s2992_s8, 4  ;;  %s2910_s1 = smov [#allocation2]   ;;  %s110_s28 = int_to_ptr.hbm [resolvable:$true] %s109_s28 }
  0x50   :  { %s111_s2 = sshll.u32 %s2910_s1, 4  ;;  %s178_s7 = sshll.u32 %s3137_s4, 4  ;;  %s112_s2 = int_to_ptr.vmem [resolvable:$true] %s111_s2  ;;  %s179_s7 = int_to_ptr.hbm [resolvable:$true] %s178_s7 }
  0x51   :  { %s2792_s10 = sshra.s32 %s110_s28, 4  ;;  %s2796_s15 = scalar_lea.hbm %s2992_s8, 512  ;;  %s2793_s10 = int_to_ptr.hbm [resolvable:$true] %s2792_s10 }
  0x52   :  { %s2794_s11 = scalar_lea.hbm %s2793_s10, 512  ;;  %p2797_p1 = scmp.lt.s32.totalorder %s2793_s10, %s2992_s8 }
  0x53   :  { %p2795_p0 = scmp.ne.s32.totalorder %s2793_s10, %s2794_s11  ;;  %p2798_p2 = scmp.lt.s32.totalorder %s2796_s15, %s2794_s11 }
  0x55   :  { %p2799_p3 = por %p2798_p2, %p2797_p1 }
  0x57   :  { %p2800_p4 = pnand %p2799_p3, %p2795_p0 }
  0x59   :  { %2803 = shalt.err (!%p2800_p4)
}
  0x5a   :  { %s2911_s0 = smov 128   ;;  %s2912_s16 = smov 8  }
  0x5b   :  { %117 = dma.hbm_to_vmem [thread:$0]  %s110_s28, 8192, %s112_s2, [#allocation3], %s2911_s0, %s2911_s0, %s2912_s16  }
  0x5c   :  { %s2913_s18 = smov [#allocation5]   ;;  %s2816_s23 = sshra.s32 %s179_s7, 4  ;;  %s2817_s23 = int_to_ptr.hbm [resolvable:$true] %s2816_s23 }
  0x5d   :  { %s180_s22 = sshll.u32 %s2913_s18, 4  ;;  %s2818_s26 = scalar_lea.hbm %s2817_s23, 128  ;;  %s181_s22 = int_to_ptr.vmem [resolvable:$true] %s180_s22 }
  0x5e   :  { %p2819_p5 = scmp.ne.s32.totalorder %s2817_s23, %s2818_s26  ;;  %s2820_s8 = scalar_lea.hbm %s3137_s4, 128 }
  0x5f   :  { %p2821_p6 = scmp.lt.s32.totalorder %s2817_s23, %s3137_s4  ;;  %p2822_p7 = scmp.lt.s32.totalorder %s2820_s8, %s2818_s26 }
  0x61   :  { %p2823_p8 = por %p2822_p7, %p2821_p6 }
  0x63   :  { %p2824_p9 = pnand %p2823_p8, %p2819_p5 }
  0x65   :  { %2827 = shalt.err (!%p2824_p9)
}
  0x66   :  { %186 = dma.hbm_to_vmem [thread:$0]  %s179_s7, 2048, %s181_s22, [#allocation6], %s2911_s0, %s2911_s0, %s2912_s16  }
  0x67   :  { %2864 = dma.done.wait [#allocation3], 8192  }
  0x68   :  { %2865 = vsyncadd [#allocation3], 4294959104 }
  0x69   :  { %2866 = dma.done.wait [#allocation6], 2048  }
  0x6a   :  { %2867 = vsyncadd [#allocation6], 4294965248  ;;  %vm280_vm0 = vcmask 1044480   ;;  %v4037_v0 = vmov 0   ;;  %vm281_vm1 = vcmask 1045504   ;;  %v2915_v1 = vmov 65535  }
  0x6b   :  { %2703 = vset.pattern.permute.xlu0 %v4037_v0  ;;  %2704 = vset.pattern.permute.xlu1 %v4037_v0  ;;  %v282_v2 = vsel %vm280_vm0, 4294967295, %v2915_v1  ;;  %v2450_v4 = vld [vmem:[%s2952_s5 + $0x20] sm:$0xf]  ;;  %v2605_v5 = vld [vmem:[%s2952_s5 + $0x2c] sm:$0x30]  ;;  %v204_v24 = vld [vmem:[%s2962_s13 + $0x8] sm:$0xff] }
  0x6c   :  { %2705 = vset.pattern.permute.xlu2 %v4037_v0  ;;  %v283_v3 = vsel %vm281_vm1, %v282_v2, 0  ;;  %v2458_v6 = vld [vmem:[%s2952_s5 + $0x28] sm:$0xf]  ;;  %v2451_v7 = vor.u32 %v2605_v5, %v2450_v4  ;;  %v2606_v8 = vld [vmem:[%s2952_s5 + $0x34] sm:$0x30]  ;;  %v205_v22 = vld [vmem:[%s2962_s13 + $0x10] sm:$0xff]  ;;  %221 = vperm.xlu1 %2704, %v204_v24  }
  0x6d   :  { %v2604_v9 = vld [vmem:[%s2952_s5 + $0x2c] sm:$0xf]  ;;  %v2460_v10 = vld [vmem:[%s2952_s5 + $0x38] sm:$0x30]  ;;  %v2459_v11 = vor.u32 %v2606_v8, %v2458_v6  ;;  %v2434_v13 = vld [vmem:[%s2952_s5] sm:$0xf]  ;;  %226 = vperm.xlu0 %2703, %v205_v22  }
  0x6e   :  { %v2463_v12 = vor.u32 %v2604_v9, %v2460_v10  ;;  %v2601_v14 = vld [vmem:[%s2952_s5 + $0xc] sm:$0xf0]  ;;  %v2442_v15 = vld [vmem:[%s2952_s5 + $0x8] sm:$0xf]  ;;  %v285_v16 = vand.u32 %v2451_v7, %v283_v3  ;;  %v2602_v17 = vld [vmem:[%s2952_s5 + $0x14] sm:$0xf0] }
  0x6f   :  { %v2600_v18 = vld [vmem:[%s2952_s5 + $0xc] sm:$0xf]  ;;  %v2444_v19 = vld [vmem:[%s2952_s5 + $0x18] sm:$0xf0]  ;;  %v291_v20 = vand.u32 %v2459_v11, %v283_v3  ;;  %v2435_v23 = vor.u32 %v2601_v14, %v2434_v13  ;;  %v2603_v25 = vld [vmem:[%s2952_s5 + $0x24] sm:$0xf]  ;;  %v2443_v26 = vor.u32 %v2602_v17, %v2442_v15 }
  0x70   :  { %v294_v21 = vand.u32 %v2463_v12, %v283_v3  ;;  %302 = vmatpush.bf16.msra.mxu0 %v285_v16  ;;  %v2447_v27 = vor.u32 %v2600_v18, %v2444_v19  ;;  %v2598_v28 = vld [vmem:[%s2957_s9] sm:$0xff]  ;;  %vm273_vm2 = vcmask 220160   ;;  %v2452_v29 = vld [vmem:[%s2952_s5 + $0x30] sm:$0x30]  ;;  %v202_v37 = vld [vmem:[%s2957_s9 + $0x8] sm:$0xf] }
  0x71   :  { %338 = vmatpush.bf16.msra.mxu2 %v291_v20  ;;  %v2599_v30 = vld [vmem:[%s2952_s5 + $0x4] sm:$0xf]  ;;  %v2455_v31 = vor.u32 %v2603_v25, %v2452_v29  ;;  %v2436_v32 = vld [vmem:[%s2952_s5 + $0x10] sm:$0xf0]  ;;  %v234_v38 = vunpack.c.l.b16 %v202_v37  ;;  %v4049_v42 = vmov 3   ;;  %v4041_v47 = vmov 4  }
  0x72   :  { %356 = vmatpush.bf16.msra.mxu3 %v294_v21  ;;  %v203_v33 = vld [vmem:[%s2962_s13] sm:$0xff]  ;;  %v2439_v36 = vor.u32 %v2599_v30, %v2436_v32  ;;  %vm389_vm3 = vcmask 1043456   ;;  %vm385_vm4 = vcmask 195584   ;;  %v4033_v10 = vmov 1   ;;  %s2922_s5 = smov 16   ;;  %s2923_s9 = smov 17  }
  0x73   :  { %v288_v34 = vand.u32 %v2455_v31, %v283_v3  ;;  %v369_v35 = vld [vmem:[%s2972_s21] sm:$0x3f]  ;;  %v236_v39 = vpack.c.b16 %v234_v38, %v234_v38  ;;  %v4045_v16 = vmov 2   ;;  %s2924_s13 = smov 15   ;;  %s2926_s21 = smov 1   ;;  %vm994_vm13 = vcmask 1042432  }
  0x74   :  { %303 = vmatpush.bf16.msra.mxu0 %v2435_v23  ;;  %382 = vperm.xlu1 %2704, %v369_v35   ;;  %v3201_v41 = vld [vmem:[%s2977_s25] sm:$0x3f]  ;;  %s2928_s25 = smov 113   ;;  %s2929_s4 = smov 112   ;;  %vm987_vm14 = vcmask 48128   ;;  %vm1602_vm15 = vcmask 97280  }
  0x75   :  { %339 = vmatpush.bf16.msra.mxu2 %v2443_v26  ;;  %216 = vperm.xlu0 %2703, %v203_v33   ;;  %v368_v7 = vld [vmem:[%s2967_s17] sm:$0x7]  ;;  %v4039_v26 = vmov 5   ;;  %s2925_s17 = smov 127   ;;  %s2931_s28 = smov 111   ;;  %vm1665_vm0 = vcmask 392192  }
  0x76   :  { %357 = vmatpush.bf16.msra.mxu3 %v2447_v27  ;;  %489 = vperm.xlu2 %2705, %v3201_v41   ;;  %v4043_v27 = vmov 6   ;;  %s4097_s1 = sld [smem:[#allocation19_spill]]  ;;  %s2936_s2 = smov 121  }
  0x77   :  { %2464 = vmatmul.msk.bf16.vlgmr.msra.gmra.mxu0 %vm273_vm2, %v2598_v28  ;;  %s4099_s7 = sld [smem:[#allocation15_spill]] }
  0x78   :  { %320 = vmatpush.bf16.msrb.mxu0 %v288_v34  ;;  %2468 = vmatmul.msk.bf16.vlgmr.msra.gmra.mxu2 %vm273_vm2, %v2598_v28  ;;  %s4100_s10 = sld [smem:[#allocation12_spill]] }
  0x79   :  { %2470 = vmatmul.msk.bf16.vlgmr.msra.gmra.mxu3 %vm273_vm2, %v2598_v28  ;;  %s4101_s11 = sld [smem:[#allocation14_spill]] }
  0x7a   :  { %s4102_s15 = sld [smem:[#allocation13_spill]] }
  0x7b   :  { %s4104_s18 = sld [smem:[#allocation17_spill]] }
  0x7c   :  { %321 = vmatpush.bf16.msrb.mxu0 %v2439_v36  ;;  %2708 = vset.pattern.permute.xlu1 %v4049_v42  ;;  %s4105_s22 = sld [smem:[#allocation21_spill]] }
  0x7d   :  { %609 = vperm.xlu1 %2708, %v3201_v41   ;;  %2706 = vset.pattern.permute.xlu0 %v4033_v10  ;;  %s4106_s23 = sld [smem:[#allocation22_spill]] }
  0x7e   :  { %529 = vperm.xlu0 %2706, %v3201_v41   ;;  %s4107_s26 = sld [smem:[#allocation20_spill]] }
  0x7f   :  { %s4108_s8 = sld [smem:[#allocation24_spill]] }
  0x85   :  { %2709 = vset.pattern.permute.xlu1 %v4041_v47  ;;  %v3426_v47 = vld [vmem:[%s2987_s3 + $0x5] ss:$8 sm:$0xf] }
  0x86   :  { %636 = vperm.xlu1 %2709, %v3201_v41   ;;  %2707 = vset.pattern.permute.xlu0 %v4045_v16 }
  0x87   :  { %2465 = vmatmul.msk.bf16.gmra.mxu0 %vm273_vm2, %v236_v39  ;;  %569 = vperm.xlu0 %2707, %v3201_v41  }
  0x88   :  { %2469 = vmatmul.msk.bf16.gmra.mxu2 %vm273_vm2, %v236_v39 }
  0x89   :  { %2471 = vmatmul.msk.bf16.gmra.mxu3 %vm273_vm2, %v236_v39 }
  0x8f   :  { %2710 = vset.pattern.permute.xlu0 %v4039_v26 }
  0x90   :  { %676 = vperm.xlu0 %2710, %v3201_v41  }
  0x97   :  { %2466 = vmatmul.msk.bf16.vlgmr.msrb.gmra.mxu0 %vm273_vm2, %v2598_v28 }
  0x98   :  { %2711 = vset.pattern.permute.xlu0 %v4043_v27 }
  0x99   :  { %716 = vperm.xlu0 %2711, %v3201_v41  }
  0xa7   :  { %2467 = vmatmul.msk.bf16.gmra.mxu0 %vm273_vm2, %v236_v39 }
  0xde   :  { %v222_v51 = vpop.permute.xlu1 %221 }
  0xdf   :  { %v227_v46 = vpop.permute.xlu0 %226 }
  0xe6   :  { %v383_v28 = vpop.permute.xlu1 %382 }
  0xe7   :  { %v217_v53 = vpop.permute.xlu0 %216 }
  0xf4   :  { %v305_v40 = vpop.f32.mrf.mxu0 }
  0xf5   :  { %v306_v57 = vadd.f32 %v305_v40, %v217_v53 }
  0xfb   :  { %v341_v43 = vpop.f32.mrf.mxu2 }
  0xfc   :  { %v359_v44 = vpop.f32.mrf.mxu3  ;;  %v307_v45 = vpop.f32.mrf.mxu0  ;;  %v342_v3 = vadd.f32 %v341_v43, %v217_v53  ;;  %v4047_v43 = vmov 7  }
  0xfd   :  { %v308_v55 = vadd.f32 %v307_v45, %v222_v51  ;;  %v360_v4 = vadd.f32 %v359_v44, %v217_v53  ;;  %2712 = vset.pattern.permute.xlu0 %v4047_v43 }
  0xff   :  { %v372_v60 = vpack.c.bf16 %v308_v55, %v306_v57 }
 0x103   :  { %v343_v48 = vpop.f32.mrf.mxu2 }
 0x104   :  { %v361_v49 = vpop.f32.mrf.mxu3  ;;  %v310_v50 = vpop.f32.mrf.mxu0  ;;  %v344_v5 = vadd.f32 %v343_v48, %v222_v51 }
 0x105   :  { %v311_v52 = vadd.f32 %v310_v50, %v227_v46  ;;  %v362_v6 = vadd.f32 %v361_v49, %v222_v51  ;;  %v4035_v49 = vmov 8   ;;  %v3289_v50 = vpop.permute.xlu2 %489 }
 0x106   :  { %v374_v11 = vpack.c.bf16 %v344_v5, %v342_v3  ;;  %2713 = vset.pattern.permute.xlu1 %v4035_v49 }
 0x107   :  { %v376_v54 = vpack.c.bf16 %v311_v52, %v311_v52  ;;  %v375_v12 = vpack.c.bf16 %v362_v6, %v360_v4  ;;  %v3296_v52 = vpop.permute.xlu1 %609 }
 0x109   :  { %v391_v56 = vsel %vm389_vm3, %v376_v54, 0 }
 0x10a   :  { %408 = vmatpush.bf16.msra.mxu0 %v391_v56  ;;  %v3310_v56 = vpop.permute.xlu0 %529 }
 0x10b   :  { %v346_v58 = vpop.f32.mrf.mxu2 }
 0x10c   :  { %v364_v59 = vpop.f32.mrf.mxu3  ;;  %v347_v61 = vadd.f32 %v346_v58, %v227_v46  ;;  %v312_v63 = vpop.f32.mrf.mxu0  ;;  %v371_v58 = vld [vmem:[%s2982_s29] sm:$0x3f]  ;;  %s4094_s29 = sld [smem:[#allocation11_spill]] }
 0x10d   :  { %v365_v62 = vadd.f32 %v364_v59, %v227_v46 }
 0x10e   :  { %v378_v1 = vpack.c.bf16 %v347_v61, %v347_v61  ;;  %409 = vmatpush.bf16.msra.mxu0 %v372_v60 }
 0x10f   :  { %v379_v2 = vpack.c.bf16 %v365_v62, %v365_v62  ;;  %v3306_v54 = vpop.permute.xlu1 %636  ;;  %v961_v62 = vld [vmem:[%s3002_s19 + $0x8] sm:$0xff] }
 0x110   :  { %v397_v8 = vsel %vm389_vm3, %v378_v1, 0 }
 0x111   :  { %v400_v9 = vsel %vm389_vm3, %v379_v2, 0  ;;  %434 = vmatpush.bf16.msrb.mxu2 %v397_v8  ;;  %2472 = vmatmul.msk.bf16.vlgmr.msra.gmra.mxu0 %vm385_vm4, %v368_v7 }
 0x112   :  { %447 = vmatpush.bf16.msrb.mxu3 %v400_v9  ;;  %v3318_v59 = vpop.permute.xlu0 %569  ;;  %v822_v9 = vld [vmem:[#allocation2 + $0x78] sm:$0xff] }
 0x113   :  { %v348_v13 = vpop.f32.mrf.mxu2  ;;  %876 = vmatpush.msrb.mxu0 %v822_v9 }
 0x114   :  { %v366_v14 = vpop.f32.mrf.mxu3  ;;  %v323_v15 = vpop.f32.mrf.mxu0  ;;  %v870_v13 = vld [vmem:[#allocation2 + $0x1f8] sm:$0xff] }
 0x115   :  { %435 = vmatpush.bf16.msrb.mxu2 %v374_v11  ;;  %v324_v23 = vadd.f32 %v323_v15, %v217_v53  ;;  %v838_v11 = vld [vmem:[#allocation2 + $0xf8] sm:$0xff]  ;;  %v821_v14 = vld [vmem:[#allocation2 + $0x70] sm:$0xff] }
 0x116   :  { %448 = vmatpush.bf16.msrb.mxu3 %v375_v12  ;;  %v854_v12 = vld [vmem:[#allocation2 + $0x178] sm:$0xff]  ;;  %v837_v15 = vld [vmem:[#allocation2 + $0xf0] sm:$0xff]  ;;  %877 = vmatpush.msrb.mxu0 %v821_v14 }
 0x118   :  { %2474 = vmatmul.msk.bf16.vlgmr.msrb.gmra.mxu2 %vm385_vm4, %v368_v7 }
 0x119   :  { %2475 = vmatmul.msk.bf16.vlgmr.msrb.gmra.mxu3 %vm385_vm4, %v368_v7  ;;  %916 = vmatpush.msra.mxu2 %v854_v12  ;;  %v865_v12 = vld [vmem:[#allocation2 + $0x1d0] sm:$0xff] }
 0x11a   :  { %v3325_v63 = vpop.permute.xlu0 %676  ;;  %936 = vmatpush.msra.mxu3 %v870_v13  ;;  %v3364_v13 = vld [vmem:[%s2987_s3 + $0x1] ss:$8 sm:$0xf] }
 0x11c   :  { %v325_v17 = vpop.f32.mrf.mxu0 }
 0x11d   :  { %v326_v21 = vadd.f32 %v325_v17, %v222_v51 }
 0x11f   :  { %v373_v24 = vpack.c.bf16 %v326_v21, %v324_v23  ;;  %v466_v21 = vlaneseq  ;;  %v836_v23 = vld [vmem:[#allocation2 + $0xe8] sm:$0xff] }
 0x122   :  { %v3336_v5 = vpop.permute.xlu0 %716 }
 0x124   :  { %v328_v18 = vpop.f32.mrf.mxu0 }
 0x125   :  { %v329_v19 = vadd.f32 %v328_v18, %v227_v46 }
 0x127   :  { %v377_v20 = vpack.c.bf16 %v329_v19, %v329_v19  ;;  %v853_v19 = vld [vmem:[#allocation2 + $0x170] sm:$0xff] }
 0x128   :  { %917 = vmatpush.msra.mxu2 %v853_v19  ;;  %v816_v19 = vld [vmem:[#allocation2 + $0x48] sm:$0xff] }
 0x129   :  { %v394_v22 = vsel %vm389_vm3, %v377_v20, 0  ;;  %v869_v20 = vld [vmem:[#allocation2 + $0x1f0] sm:$0xff] }
 0x12a   :  { %421 = vmatpush.bf16.msra.mxu1 %v394_v22  ;;  %v820_v22 = vld [vmem:[#allocation2 + $0x68] sm:$0xff]  ;;  %937 = vmatpush.msra.mxu3 %v869_v20 }
 0x12b   :  { %878 = vmatpush.msrb.mxu0 %v820_v22  ;;  %v832_v20 = vld [vmem:[#allocation2 + $0xc8] sm:$0xff] }
 0x12c   :  { %v330_v25 = vpop.f32.mrf.mxu0 }
 0x12d   :  { %v868_v25 = vld [vmem:[#allocation2 + $0x1e8] sm:$0xff] }
 0x12e   :  { %422 = vmatpush.bf16.msra.mxu1 %v373_v24  ;;  %v852_v24 = vld [vmem:[#allocation2 + $0x168] sm:$0xff]  ;;  %938 = vmatpush.msra.mxu3 %v868_v25 }
 0x12f   :  { %918 = vmatpush.msra.mxu2 %v852_v24  ;;  %v864_v25 = vld [vmem:[#allocation2 + $0x1c8] sm:$0xff] }
 0x131   :  { %2473 = vmatmul.msk.bf16.vlgmr.msra.gmra.mxu1 %vm385_vm4, %v368_v7 }
 0x132   :  { %896 = vmatpush.msrb.mxu1 %v838_v11  ;;  %v849_v11 = vld [vmem:[#allocation2 + $0x150] sm:$0xff] }
 0x134   :  { %897 = vmatpush.msrb.mxu1 %v837_v15 }
 0x136   :  { %898 = vmatpush.msrb.mxu1 %v836_v23 }
 0x18e   :  { %v411_v29 = vpop.f32.mrf.mxu0 }
 0x18f   :  { %v412_v30 = vadd.f32 %v411_v29, %v383_v28  ;;  %v835_v29 = vld [vmem:[#allocation2 + $0xe0] sm:$0xff] }
 0x190   :  { %899 = vmatpush.msrb.mxu1 %v835_v29  ;;  %v815_v29 = vld [vmem:[#allocation2 + $0x40] sm:$0xff] }
 0x191   :  { %v3225_v31 = vmax.f32 %v412_v30, 0.0  ;;  %v851_v30 = vld [vmem:[#allocation2 + $0x160] sm:$0xff] }
 0x192   :  { %919 = vmatpush.msra.mxu2 %v851_v30  ;;  %v831_v30 = vld [vmem:[#allocation2 + $0xc0] sm:$0xff] }
 0x193   :  { %500 = vrot.lane.b32.xlu1 %v3225_v31, %s2922_s5  ;;  %458 = vrot.lane.b32.xlu2 %v3225_v31, %s2923_s9 }
 0x196   :  { %v413_v32 = vpop.f32.mrf.mxu0 }
 0x197   :  { %v3349_v32 = vld [vmem:[%s2987_s3 + $0x4] ss:$8 sm:$0xf] }
 0x198   :  { %v623_v14 = vperm.slane %v3349_v32, 0  ;;  %v626_v23 = vperm.slane %v3349_v32, 3  ;;  %v625_v24 = vperm.slane %v3349_v32, 2 }
 0x19b   :  { %v437_v33 = vpop.f32.mrf.mxu2  ;;  %540 = vrot.lane.b32.xlu1 %v3225_v31, %s2924_s13  ;;  %647 = vrot.lane.b32.xlu2 %v3225_v31, %s2925_s17 }
 0x19c   :  { %v450_v34 = vpop.f32.mrf.mxu3  ;;  %v438_v36 = vadd.f32 %v437_v33, %v383_v28  ;;  %v3352_v33 = vld [vmem:[%s2987_s3] ss:$8 sm:$0xf] }
 0x19d   :  { %v451_v35 = vadd.f32 %v450_v34, %v383_v28  ;;  %v475_v15 = vperm.slane %v3352_v33, 0 }
 0x19e   :  { %v3239_v38 = vmax.f32 %v438_v36, 0.0  ;;  %v3356_v36 = vand.u32 127, %v466_v21  ;;  %v848_v21 = vld [vmem:[#allocation2 + $0x148] sm:$0xff] }
 0x19f   :  { %v3235_v37 = vmax.f32 %v451_v35, 0.0  ;;  %v867_v35 = vld [vmem:[#allocation2 + $0x1e0] sm:$0xff] }
 0x1a0   :  { %939 = vmatpush.msra.mxu3 %v867_v35  ;;  %vm468_vm5 = vcmp.lt.s32.totalorder %v3356_v36, 17  ;;  %vm508_vm6 = vcmp.lt.s32.totalorder %v3356_v36, 16  ;;  %v847_v35 = vld [vmem:[#allocation2 + $0x140] sm:$0xff]  ;;  %vm548_vm7 = vcmp.lt.s32.totalorder %v3356_v36, 15  ;;  %v633_v49 = vmul.f32 %v625_v24, %v3239_v38  ;;  %v861_v24 = vld [vmem:[#allocation2 + $0x1b0] sm:$0xff] }
 0x1a1   :  { %464 = vrot.lane.b32.xlu0 %v3235_v37, %s2923_s9  ;;  %vm588_vm8 = vcmp.lt.s32.totalorder %v3356_v36, 1  ;;  %vm655_vm9 = vcmp.lt.s32.totalorder %v3356_v36, 127  ;;  %vm695_vm10 = vcmp.lt.s32.totalorder %v3356_v36, 113  ;;  %vm735_vm11 = vcmp.lt.s32.totalorder %v3356_v36, 112 }
 0x1a2   :  { %vm775_vm12 = vcmp.lt.s32.totalorder %v3356_v36, 111 }
 0x1a3   :  { %v439_v39 = vpop.f32.mrf.mxu2  ;;  %580 = vrot.lane.b32.xlu1 %v3225_v31, %s2926_s21  ;;  %462 = vrot.lane.b32.xlu2 %v3239_v38, %s2923_s9 }
 0x1a4   :  { %v452_v40 = vpop.f32.mrf.mxu3  ;;  %v818_v39 = vld [vmem:[#allocation2 + $0x58] sm:$0xff] }
 0x1a5   :  { %v834_v40 = vld [vmem:[#allocation2 + $0xd8] sm:$0xff] }
 0x1a6   :  { %900 = vmatpush.msrb.mxu1 %v834_v40  ;;  %v3381_v40 = vld [vmem:[%s2987_s3 + $0x2] ss:$8 sm:$0xf] }
 0x1a9   :  { %653 = vrot.lane.b32.xlu0 %v3235_v37, %s2925_s17 }
 0x1ab   :  { %687 = vrot.lane.b32.xlu1 %v3225_v31, %s2928_s25  ;;  %506 = vrot.lane.b32.xlu2 %v3235_v37, %s2922_s5 }
 0x1ae   :  { %v424_v44 = vpop.f32.mrf.mxu1 }
 0x1af   :  { %v425_v45 = vadd.f32 %v424_v44, %v383_v28  ;;  %v819_v28 = vld [vmem:[#allocation2 + $0x60] sm:$0xff]  ;;  %v850_v44 = vld [vmem:[#allocation2 + $0x158] sm:$0xff] }
 0x1b0   :  { %879 = vmatpush.msrb.mxu0 %v819_v28  ;;  %920 = vmatpush.msra.mxu2 %v850_v44  ;;  %v516_v28 = vperm.slane %v3364_v13, 0 }
 0x1b1   :  { %v3252_v46 = vmax.f32 %v425_v45, 0.0  ;;  %v866_v45 = vld [vmem:[#allocation2 + $0x1d8] sm:$0xff] }
 0x1b2   :  { %880 = vmatpush.msrb.mxu0 %v818_v39  ;;  %940 = vmatpush.msra.mxu3 %v866_v45  ;;  %v863_v45 = vld [vmem:[#allocation2 + $0x1c0] sm:$0xff] }
 0x1b3   :  { %502 = vrot.lane.b32.xlu0 %v3252_v46, %s2922_s5  ;;  %727 = vrot.lane.b32.xlu1 %v3225_v31, %s2929_s4 }
 0x1b4   :  { %546 = vrot.lane.b32.xlu2 %v3235_v37, %s2924_s13  ;;  %921 = vmatpush.msra.mxu2 %v849_v11  ;;  %v814_v11 = vld [vmem:[#allocation2 + $0x38] sm:$0xff] }
 0x1b5   :  { %941 = vmatpush.msra.mxu3 %v865_v12  ;;  %v830_v12 = vld [vmem:[#allocation2 + $0xb8] sm:$0xff] }
 0x1b6   :  { %v426_v48 = vpop.f32.mrf.mxu1  ;;  %922 = vmatpush.msra.mxu2 %v848_v21  ;;  %v862_v21 = vld [vmem:[#allocation2 + $0x1b8] sm:$0xff] }
 0x1b7   :  { %v817_v48 = vld [vmem:[#allocation2 + $0x50] sm:$0xff]  ;;  %942 = vmatpush.msra.mxu3 %v864_v25 }
 0x1b8   :  { %881 = vmatpush.msrb.mxu0 %v817_v48  ;;  %v631_v48 = vmul.f32 %v623_v14, %v3225_v31  ;;  %923 = vmatpush.msra.mxu2 %v847_v35 }
 0x1b9   :  { %943 = vmatpush.msra.mxu3 %v863_v45 }
 0x1ba   :  { %882 = vmatpush.msrb.mxu0 %v816_v19  ;;  %v846_v19 = vld [vmem:[#allocation2 + $0x138] sm:$0xff] }
 0x1bb   :  { %542 = vrot.lane.b32.xlu0 %v3252_v46, %s2924_s13  ;;  %504 = vrot.lane.b32.xlu1 %v3239_v38, %s2922_s5  ;;  %s4109_s5 = sld [smem:[#allocation26_spill]] }
 0x1bc   :  { %584 = vrot.lane.b32.xlu2 %v3239_v38, %s2926_s21  ;;  %883 = vmatpush.msrb.mxu0 %v815_v29  ;;  %v829_v29 = vld [vmem:[#allocation2 + $0xb0] sm:$0xff] }
 0x1bd   :  { %924 = vmatpush.msra.mxu2 %v846_v19  ;;  %944 = vmatpush.msra.mxu3 %v862_v21  ;;  %v519_v19 = vperm.slane %v3364_v13, 3 }
 0x1be   :  { %884 = vmatpush.msrb.mxu0 %v814_v11  ;;  %v812_v11 = vld [vmem:[#allocation2 + $0x28] sm:$0xff] }
 0x1bf   :  { %945 = vmatpush.msra.mxu3 %v861_v24 }
 0x1c3   :  { %649 = vrot.lane.b32.xlu0 %v3252_v46, %s2925_s17  ;;  %544 = vrot.lane.b32.xlu1 %v3239_v38, %s2924_s13  ;;  %s4111_s13 = sld [smem:[#allocation23_spill]] }
 0x1c4   :  { %586 = vrot.lane.b32.xlu2 %v3235_v37, %s2926_s21 }
 0x1cb   :  { %756 = vperm.xlu0 %2712, %v3201_v41   ;;  %691 = vrot.lane.b32.xlu1 %v3239_v38, %s2928_s25 }
 0x1cc   :  { %651 = vrot.lane.b32.xlu2 %v3239_v38, %s2925_s17 }
 0x1d3   :  { %2714 = vset.pattern.permute.xlu0 %v4037_v0  ;;  %731 = vrot.lane.b32.xlu1 %v3239_v38, %s2929_s4 }
 0x1d4   :  { %693 = vrot.lane.b32.xlu2 %v3235_v37, %s2928_s25 }
 0x1db   :  { %771 = vrot.lane.b32.xlu1 %v3239_v38, %s2931_s28  ;;  %v478_v38 = vperm.slane %v3352_v33, 3 }
 0x1dc   :  { %733 = vrot.lane.b32.xlu2 %v3235_v37, %s2929_s4 }
 0x1e3   :  { %582 = vrot.lane.b32.xlu1 %v3252_v46, %s2926_s21 }
 0x1e4   :  { %773 = vrot.lane.b32.xlu2 %v3235_v37, %s2931_s28 }
 0x1eb   :  { %767 = vrot.lane.b32.xlu1 %v3225_v31, %s2931_s28  ;;  %v556_v31 = vperm.slane %v3381_v40, 0 }
 0x1ec   :  { %460 = vrot.lane.b32.xlu2 %v3252_v46, %s2923_s9  ;;  %s4110_s9 = sld [smem:[#allocation27_spill]] }
 0x1ed   :  { %v3294_v51 = vpop.permute.xlu2 %458 }
 0x1f3   :  { %796 = vperm.xlu1 %2713, %v3201_v41  }
 0x1f4   :  { %689 = vrot.lane.b32.xlu2 %v3252_v46, %s2928_s25  ;;  %s4112_s25 = sld [smem:[#allocation25_spill]] }
 0x1f5   :  { %v3301_v53 = vpop.permute.xlu2 %647 }
 0x1fb   :  { %2715 = vset.pattern.permute.xlu1 %v4037_v0 }
 0x1fc   :  { %729 = vrot.lane.b32.xlu2 %v3252_v46, %s2929_s4  ;;  %s4113_s4 = sld [smem:[#allocation29_spill]] }
 0x1fd   :  { %v3308_v55 = vpop.permute.xlu2 %462 }
 0x204   :  { %769 = vrot.lane.b32.xlu2 %v3252_v46, %s2931_s28  ;;  %s2937_s28 = smov 4  }
 0x205   :  { %v3313_v41 = vpop.permute.xlu1 %500  ;;  %v3315_v57 = vpop.permute.xlu2 %506 }
 0x206   :  { %v512_v39 = vsel %vm508_vm6, %v3315_v57, %v3313_v41 }
 0x207   :  { %v524_v25 = vmul.f32 %v516_v28, %v512_v39  ;;  %v3405_v28 = vmul.f32 %v3306_v54, %v631_v48 }
 0x209   :  { %v532_v0 = vmul.f32 %v3310_v56, %v524_v25  ;;  %v810_v25 = vld [vmem:[#allocation2 + $0x18] sm:$0xff] }
 0x20c   :  { %873 = vperm.xlu2 %2705, %v371_v58   ;;  %v833_v58 = vld [vmem:[#allocation2 + $0xd0] sm:$0xff] }
 0x20d   :  { %v3320_v60 = vpop.permute.xlu1 %540  ;;  %901 = vmatpush.msrb.mxu1 %v833_v58 }
 0x20e   :  { %v3322_v61 = vpop.permute.xlu2 %546 }
 0x20f   :  { %902 = vmatpush.msrb.mxu1 %v832_v20  ;;  %v3388_v20 = vld [vmem:[%s2987_s3 + $0x3] ss:$8 sm:$0xf] }
 0x210   :  { %v596_v45 = vperm.slane %v3388_v20, 0 }
 0x211   :  { %903 = vmatpush.msrb.mxu1 %v831_v30  ;;  %v845_v30 = vld [vmem:[#allocation2 + $0x130] sm:$0xff] }
 0x212   :  { %925 = vmatpush.msra.mxu2 %v845_v30  ;;  %v559_v30 = vperm.slane %v3381_v40, 3 }
 0x213   :  { %v3342_v8 = vpop.permute.xlu0 %464  ;;  %904 = vmatpush.msrb.mxu1 %v830_v12  ;;  %v844_v12 = vld [vmem:[#allocation2 + $0x128] sm:$0xff] }
 0x214   :  { %971 = vperm.xlu2 %2705, %v961_v62   ;;  %v472_v22 = vsel %vm468_vm5, %v3342_v8, %v3294_v51  ;;  %v469_v35 = vsel %vm468_vm5, %v3308_v55, %v3342_v8  ;;  %v3422_v8 = vmul.f32 %v3306_v54, %v633_v49  ;;  %v859_v49 = vld [vmem:[#allocation2 + $0x1a0] sm:$0xff]  ;;  %926 = vmatpush.msra.mxu2 %v844_v12 }
 0x215   :  { %v3327_v1 = vpop.permute.xlu1 %580  ;;  %v483_v58 = vmul.f32 %v475_v15, %v472_v22  ;;  %v813_v22 = vld [vmem:[#allocation2 + $0x30] sm:$0xff]  ;;  %905 = vmatpush.msrb.mxu1 %v829_v29  ;;  %v827_v29 = vld [vmem:[#allocation2 + $0xa0] sm:$0xff]  ;;  %v486_v16 = vmul.f32 %v478_v38, %v469_v35  ;;  %v842_v38 = vld [vmem:[#allocation2 + $0x118] sm:$0xff] }
 0x216   :  { %v3329_v2 = vpop.permute.xlu2 %584  ;;  %885 = vmatpush.msrb.mxu0 %v813_v22  ;;  %4079 = vst [vmem:[#allocation36_spill] sm:$0xff] %v3422_v8  ;;  %v811_v22 = vld [vmem:[#allocation2 + $0x20] sm:$0xff]  ;;  %v858_v35 = vld [vmem:[#allocation2 + $0x198] sm:$0xff] }
 0x217   :  { %v492_v39 = vmul.f32 %v3289_v50, %v483_v58  ;;  %v860_v58 = vld [vmem:[#allocation2 + $0x1a8] sm:$0xff] }
 0x218   :  { %886 = vmatpush.msrb.mxu0 %v812_v11  ;;  %946 = vmatpush.msra.mxu3 %v860_v58  ;;  %v666_v11 = vperm.slane %v3426_v47, 3  ;;  %v808_v58 = vld [vmem:[#allocation2 + $0x8] sm:$0xff] }
 0x21a   :  { %887 = vmatpush.msrb.mxu0 %v811_v22  ;;  %947 = vmatpush.msra.mxu3 %v859_v49  ;;  %v3459_v49 = vld [vmem:[%s2987_s3 + $0x6] ss:$8 sm:$0xf] }
 0x21b   :  { %v3354_v34 = vpop.permute.xlu0 %653 }
 0x21c   :  { %2716 = vset.pattern.permute.xlu2 %v4033_v10  ;;  %v634_v10 = vmul.f32 %v626_v23, %v3235_v37  ;;  %v552_v37 = vsel %vm548_vm7, %v3322_v61, %v3320_v60  ;;  %v624_v23 = vperm.slane %v3349_v32, 1  ;;  %v828_v32 = vld [vmem:[#allocation2 + $0xa8] sm:$0xff]  ;;  %888 = vmatpush.msrb.mxu0 %v810_v25 }
 0x21d   :  { %v3332_v3 = vpop.permute.xlu1 %687  ;;  %v564_v26 = vmul.f32 %v556_v31, %v552_v37  ;;  %906 = vmatpush.msrb.mxu1 %v828_v32  ;;  %v826_v31 = vld [vmem:[#allocation2 + $0x98] sm:$0xff]  ;;  %v536_v37 = vadd.f32 %v532_v0, %v492_v39  ;;  %v599_v32 = vperm.slane %v3388_v20, 3  ;;  %v809_v0 = vld [vmem:[#allocation2 + $0x10] sm:$0xff]  ;;  %948 = vmatpush.msra.mxu3 %v858_v35  ;;  %v824_v25 = vld [vmem:[#allocation2 + $0x88] sm:$0xff] }
 0x21e   :  { %v3334_v4 = vpop.permute.xlu2 %586  ;;  %v3419_v21 = vmul.f32 %v3306_v54, %v634_v10  ;;  %v843_v10 = vld [vmem:[#allocation2 + $0x120] sm:$0xff]  ;;  %v632_v24 = vmul.f32 %v624_v23, %v3252_v46  ;;  %v825_v39 = vld [vmem:[#allocation2 + $0x90] sm:$0xff]  ;;  %889 = vmatpush.msrb.mxu0 %v809_v0 }
 0x21f   :  { %v592_v48 = vsel %vm588_vm8, %v3334_v4, %v3327_v1  ;;  %907 = vmatpush.msrb.mxu1 %v827_v29  ;;  %927 = vmatpush.msra.mxu2 %v843_v10  ;;  %v518_v10 = vperm.slane %v3364_v13, 2 }
 0x220   :  { %v604_v43 = vmul.f32 %v596_v45, %v592_v48  ;;  %v659_v45 = vsel %vm655_vm9, %v3354_v34, %v3301_v53  ;;  %v665_v48 = vperm.slane %v3426_v47, 2  ;;  %v3462_v46 = vmul.f32 %v3306_v54, %v632_v24  ;;  %890 = vmatpush.msrb.mxu0 %v808_v58 }
 0x221   :  { %908 = vmatpush.msrb.mxu1 %v826_v31  ;;  %928 = vmatpush.msra.mxu2 %v842_v38  ;;  %v495_v31 = vmul.f32 %v3289_v50, %v486_v16  ;;  %v476_v54 = vperm.slane %v3352_v33, 1  ;;  %v477_v24 = vperm.slane %v3352_v33, 2  ;;  %v807_v16 = vld [vmem:[#allocation2] sm:$0xff] }
 0x222   :  { %v612_v8 = vmul.f32 %v3296_v52, %v604_v43  ;;  %v706_v43 = vperm.slane %v3459_v49, 3  ;;  %v855_v33 = vld [vmem:[#allocation2 + $0x180] sm:$0xff]  ;;  %891 = vmatpush.msrb.mxu0 %v807_v16 }
 0x223   :  { %909 = vmatpush.msrb.mxu1 %v825_v39  ;;  %v3488_v39 = vld [vmem:[%s2987_s3 + $0x7] ss:$8 sm:$0xf]  ;;  %v3524_v16 = vld [vmem:[%s2987_s3 + $0x20] ss:$8 sm:$0xf] }
 0x224   :  { %s2932_s3 = smov 120  }
 0x225   :  { %v3338_v6 = vpop.permute.xlu1 %727  ;;  %v3383_v44 = vpop.permute.xlu0 %502  ;;  %910 = vmatpush.msrb.mxu1 %v824_v25  ;;  %v4082_v25 = vperm.slane %v3381_v40, 1 }
 0x226   :  { %v3340_v7 = vpop.permute.xlu2 %651 }
 0x22d   :  { %v3344_v17 = vpop.permute.xlu1 %504  ;;  %v3442_v23 = vpop.permute.xlu0 %542 }
 0x22e   :  { %v3346_v18 = vpop.permute.xlu2 %693  ;;  %v509_v27 = vsel %vm508_vm6, %v3344_v17, %v3315_v57 }
 0x22f   :  { %v527_v12 = vmul.f32 %v519_v19, %v509_v27  ;;  %v841_v27 = vld [vmem:[#allocation2 + $0x110] sm:$0xff] }
 0x230   :  { %v857_v19 = vld [vmem:[#allocation2 + $0x190] sm:$0xff]  ;;  %929 = vmatpush.msra.mxu2 %v841_v27 }
 0x231   :  { %949 = vmatpush.msra.mxu3 %v857_v19  ;;  %v699_v19 = vsel %vm695_vm10, %v3346_v18, %v3332_v3 }
 0x235   :  { %v3359_v62 = vpop.permute.xlu1 %544 }
 0x236   :  { %v3361_v9 = vpop.permute.xlu2 %733  ;;  %v549_v57 = vsel %vm548_vm7, %v3359_v62, %v3322_v61  ;;  %v572_v61 = vmul.f32 %v3318_v59, %v564_v26  ;;  %v589_v26 = vsel %vm588_vm8, %v3329_v2, %v3334_v4  ;;  %v840_v4 = vld [vmem:[#allocation2 + $0x108] sm:$0xff] }
 0x237   :  { %v567_v42 = vmul.f32 %v559_v30, %v549_v57  ;;  %v535_v30 = vmul.f32 %v3310_v56, %v527_v12  ;;  %v607_v57 = vmul.f32 %v599_v32, %v589_v26  ;;  %v511_v12 = vsel %vm508_vm6, %v3313_v41, %v3383_v44  ;;  %930 = vmatpush.msra.mxu2 %v840_v4  ;;  %v650_v26 = vpop.permute.xlu0 %649 }
 0x238   :  { %v656_v32 = vsel %vm655_vm9, %v3340_v7, %v3354_v34  ;;  %v510_v41 = vsel %vm508_vm6, %v3383_v44, %v3344_v17  ;;  %v664_v34 = vperm.slane %v3426_v47, 1  ;;  %v550_v4 = vsel %vm548_vm7, %v3442_v23, %v3359_v62 }
 0x239   :  { %v575_v0 = vmul.f32 %v3318_v59, %v567_v42  ;;  %v539_v42 = vadd.f32 %v535_v30, %v495_v31  ;;  %v526_v27 = vmul.f32 %v518_v10, %v510_v41  ;;  %v745_v30 = vperm.slane %v3488_v39, 2 }
 0x23a   :  { %v658_v62 = vsel %vm655_vm9, %v3301_v53, %v650_v26  ;;  %v703_v53 = vperm.slane %v3459_v49, 0 }
 0x23d   :  { %v3394_v14 = vpop.permute.xlu1 %691 }
 0x23e   :  { %4077 = vst [vmem:[#allocation34_spill] sm:$0xff] %v3394_v14  ;;  %v3396_v15 = vpop.permute.xlu2 %773  ;;  %v674_v14 = vmul.f32 %v666_v11, %v659_v45  ;;  %v839_v11 = vld [vmem:[#allocation2 + $0x100] sm:$0xff]  ;;  %v558_v45 = vperm.slane %v3381_v40, 2 }
 0x23f   :  { %4078 = vst [vmem:[#allocation35_spill] sm:$0xff] %v3396_v15  ;;  %v576_v15 = vadd.f32 %v572_v61, %v536_v37  ;;  %v823_v37 = vld [vmem:[#allocation2 + $0x80] sm:$0xff]  ;;  %v551_v61 = vsel %vm548_vm7, %v3320_v60, %v3442_v23  ;;  %931 = vmatpush.msra.mxu2 %v839_v11  ;;  %v673_v60 = vmul.f32 %v665_v48, %v656_v32  ;;  %v785_v11 = vperm.slane %v3524_v16, 2 }
 0x240   :  { %911 = vmatpush.msrb.mxu1 %v823_v37  ;;  %v682_v44 = vmul.f32 %v3325_v63, %v674_v14  ;;  %v615_v48 = vmul.f32 %v3296_v52, %v607_v57  ;;  %v565_v31 = vmul.f32 %v4082_v25, %v551_v61  ;;  %v705_v14 = vperm.slane %v3459_v49, 2 }
 0x241   :  { %v3528_v37 = vmul.f32 %v3325_v63, %v673_v60  ;;  %v714_v57 = vmul.f32 %v706_v43, %v699_v19  ;;  %v657_v23 = vsel %vm655_vm9, %v650_v26, %v3340_v7  ;;  %v598_v43 = vperm.slane %v3388_v20, 2 }
 0x242   :  { %v739_v7 = vsel %vm735_vm11, %v3361_v9, %v3338_v6  ;;  %v704_v61 = vperm.slane %v3459_v49, 1 }
 0x245   :  { %v3451_v22 = vpop.permute.xlu1 %731 }
 0x246   :  { %4080 = vst [vmem:[#allocation37_spill] sm:$0xff] %v3451_v22  ;;  %v461_v29 = vpop.permute.xlu2 %460  ;;  %v856_v22 = vld [vmem:[#allocation2 + $0x188] sm:$0xff] }
 0x247   :  { %v470_v38 = vsel %vm468_vm5, %v461_v29, %v3308_v55  ;;  %v471_v35 = vsel %vm468_vm5, %v3294_v51, %v461_v29  ;;  %v663_v55 = vperm.slane %v3426_v47, 0  ;;  %950 = vmatpush.msra.mxu3 %v856_v22  ;;  %v616_v51 = vadd.f32 %v612_v8, %v576_v15 }
 0x248   :  { %v484_v58 = vmul.f32 %v476_v54, %v471_v35  ;;  %v485_v22 = vmul.f32 %v477_v24, %v470_v38  ;;  %v4081_v15 = vperm.slane %v3364_v13, 1  ;;  %v746_v29 = vperm.slane %v3488_v39, 3 }
 0x249   :  { %951 = vmatpush.msra.mxu3 %v855_v33  ;;  %v579_v13 = vadd.f32 %v575_v0, %v539_v42  ;;  %v643_v10 = vadd.f32 %v3405_v28, %v616_v51  ;;  %v534_v28 = vmul.f32 %v3310_v56, %v526_v27  ;;  %v566_v38 = vmul.f32 %v558_v45, %v550_v4 }
 0x24a   :  { %v525_v8 = vmul.f32 %v4081_v15, %v511_v12  ;;  %v493_v54 = vmul.f32 %v3289_v50, %v484_v58  ;;  %v494_v24 = vmul.f32 %v3289_v50, %v485_v22  ;;  %v573_v35 = vmul.f32 %v3318_v59, %v565_v31  ;;  %v4083_v58 = vld [vmem:[#allocation34_spill] sm:$0xff] }
 0x24b   :  { %v619_v50 = vadd.f32 %v615_v48, %v579_v13  ;;  %v597_v33 = vperm.slane %v3388_v20, 1  ;;  %v671_v12 = vmul.f32 %v663_v55, %v658_v62  ;;  %v672_v51 = vmul.f32 %v664_v34, %v657_v23 }
 0x24c   :  { %v533_v40 = vmul.f32 %v3310_v56, %v525_v8  ;;  %v538_v0 = vadd.f32 %v534_v28, %v494_v24  ;;  %v722_v56 = vmul.f32 %v3336_v5, %v714_v57  ;;  %v574_v20 = vmul.f32 %v3318_v59, %v566_v38 }
 0x24d   :  { %v3504_v17 = vpop.permute.xlu1 %771  ;;  %v646_v55 = vadd.f32 %v3419_v21, %v619_v50  ;;  %v696_v22 = vsel %vm695_vm10, %v4083_v58, %v3346_v18  ;;  %v743_v8 = vperm.slane %v3488_v39, 0  ;;  %v679_v59 = vmul.f32 %v3325_v63, %v671_v12  ;;  %v4086_v12 = vld [vmem:[#allocation35_spill] sm:$0xff] }
 0x24e   :  { %v690_v47 = vpop.permute.xlu2 %689  ;;  %v537_v32 = vadd.f32 %v533_v40, %v493_v54  ;;  %v578_v60 = vadd.f32 %v574_v20, %v538_v0  ;;  %v680_v26 = vmul.f32 %v3325_v63, %v672_v51  ;;  %v754_v13 = vmul.f32 %v746_v29, %v739_v7 }
 0x24f   :  { %v698_v21 = vsel %vm695_vm10, %v3332_v3, %v690_v47  ;;  %v686_v48 = vadd.f32 %v682_v44, %v646_v55  ;;  %v713_v25 = vmul.f32 %v705_v14, %v696_v22  ;;  %v744_v54 = vperm.slane %v3488_v39, 1  ;;  %v4085_v44 = vld [vmem:[#allocation36_spill] sm:$0xff] }
 0x250   :  { %v711_v3 = vmul.f32 %v703_v53, %v698_v21  ;;  %v683_v63 = vadd.f32 %v679_v59, %v643_v10  ;;  %v786_v57 = vperm.slane %v3524_v16, 3  ;;  %v783_v38 = vperm.slane %v3524_v16, 0 }
 0x251   :  { %v726_v28 = vadd.f32 %v722_v56, %v686_v48  ;;  %v721_v23 = vmul.f32 %v3336_v5, %v713_v25  ;;  %v3612_v25 = vld [vmem:[%s3017_s6] sm:$0x3f]  ;;  %s2935_s6 = smov 7  }
 0x252   :  { %v719_v10 = vmul.f32 %v3336_v5, %v711_v3  ;;  %1065 = vperm.xlu2 %2716, %v3612_v25  }
 0x255   :  { %v583_v41 = vpop.permute.xlu1 %582 }
 0x256   :  { %v730_v42 = vpop.permute.xlu2 %729  ;;  %v590_v45 = vsel %vm588_vm8, %v583_v41, %v3329_v2  ;;  %v591_v34 = vsel %vm588_vm8, %v3327_v1, %v583_v41  ;;  %v577_v2 = vadd.f32 %v573_v35, %v537_v32  ;;  %v697_v1 = vsel %vm695_vm10, %v690_v47, %v4083_v58  ;;  %v4084_v47 = vld [vmem:[#allocation37_spill] sm:$0xff]  ;;  %v757_v35 = vpop.permute.xlu0 %756 }
 0x257   :  { %v605_v49 = vmul.f32 %v597_v33, %v591_v34  ;;  %v606_v15 = vmul.f32 %v598_v43, %v590_v45  ;;  %v738_v19 = vsel %vm735_vm11, %v3338_v6, %v730_v42  ;;  %v736_v24 = vsel %vm735_vm11, %v4084_v47, %v3361_v9 }
 0x258   :  { %v737_v6 = vsel %vm735_vm11, %v730_v42, %v4084_v47  ;;  %v751_v40 = vmul.f32 %v743_v8, %v738_v19  ;;  %v784_v9 = vperm.slane %v3524_v16, 1  ;;  %v753_v33 = vmul.f32 %v745_v30, %v736_v24 }
 0x259   :  { %v613_v27 = vmul.f32 %v3296_v52, %v605_v49  ;;  %v614_v18 = vmul.f32 %v3296_v52, %v606_v15  ;;  %v712_v52 = vmul.f32 %v704_v61, %v697_v1  ;;  %v752_v43 = vmul.f32 %v744_v54, %v737_v6 }
 0x25a   :  { %v776_v32 = vsel %vm775_vm12, %v3504_v17, %v4086_v12  ;;  %v759_v53 = vmul.f32 %v757_v35, %v751_v40  ;;  %v762_v61 = vmul.f32 %v757_v35, %v754_v13  ;;  %v761_v41 = vmul.f32 %v757_v35, %v753_v33  ;;  %v962_v13 = vld [vmem:[%s3002_s19 + $0x10] sm:$0xff] }
 0x25b   :  { %v617_v31 = vadd.f32 %v613_v27, %v577_v2  ;;  %v618_v4 = vadd.f32 %v614_v18, %v578_v60  ;;  %v720_v0 = vmul.f32 %v3336_v5, %v712_v52  ;;  %v723_v42 = vadd.f32 %v719_v10, %v683_v63  ;;  %976 = vperm.xlu0 %2714, %v962_v13   ;;  %v2765_v13 = vld [vmem:[%s4100_s10 + $0x4] ss:$0 sm:$0xff] }
 0x25c   :  { %v760_v20 = vmul.f32 %v757_v35, %v752_v43  ;;  %v793_v5 = vmul.f32 %v785_v11, %v776_v32  ;;  %v766_v58 = vadd.f32 %v762_v61, %v726_v28  ;;  %v960_v11 = vld [vmem:[%s3002_s19] sm:$0xff]  ;;  %v4087_v52 = vmov 3   ;;  %s2933_s19 = smov 9  }
 0x25d   :  { %v644_v29 = vadd.f32 %v3462_v46, %v617_v31  ;;  %v645_v14 = vadd.f32 %v4085_v44, %v618_v4  ;;  %v768_v62 = vpop.permute.xlu1 %767  ;;  %v763_v22 = vadd.f32 %v759_v53, %v723_v42  ;;  %966 = vperm.xlu1 %2715, %v960_v11   ;;  %v4088_v40 = vmov 7  }
 0x25e   :  { %v770_v50 = vpop.permute.xlu2 %769  ;;  %v779_v51 = vsel %vm775_vm12, %v4086_v12, %v768_v62  ;;  %2722 = vset.pattern.permute.xlu2 %v4088_v40  ;;  %v4089_v44 = vmov 2   ;;  %v4091_v28 = vmov 4  }
 0x25f   :  { %v685_v46 = vadd.f32 %v3528_v37, %v645_v14  ;;  %v684_v56 = vadd.f32 %v680_v26, %v644_v29  ;;  %v777_v39 = vsel %vm775_vm12, %v770_v50, %v3504_v17  ;;  %v778_v30 = vsel %vm775_vm12, %v768_v62, %v770_v50  ;;  %v1017_v26 = vld [vmem:[%s3012_s30] sm:$0x3f]  ;;  %s4096_s30 = sld [smem:[#allocation18_spill]] }
 0x260   :  { %v794_v55 = vmul.f32 %v786_v57, %v779_v51  ;;  %v791_v45 = vmul.f32 %v783_v38, %v778_v30  ;;  %v792_v34 = vmul.f32 %v784_v9, %v777_v39  ;;  %v2607_v29 = vld [vmem:[%s2997_s14] sm:$0xff]  ;;  %v4090_v14 = vmov 6   ;;  %v959_v57 = vld [vmem:[%s2997_s14 + $0x8] sm:$0xf]  ;;  %s4095_s14 = sld [smem:[#allocation16_spill]] }
 0x261   :  { %v725_v37 = vadd.f32 %v721_v23, %v685_v46  ;;  %v724_v7 = vadd.f32 %v720_v0, %v684_v56  ;;  %v984_v62 = vunpack.c.l.b16 %v959_v57  ;;  %v4092_v38 = vmov 5   ;;  %v1016_v30 = vld [vmem:[%s3007_s24] sm:$0x7]  ;;  %s2934_s24 = smov 119  }
 0x262   :  { %v4093_v9 = vmov 0  }
 0x263   :  { %v764_v17 = vadd.f32 %v760_v20, %v724_v7  ;;  %v765_v15 = vadd.f32 %v761_v41, %v725_v37  ;;  %2718 = vset.pattern.permute.xlu0 %v4087_v52  ;;  %v986_v23 = vpack.c.b16 %v984_v62, %v984_v62  ;;  %v4098_v20 = vmov 8  }
 0x264   :  { %1087 = vperm.xlu0 %2718, %v3612_v25  }
 0x265   :  { %v797_v49 = vpop.permute.xlu1 %796  ;;  %1024 = vperm.xlu1 %2715, %v1017_v26   ;;  %v2772_v26 = vld [vmem:[%s4100_s10 + $0x2] ss:$0 sm:$0xff] }
 0x266   :  { %v799_v36 = vmul.f32 %v797_v49, %v791_v45  ;;  %v801_v8 = vmul.f32 %v797_v49, %v793_v5  ;;  %v802_v59 = vmul.f32 %v797_v49, %v794_v55  ;;  %v800_v21 = vmul.f32 %v797_v49, %v792_v34  ;;  %v874_v18 = vpop.permute.xlu2 %873  ;;  %v1019_v5 = vld [vmem:[%s4094_s29] sm:$0x3f]  ;;  %v1271_v45 = vld [vmem:[%s4096_s30 + $0x8] sm:$0xf]  ;;  %s2938_s29 = smov 5  }
 0x267   :  { %v1212_v55 = vld [vmem:[%s4095_s14] sm:$0xff] }
 0x268   :  { %v803_v2 = vadd.f32 %v799_v36, %v763_v22  ;;  %v804_v60 = vadd.f32 %v800_v21, %v764_v17  ;;  %v805_v1 = vadd.f32 %v801_v8, %v765_v15  ;;  %v806_v16 = vadd.f32 %v802_v59, %v766_v58  ;;  %v3662_v34 = vld [vmem:[%s4097_s1] sm:$0xff] }
 0x26a   :  { %892 = vmatmul.f32.vlgmr.msrb.gmra.mxu0 %v803_v2  ;;  %912 = vmatmul.f32.vlgmr.msrb.gmra.mxu1 %v804_v60  ;;  %v2609_v2 = vld [vmem:[%s4099_s7] sm:$0xff] }
 0x26b   :  { %932 = vmatmul.f32.vlgmr.msra.gmra.mxu2 %v805_v1  ;;  %952 = vmatmul.f32.vlgmr.msra.gmra.mxu3 %v806_v16  ;;  %v2769_v60 = vld [vmem:[%s4100_s10 + $0x1] ss:$0 sm:$0xff]  ;;  %v2766_v16 = vld [vmem:[%s4100_s10] ss:$0 sm:$0xff] }
 0x26c   :  { %2721 = vset.pattern.permute.xlu0 %v4090_v14 }
 0x26d   :  { %1054 = vperm.xlu1 %2715, %v3612_v25  }
 0x26e   :  { %v972_v43 = vpop.permute.xlu2 %971 }
 0x275   :  { %2717 = vset.pattern.permute.xlu1 %v4089_v44 }
 0x276   :  { %1076 = vperm.xlu1 %2717, %v3612_v25  }
 0x27e   :  { %2719 = vset.pattern.permute.xlu1 %v4091_v28 }
 0x27f   :  { %1096 = vperm.xlu1 %2719, %v3612_v25  }
 0x287   :  { %2720 = vset.pattern.permute.xlu1 %v4092_v38 }
 0x288   :  { %1107 = vperm.xlu1 %2720, %v3612_v25  }
 0x290   :  { %2725 = vset.pattern.permute.xlu1 %v4093_v9 }
 0x2ac   :  { %v1066_v58 = vpop.permute.xlu2 %1065 }
 0x2cd   :  { %v977_v33 = vpop.permute.xlu0 %976 }
 0x2cf   :  { %v967_v12 = vpop.permute.xlu1 %966 }
 0x2d6   :  { %v1088_v8 = vpop.permute.xlu0 %1087 }
 0x2d7   :  { %v1025_v37 = vpop.permute.xlu1 %1024 }
 0x2df   :  { %v1055_v22 = vpop.permute.xlu1 %1054 }
 0x2e7   :  { %v893_v27 = vpop.f32.mrf.mxu0  ;;  %v913_v48 = vpop.f32.mrf.mxu1 }
 0x2e8   :  { %v894_v19 = vadd.f32 %v893_v27, %v874_v18  ;;  %v1077_v17 = vpop.permute.xlu1 %1076 }
 0x2ea   :  { %v914_v3 = vadd.f32 %v913_v48, %v894_v19  ;;  %v2767_v19 = vld [vmem:[%s4100_s10 + $0x3] ss:$0 sm:$0xff] }
 0x2ee   :  { %v933_v31 = vpop.f32.mrf.mxu2  ;;  %v953_v54 = vpop.f32.mrf.mxu3 }
 0x2ef   :  { %v934_v4 = vadd.f32 %v933_v31, %v914_v3 }
 0x2f1   :  { %v954_v47 = vadd.f32 %v953_v54, %v934_v4  ;;  %v1097_v36 = vpop.permute.xlu1 %1096  ;;  %v2770_v54 = vld [vmem:[%s4100_s10 + $0x5] ss:$0 sm:$0xff] }
 0x2f3   :  { %v956_v24 = vmax.f32 %v954_v47, 0.0 }
 0x2f5   :  { %v963_v6 = vpack.c.bf16 %v956_v24, %v956_v24  ;;  %v1157_v24 = vld [vmem:[%s4101_s11 + $0x10] sm:$0xff] }
 0x2f7   :  { %v996_v63 = vsel %vm994_vm13, %v963_v6, 0  ;;  %v1211_v6 = vld [vmem:[%s4099_s7 + $0x8] sm:$0xf] }
 0x2f8   :  { %1005 = vmatpush.bf16.msra.mxu0 %v996_v63 }
 0x2fa   :  { %v1108_v21 = vpop.permute.xlu1 %1107 }
 0x2fb   :  { %2488 = vmatmul.msk.bf16.vlgmr.msra.gmra.mxu0 %vm987_vm14, %v2607_v29  ;;  %v1220_v29 = vunpack.c.l.b16 %v1211_v6 }
 0x30b   :  { %2489 = vmatmul.msk.bf16.gmra.mxu0 %vm987_vm14, %v986_v23 }
 0x378   :  { %v1007_v50 = vpop.f32.mrf.mxu0 }
 0x379   :  { %v1008_v56 = vadd.f32 %v1007_v50, %v967_v12  ;;  %v1222_v50 = vpack.c.b16 %v1220_v29, %v1220_v29 }
 0x380   :  { %v1009_v35 = vpop.f32.mrf.mxu0 }
 0x381   :  { %v1010_v0 = vadd.f32 %v1009_v35, %v972_v43  ;;  %v2773_v43 = vld [vmem:[%s4100_s10 + $0x6] ss:$0 sm:$0xff] }
 0x383   :  { %v1020_v51 = vpack.c.bf16 %v1010_v0, %v1008_v56 }
 0x388   :  { %v1012_v10 = vpop.f32.mrf.mxu0 }
 0x389   :  { %v1013_v46 = vadd.f32 %v1012_v10, %v977_v33  ;;  %v2768_v33 = vld [vmem:[%s4100_s10 + $0x7] ss:$0 sm:$0xff] }
 0x38b   :  { %v1021_v32 = vpack.c.bf16 %v1013_v46, %v1013_v46 }
 0x38d   :  { %v1031_v53 = vsel %vm389_vm3, %v1021_v32, 0 }
 0x38e   :  { %1039 = vmatpush.bf16.msra.mxu1 %v1031_v53  ;;  %1235 = vmatpush.bf16.msrb.mxu3 %v1031_v53 }
 0x390   :  { %v1014_v39 = vpop.f32.mrf.mxu0 }
 0x392   :  { %1040 = vmatpush.bf16.msra.mxu1 %v1020_v51  ;;  %1236 = vmatpush.bf16.msrb.mxu3 %v1020_v51  ;;  %v2771_v51 = vld [vmem:[%s4100_s10 + $0x8] ss:$0 sm:$0xff] }
 0x395   :  { %2490 = vmatmul.msk.bf16.vlgmr.msra.gmra.mxu1 %vm385_vm4, %v1016_v30  ;;  %2501 = vmatmul.msk.bf16.vlgmr.msrb.gmra.mxu3 %vm385_vm4, %v2609_v2 }
 0x3a5   :  { %2502 = vmatmul.msk.bf16.gmra.mxu3 %vm385_vm4, %v1222_v50 }
 0x412   :  { %v1042_v7 = vpop.f32.mrf.mxu1 }
 0x413   :  { %v1043_v61 = vadd.f32 %v1042_v7, %v1025_v37 }
 0x415   :  { %v3635_v41 = vmax.f32 %v1043_v61, 0.0 }
 0x417   :  { %1123 = vrot.lane.b32.xlu1 %v3635_v41, %s2932_s3  ;;  %1059 = vrot.lane.b32.xlu0 %v3635_v41, %s2912_s16  ;;  %v1094_v57 = vmul.f32 %v2765_v13, %v3635_v41 }
 0x418   :  { %1047 = vrot.lane.b32.xlu2 %v3635_v41, %s2933_s19 }
 0x419   :  { %v1099_v12 = vmul.f32 %v1097_v36, %v1094_v57 }
 0x41a   :  { %v1044_v42 = vpop.f32.mrf.mxu1 }
 0x41f   :  { %1134 = vrot.lane.b32.xlu1 %v3635_v41, %s2934_s24  ;;  %1070 = vrot.lane.b32.xlu0 %v3635_v41, %s2935_s6 }
 0x420   :  { %1129 = vperm.xlu2 %2722, %v3612_v25  }
 0x427   :  { %1118 = vperm.xlu0 %2721, %v3612_v25   ;;  %1171 = vperm.xlu1 %2725, %v1157_v24  }
 0x428   :  { %1081 = vrot.lane.b32.xlu2 %v3635_v41, %s2926_s21 }
 0x429   :  { %2723 = vset.pattern.permute.xlu2 %v4098_v20 }
 0x42f   :  { %2724 = vset.pattern.permute.xlu0 %v4093_v9 }
 0x430   :  { %1101 = vrot.lane.b32.xlu2 %v3635_v41, %s2925_s17  ;;  %1147 = vperm.xlu0 %2724, %v1019_v5  }
 0x438   :  { %1112 = vrot.lane.b32.xlu2 %v3635_v41, %s2936_s2  ;;  %1252 = vperm.xlu0 %2724, %v1212_v55  }
 0x440   :  { %1140 = vperm.xlu2 %2723, %v3612_v25   ;;  %1285 = vperm.xlu0 %2724, %v1271_v45   ;;  %v1155_v45 = vld [vmem:[%s4101_s11] sm:$0xff] }
 0x441   :  { %1161 = vperm.xlu1 %2725, %v1155_v45  }
 0x448   :  { %1325 = vperm.xlu0 %2724, %v3662_v34   ;;  %2726 = vset.pattern.permute.xlu2 %v4093_v9 }
 0x450   :  { %2728 = vset.pattern.permute.xlu0 %v4089_v44 }
 0x451   :  { %1366 = vperm.xlu0 %2728, %v3662_v34  }
 0x459   :  { %2730 = vset.pattern.permute.xlu0 %v4091_v28 }
 0x45a   :  { %1402 = vperm.xlu0 %2730, %v3662_v34  }
 0x462   :  { %2732 = vset.pattern.permute.xlu0 %v4092_v38 }
 0x463   :  { %1422 = vperm.xlu0 %2732, %v3662_v34  }
 0x46b   :  { %2738 = vset.pattern.permute.xlu0 %v4098_v20 }
 0x46c   :  { %1482 = vperm.xlu0 %2738, %v3662_v34  }
 0x472   :  { %v1048_v49 = vpop.permute.xlu2 %1047 }
 0x473   :  { %v1051_v18 = vmul.f32 %v2766_v16, %v1048_v49  ;;  %v1270_v16 = vld [vmem:[%s4096_s30] sm:$0xff]  ;;  %s2941_s30 = smov 124  }
 0x474   :  { %2741 = vset.pattern.permute.xlu0 %v4088_v40 }
 0x475   :  { %v1057_v31 = vmul.f32 %v1055_v22, %v1051_v18 }
 0x47a   :  { %v1130_v15 = vpop.permute.xlu2 %1129 }
 0x482   :  { %v1082_v59 = vpop.permute.xlu2 %1081 }
 0x483   :  { %v1085_v4 = vmul.f32 %v2767_v19, %v1082_v59  ;;  %v1213_v59 = vld [vmem:[%s4095_s14 + $0x8] sm:$0xff] }
 0x484   :  { %1257 = vperm.xlu1 %2725, %v1213_v59  }
 0x485   :  { %v1090_v35 = vmul.f32 %v1088_v8, %v1085_v4 }
 0x489   :  { %v1060_v1 = vpop.permute.xlu0 %1059  ;;  %v1124_v25 = vpop.permute.xlu1 %1123 }
 0x48a   :  { %v1102_v11 = vpop.permute.xlu2 %1101  ;;  %v1063_v27 = vmul.f32 %v2769_v60, %v1060_v1  ;;  %v1127_v53 = vmul.f32 %v2768_v33, %v1124_v25  ;;  %v2608_v1 = vld [vmem:[%s4102_s15] sm:$0xff] }
 0x48b   :  { %v1105_v10 = vmul.f32 %v2770_v54, %v1102_v11  ;;  %v4103_v11 = vmov 1  }
 0x48c   :  { %v1068_v48 = vmul.f32 %v1066_v58, %v1063_v27  ;;  %v1132_v42 = vmul.f32 %v1130_v15, %v1127_v53  ;;  %v1214_v58 = vld [vmem:[%s4095_s14 + $0x10] sm:$0xff]  ;;  %2727 = vset.pattern.permute.xlu1 %v4103_v11  ;;  %v1154_v27 = vld [vmem:[%s4102_s15 + $0x8] sm:$0xf]  ;;  %s2939_s14 = smov 125  }
 0x48d   :  { %v1110_v56 = vmul.f32 %v1108_v21, %v1105_v10  ;;  %1262 = vperm.xlu2 %2726, %v1214_v58   ;;  %v1156_v21 = vld [vmem:[%s4101_s11 + $0x8] sm:$0xff]  ;;  %1346 = vperm.xlu1 %2727, %v3662_v34   ;;  %v1179_v18 = vunpack.c.l.b16 %v1154_v27  ;;  %s2856_s11 = scalar_lea.hbm %s3152_s27, 128 }
 0x48e   :  { %v1069_v62 = vadd.f32 %v1068_v48, %v1057_v31  ;;  %v3706_v31 = vld [vmem:[%s4097_s1 + $0x8] sm:$0xf]  ;;  %s2942_s1 = smov 123  }
 0x48f   :  { %v1181_v19 = vpack.c.b16 %v1179_v18, %v1179_v18  ;;  %v1506_v27 = vld [vmem:[%s4106_s23 + $0x68] sm:$0xff] }
 0x491   :  { %v1071_v3 = vpop.permute.xlu0 %1070  ;;  %v1135_v37 = vpop.permute.xlu1 %1134 }
 0x492   :  { %v1074_v47 = vmul.f32 %v2772_v26, %v1071_v3  ;;  %v1113_v63 = vpop.permute.xlu2 %1112  ;;  %v1138_v5 = vmul.f32 %v2771_v51, %v1135_v37  ;;  %v1238_v26 = vpop.f32.mrf.mxu3  ;;  %v2610_v51 = vld [vmem:[%s4104_s18] sm:$0x30] }
 0x493   :  { %v1116_v39 = vmul.f32 %v2773_v43, %v1113_v63 }
 0x494   :  { %v1079_v23 = vmul.f32 %v1077_v17, %v1074_v47 }
 0x495   :  { %1166 = vperm.xlu2 %2726, %v1156_v21   ;;  %1350 = vperm.xlu1 %2727, %v3706_v31  }
 0x496   :  { %v1080_v46 = vadd.f32 %v1079_v23, %v1069_v62 }
 0x498   :  { %v1091_v32 = vadd.f32 %v1090_v35, %v1080_v46 }
 0x499   :  { %v1119_v0 = vpop.permute.xlu0 %1118  ;;  %v1172_v4 = vpop.permute.xlu1 %1171 }
 0x49a   :  { %v1100_v30 = vadd.f32 %v1099_v12, %v1091_v32  ;;  %v1121_v61 = vmul.f32 %v1119_v0, %v1116_v39  ;;  %v1141_v41 = vpop.permute.xlu2 %1140  ;;  %v1240_v13 = vpop.f32.mrf.mxu3 }
 0x49b   :  { %v1143_v22 = vmul.f32 %v1141_v41, %v1138_v5 }
 0x49c   :  { %v1111_v7 = vadd.f32 %v1110_v56, %v1100_v30  ;;  %v2505_v56 = vld [vmem:[%s4104_s18] sm:$0xf] }
 0x49d   :  { %1280 = vperm.xlu2 %2726, %v1270_v16   ;;  %2735 = vset.pattern.permute.xlu1 %v4087_v52  ;;  %v2506_v30 = vor.u32 %v2610_v51, %v2505_v56  ;;  %v1507_v16 = vld [vmem:[%s4106_s23 + $0x70] sm:$0xff]  ;;  %v2776_v56 = vld [vmem:[%s4105_s22 + $0x2] ss:$0 sm:$0xff]  ;;  %v2781_v51 = vld [vmem:[%s4105_s22 + $0x3] ss:$0 sm:$0xff] }
 0x49e   :  { %v1122_v55 = vadd.f32 %v1121_v61, %v1111_v7  ;;  %1390 = vperm.xlu1 %2735, %v3706_v31  }
 0x4a0   :  { %v1133_v49 = vadd.f32 %v1132_v42, %v1122_v55 }
 0x4a2   :  { %v1148_v17 = vpop.permute.xlu0 %1147  ;;  %v1144_v36 = vadd.f32 %v1143_v22, %v1133_v49  ;;  %v1243_v48 = vpop.f32.mrf.mxu3  ;;  %v3743_v22 = vld [vmem:[%s4105_s22 + $0x4] ss:$0 sm:$0xff] }
 0x4a4   :  { %v1150_v8 = vadd.f32 %v1148_v17, %v1144_v36 }
 0x4a5   :  { %2729 = vset.pattern.permute.xlu2 %v4087_v52 }
 0x4a6   :  { %v1151_v2 = vmax.f32 %v1150_v8, 0.0  ;;  %1386 = vperm.xlu2 %2729, %v3662_v34   ;;  %2737 = vset.pattern.permute.xlu1 %v4091_v28 }
 0x4a7   :  { %1406 = vperm.xlu1 %2737, %v3706_v31  }
 0x4a8   :  { %v1158_v15 = vpack.c.bf16 %v1151_v2, %v1151_v2 }
 0x4aa   :  { %v1189_v60 = vsel %vm994_vm13, %v1158_v15, 0  ;;  %v1245_v25 = vpop.f32.mrf.mxu3  ;;  %v1253_v32 = vpop.permute.xlu0 %1252 }
 0x4ab   :  { %1198 = vmatpush.bf16.msrb.mxu2 %v1189_v60  ;;  %v1502_v25 = vld [vmem:[%s4106_s23 + $0x48] sm:$0xff] }
 0x4ae   :  { %2495 = vmatmul.msk.bf16.vlgmr.msrb.gmra.mxu2 %vm987_vm14, %v2608_v1  ;;  %2731 = vset.pattern.permute.xlu2 %v4093_v9  ;;  %v1508_v1 = vld [vmem:[%s4106_s23 + $0x78] sm:$0xff] }
 0x4af   :  { %1330 = vperm.xlu2 %2731, %v3706_v31   ;;  %2739 = vset.pattern.permute.xlu1 %v4092_v38 }
 0x4b0   :  { %1426 = vperm.xlu1 %2739, %v3706_v31   ;;  %1519 = vmatpush.msrb.mxu0 %v1508_v1  ;;  %v1555_v1 = vld [vmem:[%s4108_s8 + $0x28] sm:$0xff] }
 0x4b2   :  { %1520 = vmatpush.msrb.mxu0 %v1507_v16 }
 0x4b3   :  { %v1162_v24 = vpop.permute.xlu1 %1161 }
 0x4b4   :  { %1521 = vmatpush.msrb.mxu0 %v1506_v27 }
 0x4b7   :  { %2733 = vset.pattern.permute.xlu2 %v4089_v44 }
 0x4b8   :  { %1370 = vperm.xlu2 %2733, %v3706_v31   ;;  %2740 = vset.pattern.permute.xlu1 %v4090_v14 }
 0x4be   :  { %2496 = vmatmul.msk.bf16.gmra.mxu2 %vm987_vm14, %v1181_v19  ;;  %v1505_v19 = vld [vmem:[%s4106_s23 + $0x60] sm:$0xff] }
 0x4bf   :  { %1522 = vmatpush.msrb.mxu0 %v1505_v19  ;;  %v2777_v19 = vld [vmem:[%s4105_s22 + $0x7] ss:$0 sm:$0xff] }
 0x4c0   :  { %2734 = vset.pattern.permute.xlu2 %v4090_v14 }
 0x4c1   :  { %1442 = vperm.xlu2 %2734, %v3662_v34  }
 0x4c9   :  { %2736 = vset.pattern.permute.xlu2 %v4088_v40 }
 0x4ca   :  { %1462 = vperm.xlu2 %2736, %v3662_v34   ;;  %v1286_v34 = vpop.permute.xlu0 %1285 }
 0x4d2   :  { %2742 = vset.pattern.permute.xlu2 %v4098_v20  ;;  %v1326_v15 = vpop.permute.xlu0 %1325 }
 0x4da   :  { %v1367_v18 = vpop.permute.xlu0 %1366 }
 0x4e7   :  { %v1263_v54 = vpop.permute.xlu2 %1262 }
 0x4ef   :  { %v1167_v6 = vpop.permute.xlu2 %1166 }
 0x4f6   :  { %v1258_v10 = vpop.permute.xlu1 %1257 }
 0x4f7   :  { %v1281_v61 = vpop.permute.xlu2 %1280 }
 0x4ff   :  { %v3728_v37 = vpop.permute.xlu1 %1346 }
 0x500   :  { %v3768_v59 = vpop.permute.xlu2 %1386 }
 0x507   :  { %v3730_v7 = vpop.permute.xlu1 %1350 }
 0x509   :  { %v3773_v21 = vpop.permute.xlu2 %1330 }
 0x510   :  { %v3732_v5 = vpop.permute.xlu1 %1390 }
 0x512   :  { %v3776_v2 = vpop.permute.xlu2 %1370 }
 0x519   :  { %v1407_v17 = vpop.permute.xlu1 %1406 }
 0x51b   :  { %v3778_v60 = vpop.permute.xlu2 %1442 }
 0x531   :  { %v1200_v3 = vpop.f32.mrf.mxu2 }
 0x532   :  { %v1201_v62 = vadd.f32 %v1200_v3, %v1162_v24  ;;  %v1501_v3 = vld [vmem:[%s4106_s23 + $0x40] sm:$0xff]  ;;  %v1498_v24 = vld [vmem:[%s4106_s23 + $0x28] sm:$0xff] }
 0x534   :  { %v1247_v33 = vadd.f32 %v1238_v26, %v1201_v62  ;;  %v3784_v26 = vpop.permute.xlu2 %1462  ;;  %v1495_v62 = vld [vmem:[%s4106_s23 + $0x10] sm:$0xff] }
 0x536   :  { %v1265_v53 = vadd.f32 %v1253_v32, %v1247_v33  ;;  %v1493_v33 = vld [vmem:[%s4106_s23] sm:$0xff] }
 0x539   :  { %v1202_v47 = vpop.f32.mrf.mxu2 }
 0x53a   :  { %v1203_v63 = vadd.f32 %v1202_v47, %v1167_v6  ;;  %v1499_v47 = vld [vmem:[%s4106_s23 + $0x30] sm:$0xff]  ;;  %v3793_v6 = vpop.permute.xlu1 %1426 }
 0x53c   :  { %v1248_v50 = vadd.f32 %v1240_v13, %v1203_v63  ;;  %v1504_v13 = vld [vmem:[%s4106_s23 + $0x58] sm:$0xff]  ;;  %v1497_v63 = vld [vmem:[%s4106_s23 + $0x20] sm:$0xff] }
 0x53d   :  { %1523 = vmatpush.msrb.mxu0 %v1504_v13 }
 0x53e   :  { %v1266_v43 = vadd.f32 %v1258_v10, %v1248_v50  ;;  %v1494_v50 = vld [vmem:[%s4106_s23 + $0x8] sm:$0xff]  ;;  %v2778_v10 = vld [vmem:[%s4105_s22] ss:$0 sm:$0xff] }
 0x540   :  { %v1276_v39 = vpack.c.bf16 %v1266_v43, %v1265_v53  ;;  %v2775_v43 = vld [vmem:[%s4105_s22 + $0x1] ss:$0 sm:$0xff] }
 0x541   :  { %v1205_v29 = vpop.f32.mrf.mxu2 }
 0x542   :  { %v1206_v57 = vadd.f32 %v1205_v29, %v1172_v4  ;;  %v1500_v4 = vld [vmem:[%s4106_s23 + $0x38] sm:$0xff] }
 0x544   :  { %v1249_v23 = vadd.f32 %v1243_v48, %v1206_v57  ;;  %v1503_v48 = vld [vmem:[%s4106_s23 + $0x50] sm:$0xff]  ;;  %v1496_v57 = vld [vmem:[%s4106_s23 + $0x18] sm:$0xff] }
 0x545   :  { %1524 = vmatpush.msrb.mxu0 %v1503_v48 }
 0x546   :  { %v1267_v35 = vadd.f32 %v1263_v54, %v1249_v23 }
 0x547   :  { %1525 = vmatpush.msrb.mxu0 %v1502_v25  ;;  %v3813_v25 = vld [vmem:[%s4105_s22 + $0x8] ss:$0 sm:$0xff] }
 0x548   :  { %v1277_v46 = vpack.c.bf16 %v1267_v35, %v1267_v35 }
 0x549   :  { %v1207_v12 = vpop.f32.mrf.mxu2  ;;  %1526 = vmatpush.msrb.mxu0 %v1501_v3  ;;  %v2782_v3 = vld [vmem:[%s4105_s22 + $0x6] ss:$0 sm:$0xff] }
 0x54a   :  { %v1297_v0 = vsel %vm389_vm3, %v1277_v46, 0 }
 0x54b   :  { %1305 = vmatpush.bf16.msrb.mxu1 %v1297_v0  ;;  %1527 = vmatpush.msrb.mxu0 %v1500_v4 }
 0x54d   :  { %1528 = vmatpush.msrb.mxu0 %v1499_v47 }
 0x54f   :  { %1306 = vmatpush.bf16.msrb.mxu1 %v1276_v39  ;;  %1529 = vmatpush.msrb.mxu0 %v1498_v24  ;;  %v1274_v39 = vld [vmem:[%s4107_s26] sm:$0xff] }
 0x551   :  { %1530 = vmatpush.msrb.mxu0 %v1497_v63  ;;  %v1553_v63 = vld [vmem:[%s4108_s8 + $0x18] sm:$0xff] }
 0x552   :  { %2507 = vmatmul.msk.bf16.vlgmr.msrb.gmra.mxu1 %vm385_vm4, %v2506_v30 }
 0x553   :  { %1531 = vmatpush.msrb.mxu0 %v1496_v57 }
 0x555   :  { %1532 = vmatpush.msrb.mxu0 %v1495_v62 }
 0x557   :  { %1533 = vmatpush.msrb.mxu0 %v1494_v50 }
 0x559   :  { %1534 = vmatpush.msrb.mxu0 %v1493_v33  ;;  %v1641_v33 = vld [vmem:[%s4109_s5] sm:$0xff] }
 0x5cf   :  { %v1308_v41 = vpop.f32.mrf.mxu1 }
 0x5d0   :  { %v1309_v42 = vadd.f32 %v1308_v41, %v1281_v61 }
 0x5d2   :  { %v3734_v55 = vmax.f32 %v1309_v42, 0.0 }
 0x5d4   :  { %1453 = vrot.lane.b32.xlu0 %v3734_v55, %s2932_s3  ;;  %1337 = vrot.lane.b32.xlu2 %v3734_v55, %s2912_s16 }
 0x5d5   :  { %1315 = vrot.lane.b32.xlu1 %v3734_v55, %s2933_s19 }
 0x5d7   :  { %v1310_v45 = vpop.f32.mrf.mxu1 }
 0x5d8   :  { %v1311_v58 = vadd.f32 %v1310_v45, %v1286_v34 }
 0x5da   :  { %v1314_v49 = vmax.f32 %v1311_v58, 0.0 }
 0x5dc   :  { %1473 = vrot.lane.b32.xlu0 %v3734_v55, %s2934_s24  ;;  %1357 = vrot.lane.b32.xlu2 %v3734_v55, %s2935_s6  ;;  %v1400_v36 = vmul.f32 %v3743_v22, %v1314_v49 }
 0x5dd   :  { %1377 = vrot.lane.b32.xlu1 %v3734_v55, %s2926_s21 }
 0x5de   :  { %v3752_v8 = vmul.f32 %v1407_v17, %v1400_v36  ;;  %v2780_v17 = vld [vmem:[%s4105_s22 + $0x5] ss:$0 sm:$0xff] }
 0x5e4   :  { %1339 = vrot.lane.b32.xlu2 %v1314_v49, %s2912_s16  ;;  %1466 = vperm.xlu0 %2741, %v3706_v31  }
 0x5e5   :  { %1413 = vrot.lane.b32.xlu1 %v3734_v55, %s2925_s17 }
 0x5ec   :  { %1359 = vrot.lane.b32.xlu2 %v1314_v49, %s2935_s6  ;;  %2745 = vset.pattern.permute.xlu0 %v4093_v9  ;;  %s4116_s6 = sld [smem:[#allocation31_spill]] }
 0x5ed   :  { %1433 = vrot.lane.b32.xlu1 %v3734_v55, %s2936_s2 }
 0x5f4   :  { %1415 = vrot.lane.b32.xlu2 %v1314_v49, %s2925_s17 }
 0x5f5   :  { %1317 = vrot.lane.b32.xlu1 %v1314_v49, %s2933_s19  ;;  %s2940_s19 = smov 3  }
 0x5fc   :  { %1435 = vrot.lane.b32.xlu2 %v1314_v49, %s2936_s2  ;;  %s2374_s2 = sshll.u32 %s3152_s27, 4  ;;  %s2375_s2 = int_to_ptr.hbm [resolvable:$true] %s2374_s2 }
 0x5fd   :  { %1379 = vrot.lane.b32.xlu1 %v1314_v49, %s2926_s21  ;;  %s2852_s7 = sshra.s32 %s2375_s2, 4  ;;  %s2853_s7 = int_to_ptr.hbm [resolvable:$true] %s2852_s7 }
 0x5fe   :  { %s2854_s10 = scalar_lea.hbm %s2853_s7, 128  ;;  %p2857_p11 = scmp.lt.s32.totalorder %s2853_s7, %s3152_s27 }
 0x5ff   :  { %p2855_p10 = scmp.ne.s32.totalorder %s2853_s7, %s2854_s10  ;;  %p2858_p12 = scmp.lt.s32.totalorder %s2856_s11, %s2854_s10 }
 0x601   :  { %p2859_p13 = por %p2858_p12, %p2857_p11 }
 0x603   :  { %p2860_p0 = pnand %p2859_p13, %p2855_p10 }
 0x604   :  { %1455 = vrot.lane.b32.xlu2 %v1314_v49, %s2932_s3  ;;  %s4114_s3 = sld [smem:[#allocation28_spill]] }
 0x605   :  { %1446 = vperm.xlu1 %2740, %v3706_v31  }
 0x60c   :  { %1486 = vperm.xlu2 %2742, %v3706_v31   ;;  %v1403_v31 = vpop.permute.xlu0 %1402 }
 0x60d   :  { %1475 = vrot.lane.b32.xlu1 %v1314_v49, %s2934_s24  ;;  %s4115_s24 = sld [smem:[#allocation33_spill]] }
 0x60e   :  { %2743 = vset.pattern.permute.xlu1 %v4093_v9 }
 0x614   :  { %2744 = vset.pattern.permute.xlu2 %v4093_v9  ;;  %v1423_v29 = vpop.permute.xlu0 %1422 }
 0x615   :  { %1511 = vperm.xlu1 %2743, %v1274_v39  }
 0x61c   :  { %v1483_v46 = vpop.permute.xlu0 %1482 }
 0x61d   :  { %1584 = vperm.xlu1 %2743, %v1555_v1  }
 0x625   :  { %1574 = vperm.xlu1 %2743, %v1553_v63   ;;  %v1551_v63 = vld [vmem:[%s4108_s8 + $0x8] sm:$0xff] }
 0x62d   :  { %1652 = vperm.xlu1 %2743, %v1641_v33  }
 0x62e   :  { %v1338_v54 = vpop.permute.xlu2 %1337 }
 0x62f   :  { %v1343_v53 = vmul.f32 %v2775_v43, %v1338_v54 }
 0x631   :  { %v1353_v61 = vmul.f32 %v3728_v37, %v1343_v53 }
 0x636   :  { %v1358_v23 = vpop.permute.xlu2 %1357 }
 0x637   :  { %v1363_v41 = vmul.f32 %v2776_v56, %v1358_v23 }
 0x639   :  { %v1373_v49 = vmul.f32 %v1367_v18, %v1363_v41 }
 0x63e   :  { %v1340_v32 = vpop.permute.xlu2 %1339 }
 0x646   :  { %v1454_v34 = vpop.permute.xlu0 %1453  ;;  %v1360_v16 = vpop.permute.xlu2 %1359 }
 0x647   :  { %v1316_v35 = vpop.permute.xlu1 %1315  ;;  %v1459_v54 = vmul.f32 %v2777_v19, %v1454_v34 }
 0x648   :  { %v1321_v12 = vmul.f32 %v2778_v10, %v1316_v35  ;;  %v1275_v35 = vld [vmem:[%s4107_s26 + $0x8] sm:$0xf] }
 0x649   :  { %1516 = vperm.xlu2 %2744, %v1275_v35  }
 0x64a   :  { %v1333_v30 = vmul.f32 %v1326_v15, %v1321_v12  ;;  %v1399_v15 = vmul.f32 %v3743_v22, %v3734_v55 }
 0x64c   :  { %v1355_v45 = vadd.f32 %v1353_v61, %v1333_v30  ;;  %v1409_v48 = vmul.f32 %v1403_v31, %v1399_v15  ;;  %v1469_v31 = vmul.f32 %v3784_v26, %v1459_v54  ;;  %v1364_v26 = vmul.f32 %v2776_v56, %v1360_v16  ;;  %v1552_v61 = vld [vmem:[%s4108_s8 + $0x10] sm:$0xff]  ;;  %v1550_v56 = vld [vmem:[%s4108_s8] sm:$0xff]  ;;  %v3835_v15 = vld [vmem:[%s4110_s9 + $0x8] sm:$0xf] }
 0x64e   :  { %v1375_v27 = vadd.f32 %v1373_v49, %v1355_v45  ;;  %v1474_v18 = vpop.permute.xlu0 %1473  ;;  %v1416_v62 = vpop.permute.xlu2 %1415 }
 0x64f   :  { %v1378_v0 = vpop.permute.xlu1 %1377  ;;  %v1479_v55 = vmul.f32 %v3813_v25, %v1474_v18  ;;  %v1420_v45 = vmul.f32 %v2780_v17, %v1416_v62  ;;  %v2611_v62 = vld [vmem:[%s4111_s13] sm:$0xff] }
 0x650   :  { %v1383_v42 = vmul.f32 %v2781_v51, %v1378_v0  ;;  %v1344_v0 = vmul.f32 %v2775_v43, %v1340_v32  ;;  %v1374_v43 = vmul.f32 %v3776_v2, %v1364_v26 }
 0x651   :  { %1569 = vperm.xlu2 %2744, %v1552_v61   ;;  %v1430_v1 = vmul.f32 %v3793_v6, %v1420_v45 }
 0x652   :  { %v1393_v36 = vmul.f32 %v3768_v59, %v1383_v42  ;;  %v3826_v42 = vld [vmem:[%s4110_s9] sm:$0xff] }
 0x653   :  { %1695 = vperm.xlu1 %2743, %v3826_v42  }
 0x654   :  { %v1395_v13 = vadd.f32 %v1393_v36, %v1375_v27 }
 0x656   :  { %v1411_v47 = vadd.f32 %v1409_v48, %v1395_v13  ;;  %v1436_v41 = vpop.permute.xlu2 %1435  ;;  %v1467_v27 = vpop.permute.xlu0 %1466 }
 0x657   :  { %v1414_v58 = vpop.permute.xlu1 %1413  ;;  %v1440_v16 = vmul.f32 %v2782_v3, %v1436_v41 }
 0x658   :  { %v1419_v37 = vmul.f32 %v2780_v17, %v1414_v58  ;;  %v1642_v17 = vld [vmem:[%s4109_s5 + $0x8] sm:$0xf] }
 0x659   :  { %1559 = vperm.xlu2 %2744, %v1550_v56  }
 0x65a   :  { %v1429_v4 = vmul.f32 %v1423_v29, %v1419_v37  ;;  %v1489_v29 = vmul.f32 %v1483_v46, %v1479_v55 }
 0x65b   :  { %2747 = vset.pattern.permute.xlu1 %v4103_v11 }
 0x65c   :  { %v1431_v22 = vadd.f32 %v1429_v4, %v1411_v47  ;;  %1720 = vperm.xlu1 %2747, %v3835_v15  }
 0x65e   :  { %v1456_v49 = vpop.permute.xlu2 %1455 }
 0x65f   :  { %v1434_v59 = vpop.permute.xlu1 %1433 }
 0x660   :  { %v1439_v24 = vmul.f32 %v2782_v3, %v1434_v59 }
 0x661   :  { %1657 = vperm.xlu2 %2744, %v1642_v17  }
 0x662   :  { %v1449_v57 = vmul.f32 %v3778_v60, %v1439_v24  ;;  %v1354_v60 = vmul.f32 %v3730_v7, %v1344_v0 }
 0x664   :  { %v1451_v23 = vadd.f32 %v1449_v57, %v1431_v22  ;;  %2750 = vset.pattern.permute.xlu1 %v4087_v52 }
 0x665   :  { %1756 = vperm.xlu1 %2750, %v3826_v42  }
 0x666   :  { %v1471_v50 = vadd.f32 %v1469_v31, %v1451_v23  ;;  %v2613_v31 = vld [vmem:[%s4111_s13 + $0x10] sm:$0xff] }
 0x667   :  { %v1318_v12 = vpop.permute.xlu1 %1317 }
 0x668   :  { %v1322_v53 = vmul.f32 %v2778_v10, %v1318_v12  ;;  %v1491_v39 = vadd.f32 %v1489_v29, %v1471_v50 }
 0x669   :  { %1700 = vperm.xlu2 %2744, %v3835_v15  }
 0x66a   :  { %v1334_v30 = vmul.f32 %v3773_v21, %v1322_v53  ;;  %1535 = vmatmul.f32.vlgmr.msrb.gmra.mxu0 %v1491_v39 }
 0x66c   :  { %v1356_v46 = vadd.f32 %v1354_v60, %v1334_v30 }
 0x66d   :  { %2753 = vset.pattern.permute.xlu1 %v4091_v28 }
 0x66e   :  { %v1376_v32 = vadd.f32 %v1374_v43, %v1356_v46  ;;  %1776 = vperm.xlu1 %2753, %v3835_v15   ;;  %v2614_v43 = vld [vmem:[%s4112_s25] sm:$0x30] }
 0x66f   :  { %v1380_v34 = vpop.permute.xlu1 %1379 }
 0x670   :  { %v1384_v10 = vmul.f32 %v2781_v51, %v1380_v34  ;;  %v2525_v34 = vld [vmem:[%s4112_s25] sm:$0xf] }
 0x671   :  { %2748 = vset.pattern.permute.xlu2 %v4089_v44 }
 0x672   :  { %v1394_v21 = vmul.f32 %v3732_v5, %v1384_v10  ;;  %v1460_v5 = vmul.f32 %v2777_v19, %v1456_v49  ;;  %1736 = vperm.xlu2 %2748, %v3826_v42   ;;  %v1554_v19 = vld [vmem:[%s4108_s8 + $0x20] sm:$0xff] }
 0x673   :  { %1579 = vperm.xlu0 %2745, %v1554_v19  }
 0x674   :  { %v1396_v7 = vadd.f32 %v1394_v21, %v1376_v32  ;;  %v1470_v48 = vmul.f32 %v1467_v27, %v1460_v5  ;;  %v2526_v32 = vor.u32 %v2614_v43, %v2525_v34 }
 0x676   :  { %v1412_v58 = vadd.f32 %v3752_v8, %v1396_v7  ;;  %v1487_v8 = vpop.permute.xlu2 %1486  ;;  %2756 = vset.pattern.permute.xlu1 %v4090_v14 }
 0x677   :  { %v1447_v36 = vpop.permute.xlu1 %1446  ;;  %1812 = vperm.xlu1 %2756, %v3826_v42  }
 0x678   :  { %v1432_v2 = vadd.f32 %v1430_v1, %v1412_v58  ;;  %v1450_v51 = vmul.f32 %v1447_v36, %v1440_v16 }
 0x67a   :  { %v1452_v37 = vadd.f32 %v1450_v51, %v1432_v2  ;;  %2751 = vset.pattern.permute.xlu2 %v4087_v52  ;;  %v3894_v51 = vld [vmem:[%s4113_s4 + $0x4] ss:$0 sm:$0xff] }
 0x67b   :  { %1760 = vperm.xlu2 %2751, %v3835_v15   ;;  %1564 = vperm.xlu0 %2745, %v1551_v63  }
 0x67c   :  { %v1472_v3 = vadd.f32 %v1470_v48, %v1452_v37 }
 0x67f   :  { %v1476_v13 = vpop.permute.xlu1 %1475  ;;  %2760 = vset.pattern.permute.xlu1 %v4098_v20 }
 0x680   :  { %v1480_v4 = vmul.f32 %v3813_v25, %v1476_v13  ;;  %v1645_v13 = vld [vmem:[%s4114_s3] sm:$0xff] }
 0x682   :  { %v1490_v6 = vmul.f32 %v1487_v8, %v1480_v4  ;;  %v1978_v8 = vld [vmem:[%s4115_s24 + $0x8] sm:$0xff]  ;;  %v1886_v4 = vld [vmem:[%s4116_s6 + $0x18] sm:$0xff] }
 0x683   :  { %2754 = vset.pattern.permute.xlu2 %v4092_v38  ;;  %2746 = vset.pattern.permute.xlu0 %v4103_v11 }
 0x684   :  { %v1492_v18 = vadd.f32 %v1490_v6, %v1472_v3  ;;  %1792 = vperm.xlu2 %2754, %v3826_v42   ;;  %1716 = vperm.xlu0 %2746, %v3826_v42   ;;  %v1981_v6 = vld [vmem:[%s4115_s24 + $0x20] sm:$0xff] }
 0x686   :  { %1538 = vmatmul.f32.gmra.mxu0 %v1492_v18  ;;  %v1646_v18 = vld [vmem:[%s4114_s3 + $0x8] sm:$0xf] }
 0x687   :  { %v1512_v25 = vpop.permute.xlu1 %1511 }
 0x68c   :  { %2757 = vset.pattern.permute.xlu2 %v4090_v14  ;;  %2749 = vset.pattern.permute.xlu0 %v4089_v44 }
 0x68d   :  { %1816 = vperm.xlu2 %2757, %v3835_v15   ;;  %1740 = vperm.xlu0 %2749, %v3835_v15  }
 0x68f   :  { %v1585_v50 = vpop.permute.xlu1 %1584 }
 0x695   :  { %2758 = vset.pattern.permute.xlu2 %v4088_v40  ;;  %2752 = vset.pattern.permute.xlu0 %v4091_v28 }
 0x696   :  { %1832 = vperm.xlu2 %2758, %v3826_v42   ;;  %1772 = vperm.xlu0 %2752, %v3826_v42  }
 0x69e   :  { %2761 = vset.pattern.permute.xlu2 %v4098_v20  ;;  %v2612_v20 = vld [vmem:[%s4111_s13 + $0x8] sm:$0xff]  ;;  %2755 = vset.pattern.permute.xlu0 %v4092_v38  ;;  %v1575_v38 = vpop.permute.xlu1 %1574 }
 0x69f   :  { %1796 = vperm.xlu0 %2755, %v3835_v15  }
 0x6a3   :  { %v1517_v54 = vpop.permute.xlu2 %1516 }
 0x6a6   :  { %v1653_v21 = vpop.permute.xlu1 %1652 }
 0x6a7   :  { %2759 = vset.pattern.permute.xlu0 %v4088_v40 }
 0x6ab   :  { %v1570_v12 = vpop.permute.xlu2 %1569 }
 0x6b3   :  { %v1560_v41 = vpop.permute.xlu2 %1559 }
 0x6bb   :  { %v1658_v1 = vpop.permute.xlu2 %1657 }
 0x6c3   :  { %v3911_v48 = vpop.permute.xlu2 %1700 }
 0x6c5   :  { %v3881_v45 = vpop.permute.xlu1 %1695 }
 0x6ce   :  { %v3883_v7 = vpop.permute.xlu1 %1720 }
 0x6d7   :  { %v3885_v49 = vpop.permute.xlu1 %1756 }
 0x6e0   :  { %v1777_v17 = vpop.permute.xlu1 %1776 }
 0x6e5   :  { %v1580_v33 = vpop.permute.xlu0 %1579 }
 0x6e7   :  { %v1536_v52 = vpop.f32.mrf.mxu0 }
 0x6e8   :  { %v1537_v59 = vadd.f32 %v1536_v52, %v1512_v25  ;;  %v2105_v52 = vld [vmem:[%s3147_s20] sm:$0xff] }
 0x6e9   :  { %v1977_v25 = vld [vmem:[%s4115_s24] sm:$0xff] }
 0x6ea   :  { %v1542_v14 = vmax.f32 %v1537_v59, 0.0 }
 0x6ed   :  { %v1565_v60 = vpop.permute.xlu0 %1564 }
 0x6f6   :  { %v1717_v59 = vpop.permute.xlu0 %1716 }
 0x6ff   :  { %v3930_v63 = vpop.permute.xlu0 %1740 }
 0x703   :  { %v1539_v47 = vpop.f32.mrf.mxu0 }
 0x704   :  { %v1540_v24 = vadd.f32 %v1539_v47, %v1517_v54  ;;  %v1885_v54 = vld [vmem:[%s4116_s6 + $0x10] sm:$0xff] }
 0x706   :  { %v1543_v55 = vmax.f32 %v1540_v24, 0.0  ;;  %v1980_v24 = vld [vmem:[%s4115_s24 + $0x18] sm:$0xff] }
 0x708   :  { %v1556_v22 = vpack.c.bf16 %v1543_v55, %v1542_v14  ;;  %v2114_v14 = vld [vmem:[%s3147_s20 + $0x48] sm:$0xff] }
 0x70a   :  { %v1613_v57 = vsel %vm281_vm1, %v1556_v22, 0  ;;  %v1888_v22 = vld [vmem:[%s4116_s6 + $0x28] sm:$0xff] }
 0x70b   :  { %1622 = vmatpush.bf16.msra.mxu3 %v1613_v57  ;;  %v2117_v57 = vld [vmem:[%s3147_s20 + $0x60] sm:$0xff] }
 0x70e   :  { %2520 = vmatmul.msk.bf16.vlgmr.msra.gmra.mxu3 %vm1602_vm15, %v2611_v62  ;;  %v1773_v62 = vpop.permute.xlu0 %1772 }
 0x71e   :  { %2521 = vmatmul.msk.bf16.gmra.mxu3 %vm1602_vm15, %v2612_v20 }
 0x72e   :  { %2522 = vmatmul.msk.bf16.gmra.mxu3 %vm1602_vm15, %v2613_v31  ;;  %v2106_v31 = vld [vmem:[%s3147_s20 + $0x8] sm:$0xff] }
 0x791   :  { %v1624_v11 = vpop.f32.mrf.mxu3 }
 0x792   :  { %v1625_v46 = vadd.f32 %v1624_v11, %v1560_v41  ;;  %v2120_v11 = vld [vmem:[%s3147_s20 + $0x78] sm:$0xff] }
 0x799   :  { %v1626_v44 = vpop.f32.mrf.mxu3 }
 0x79a   :  { %v1627_v40 = vadd.f32 %v1626_v44, %v1565_v60  ;;  %v1813_v44 = vpop.permute.xlu1 %1812  ;;  %v2112_v60 = vld [vmem:[%s3147_s20 + $0x38] sm:$0xff] }
 0x79c   :  { %v1647_v10 = vpack.c.bf16 %v1627_v40, %v1625_v46  ;;  %v2786_v40 = vld [vmem:[%s4113_s4 + $0x5] ss:$0 sm:$0xff] }
 0x7a1   :  { %v1629_v23 = vpop.f32.mrf.mxu3 }
 0x7a2   :  { %v1630_v26 = vadd.f32 %v1629_v23, %v1570_v12  ;;  %v3939_v23 = vpop.permute.xlu0 %1796  ;;  %v2788_v12 = vld [vmem:[%s4113_s4] ss:$0 sm:$0xff] }
 0x7a9   :  { %v1631_v29 = vpop.f32.mrf.mxu3 }
 0x7aa   :  { %v1632_v39 = vadd.f32 %v1631_v29, %v1575_v38 }
 0x7ac   :  { %v1648_v61 = vpack.c.bf16 %v1632_v39, %v1630_v26 }
 0x7b1   :  { %v1634_v35 = vpop.f32.mrf.mxu3 }
 0x7b2   :  { %v1635_v0 = vadd.f32 %v1634_v35, %v1580_v33  ;;  %v2784_v35 = vld [vmem:[%s4113_s4 + $0x1] ss:$0 sm:$0xff]  ;;  %v2785_v33 = vld [vmem:[%s4113_s4 + $0x2] ss:$0 sm:$0xff] }
 0x7b9   :  { %v1636_v28 = vpop.f32.mrf.mxu3 }
 0x7ba   :  { %v1637_v53 = vadd.f32 %v1636_v28, %v1585_v50  ;;  %v2109_v50 = vld [vmem:[%s3147_s20 + $0x20] sm:$0xff] }
 0x7bc   :  { %v1649_v30 = vpack.c.bf16 %v1637_v53, %v1635_v0  ;;  %v2787_v0 = vld [vmem:[%s4113_s4 + $0x3] ss:$0 sm:$0xff] }
 0x7be   :  { %1674 = vmatpush.bf16.msra.mxu2 %v1649_v30  ;;  %2012 = vmatpush.bf16.msra.mxu0 %v1649_v30 }
 0x7c2   :  { %1675 = vmatpush.bf16.msra.mxu2 %v1648_v61  ;;  %2013 = vmatpush.bf16.msra.mxu0 %v1648_v61 }
 0x7c6   :  { %1676 = vmatpush.bf16.msra.mxu2 %v1647_v10  ;;  %2014 = vmatpush.bf16.msra.mxu0 %v1647_v10 }
 0x7c9   :  { %2527 = vmatmul.msk.bf16.vlgmr.msra.gmra.mxu2 %vm1665_vm0, %v2526_v32  ;;  %v2789_v32 = vld [vmem:[%s4113_s4 + $0x6] ss:$0 sm:$0xff] }
 0x84c   :  { %v1678_v56 = vpop.f32.mrf.mxu2 }
 0x84d   :  { %v1679_v58 = vadd.f32 %v1678_v56, %v1653_v21 }
 0x84f   :  { %v3887_v36 = vmax.f32 %v1679_v58, 0.0 }
 0x851   :  { %1747 = vrot.lane.b32.xlu1 %v3887_v36, %s2926_s21  ;;  %1707 = vrot.lane.b32.xlu2 %v3887_v36, %s2937_s28  ;;  %v1769_v34 = vmul.f32 %v3894_v51, %v3887_v36 }
 0x852   :  { %1685 = vrot.lane.b32.xlu0 %v3887_v36, %s2938_s29 }
 0x854   :  { %v1680_v16 = vpop.f32.mrf.mxu2 }
 0x855   :  { %v1681_v2 = vadd.f32 %v1680_v16, %v1658_v1  ;;  %v1779_v16 = vmul.f32 %v1773_v62, %v1769_v34 }
 0x857   :  { %v1684_v5 = vmax.f32 %v1681_v2, 0.0 }
 0x859   :  { %1803 = vrot.lane.b32.xlu1 %v3887_v36, %s2939_s14  ;;  %1727 = vrot.lane.b32.xlu2 %v3887_v36, %s2940_s19  ;;  %v1770_v27 = vmul.f32 %v3894_v51, %v1684_v5 }
 0x85a   :  { %1823 = vrot.lane.b32.xlu0 %v3887_v36, %s2941_s30 }
 0x85b   :  { %v3900_v37 = vmul.f32 %v1777_v17, %v1770_v27 }
 0x861   :  { %1687 = vrot.lane.b32.xlu1 %v1684_v5, %s2938_s29  ;;  %1783 = vrot.lane.b32.xlu2 %v3887_v36, %s2925_s17 }
 0x862   :  { %1709 = vrot.lane.b32.xlu0 %v1684_v5, %s2937_s28 }
 0x869   :  { %1843 = vrot.lane.b32.xlu1 %v3887_v36, %s2942_s1  ;;  %1749 = vrot.lane.b32.xlu2 %v1684_v5, %s2926_s21  ;;  %s4118_s21 = sld [smem:[#allocation30_spill]] }
 0x86a   :  { %1836 = vperm.xlu0 %2759, %v3835_v15  }
 0x871   :  { %1852 = vperm.xlu1 %2760, %v3826_v42   ;;  %1805 = vrot.lane.b32.xlu2 %v1684_v5, %s2939_s14  ;;  %v1737_v42 = vpop.permute.xlu2 %1736 }
 0x872   :  { %2762 = vset.pattern.permute.xlu0 %v4093_v9 }
 0x873   :  { %1865 = vperm.xlu0 %2762, %v1645_v13   ;;  %v1883_v13 = vld [vmem:[%s4116_s6] sm:$0xff] }
 0x879   :  { %1729 = vrot.lane.b32.xlu1 %v1684_v5, %s2940_s19  ;;  %1845 = vrot.lane.b32.xlu2 %v1684_v5, %s2942_s1  ;;  %v3919_v3 = vpop.permute.xlu2 %1760 }
 0x87a   :  { %2763 = vset.pattern.permute.xlu1 %v4093_v9 }
 0x87b   :  { %2044 = vperm.xlu0 %2762, %v1978_v8  }
 0x881   :  { %1785 = vrot.lane.b32.xlu1 %v1684_v5, %s2925_s17  ;;  %1856 = vperm.xlu2 %2761, %v3835_v15   ;;  %v1793_v19 = vpop.permute.xlu2 %1792  ;;  %v2108_v15 = vld [vmem:[%s3147_s20 + $0x18] sm:$0xff]  ;;  %s4117_s17 = sld [smem:[#allocation32_spill]] }
 0x883   :  { %1907 = vperm.xlu0 %2762, %v1886_v4  }
 0x889   :  { %1825 = vrot.lane.b32.xlu1 %v1684_v5, %s2941_s30  ;;  %2764 = vset.pattern.permute.xlu2 %v4093_v9  ;;  %v3926_v47 = vpop.permute.xlu2 %1816  ;;  %v2111_v9 = vld [vmem:[%s3147_s20 + $0x30] sm:$0xff] }
 0x88a   :  { %1892 = vperm.xlu2 %2764, %v1883_v13   ;;  %v2113_v13 = vld [vmem:[%s3147_s20 + $0x40] sm:$0xff] }
 0x88b   :  { %2059 = vperm.xlu0 %2762, %v1981_v6  }
 0x891   :  { %1870 = vperm.xlu1 %2763, %v1646_v18   ;;  %v3933_v55 = vpop.permute.xlu2 %1832 }
 0x893   :  { %2161 = vperm.xlu0 %2762, %v2105_v52  }
 0x899   :  { %2039 = vperm.xlu1 %2763, %v1977_v25   ;;  %v1979_v25 = vld [vmem:[%s4115_s24 + $0x10] sm:$0xff] }
 0x89b   :  { %2176 = vperm.xlu0 %2762, %v2108_v15  }
 0x8a1   :  { %1902 = vperm.xlu1 %2763, %v1885_v54  }
 0x8a3   :  { %2191 = vperm.xlu0 %2762, %v2111_v9   ;;  %v1887_v9 = vld [vmem:[%s4116_s6 + $0x20] sm:$0xff] }
 0x8a9   :  { %2054 = vperm.xlu1 %2763, %v1980_v24  }
 0x8ab   :  { %2206 = vperm.xlu0 %2762, %v2114_v14   ;;  %v1708_v20 = vpop.permute.xlu2 %1707 }
 0x8ac   :  { %v1713_v28 = vmul.f32 %v2784_v35, %v1708_v20 }
 0x8ae   :  { %v1723_v26 = vmul.f32 %v1717_v59, %v1713_v28 }
 0x8b1   :  { %1917 = vperm.xlu1 %2763, %v1888_v22  }
 0x8b3   :  { %2221 = vperm.xlu0 %2762, %v2117_v57   ;;  %v1728_v29 = vpop.permute.xlu2 %1727 }
 0x8b4   :  { %v1733_v39 = vmul.f32 %v2785_v33, %v1728_v29  ;;  %v1982_v29 = vld [vmem:[%s4115_s24 + $0x28] sm:$0xff] }
 0x8b6   :  { %v1743_v43 = vmul.f32 %v1737_v42, %v1733_v39  ;;  %v1884_v42 = vld [vmem:[%s4116_s6 + $0x8] sm:$0xff] }
 0x8b7   :  { %1897 = vperm.xlu2 %2764, %v1884_v42   ;;  %v2119_v42 = vld [vmem:[%s3147_s20 + $0x70] sm:$0xff] }
 0x8b9   :  { %2166 = vperm.xlu1 %2763, %v2106_v31   ;;  %v2618_v31 = vld [vmem:[%s4117_s17] sm:$0xff] }
 0x8ba   :  { %2555 = vmatmul.msk.bf16.vlgmr.msra.gmra.mxu0 %vm1665_vm0, %v2618_v31  ;;  %v2075_v31 = vld [vmem:[#allocation5 + $0x10] sm:$0xff] }
 0x8bb   :  { %2236 = vperm.xlu0 %2762, %v2120_v11   ;;  %v1784_v46 = vpop.permute.xlu2 %1783 }
 0x8bc   :  { %v1789_v21 = vmul.f32 %v2786_v40, %v1784_v46 }
 0x8be   :  { %v1799_v17 = vmul.f32 %v1793_v19, %v1789_v21 }
 0x8bf   :  { %2049 = vperm.xlu2 %2764, %v1979_v25   ;;  %v2087_v25 = vld [vmem:[#allocation5 + $0x70] sm:$0xff] }
 0x8c1   :  { %2181 = vperm.xlu1 %2763, %v2109_v50  }
 0x8c3   :  { %v1748_v53 = vpop.permute.xlu1 %1747  ;;  %v1750_v52 = vpop.permute.xlu2 %1749 }
 0x8c4   :  { %v1686_v38 = vpop.permute.xlu0 %1685  ;;  %v1753_v61 = vmul.f32 %v2787_v0, %v1748_v53  ;;  %v1754_v62 = vmul.f32 %v2787_v0, %v1750_v52  ;;  %v2088_v52 = vld [vmem:[#allocation5 + $0x78] sm:$0xff] }
 0x8c5   :  { %v1691_v30 = vmul.f32 %v2788_v12, %v1686_v38  ;;  %v2791_v38 = vld [vmem:[%s4113_s4 + $0x8] ss:$0 sm:$0xff]  ;;  %2121 = vmatpush.msrb.mxu2 %v2088_v52 }
 0x8c6   :  { %v1763_v56 = vmul.f32 %v3885_v49, %v1753_v61  ;;  %v2118_v49 = vld [vmem:[%s3147_s20 + $0x68] sm:$0xff]  ;;  %v1764_v50 = vmul.f32 %v3919_v3, %v1754_v62  ;;  %v2077_v62 = vld [vmem:[#allocation5 + $0x20] sm:$0xff] }
 0x8c7   :  { %v1703_v41 = vmul.f32 %v3881_v45, %v1691_v30  ;;  %v2115_v45 = vld [vmem:[%s3147_s20 + $0x50] sm:$0xff]  ;;  %1912 = vperm.xlu2 %2764, %v1887_v9   ;;  %2122 = vmatpush.msrb.mxu2 %v2087_v25  ;;  %v2082_v9 = vld [vmem:[#allocation5 + $0x48] sm:$0xff] }
 0x8c8   :  { %v2107_v30 = vld [vmem:[%s3147_s20 + $0x10] sm:$0xff] }
 0x8c9   :  { %v1725_v10 = vadd.f32 %v1723_v26, %v1703_v41  ;;  %2196 = vperm.xlu1 %2763, %v2112_v60  }
 0x8cb   :  { %v1745_v58 = vadd.f32 %v1743_v43, %v1725_v10  ;;  %v1804_v1 = vpop.permute.xlu1 %1803  ;;  %v1806_v24 = vpop.permute.xlu2 %1805  ;;  %v2619_v10 = vld [vmem:[%s4117_s17 + $0x8] sm:$0xff] }
 0x8cc   :  { %v1809_v5 = vmul.f32 %v2789_v32, %v1804_v1  ;;  %v1824_v6 = vpop.permute.xlu0 %1823  ;;  %v1810_v60 = vmul.f32 %v2789_v32, %v1806_v24  ;;  %2556 = vmatmul.msk.bf16.gmra.mxu0 %vm1665_vm0, %v2619_v10  ;;  %v2110_v32 = vld [vmem:[%s3147_s20 + $0x28] sm:$0xff]  ;;  %v2081_v24 = vld [vmem:[#allocation5 + $0x40] sm:$0xff] }
 0x8cd   :  { %v1765_v2 = vadd.f32 %v1763_v56, %v1745_v58 }
 0x8ce   :  { %v1819_v51 = vmul.f32 %v1813_v44, %v1809_v5  ;;  %v1820_v34 = vmul.f32 %v3926_v47, %v1810_v60 }
 0x8cf   :  { %v1781_v27 = vadd.f32 %v1779_v16, %v1765_v2  ;;  %2064 = vperm.xlu2 %2764, %v1982_v29  }
 0x8d1   :  { %v1801_v36 = vadd.f32 %v1799_v17, %v1781_v27  ;;  %2211 = vperm.xlu1 %2763, %v2115_v45  }
 0x8d3   :  { %v1821_v8 = vadd.f32 %v1819_v51, %v1801_v36  ;;  %v1688_v4 = vpop.permute.xlu1 %1687  ;;  %v1846_v28 = vpop.permute.xlu2 %1845 }
 0x8d4   :  { %v1710_v19 = vpop.permute.xlu0 %1709  ;;  %v1692_v59 = vmul.f32 %v2788_v12, %v1688_v4  ;;  %v2790_v12 = vld [vmem:[%s4113_s4 + $0x7] ss:$0 sm:$0xff]  ;;  %v1850_v21 = vmul.f32 %v2791_v38, %v1846_v28  ;;  %v2620_v4 = vld [vmem:[%s4117_s17 + $0x10] sm:$0xff] }
 0x8d5   :  { %v1714_v54 = vmul.f32 %v2784_v35, %v1710_v19  ;;  %v1829_v53 = vmul.f32 %v2790_v12, %v1824_v6  ;;  %v2616_v6 = vld [vmem:[%s4118_s21 + $0x8] sm:$0xff] }
 0x8d6   :  { %v1704_v14 = vmul.f32 %v3911_v48, %v1692_v59  ;;  %v2086_v19 = vld [vmem:[#allocation5 + $0x68] sm:$0xff]  ;;  %v2084_v59 = vld [vmem:[#allocation5 + $0x58] sm:$0xff] }
 0x8d7   :  { %v1724_v22 = vmul.f32 %v3883_v7, %v1714_v54  ;;  %2171 = vperm.xlu2 %2764, %v2107_v30   ;;  %v1839_v3 = vmul.f32 %v3933_v55, %v1829_v53  ;;  %2123 = vmatpush.msrb.mxu2 %v2086_v19  ;;  %v2083_v54 = vld [vmem:[#allocation5 + $0x50] sm:$0xff] }
 0x8d9   :  { %2226 = vperm.xlu1 %2763, %v2118_v49   ;;  %v1726_v11 = vadd.f32 %v1724_v22, %v1704_v14  ;;  %v2116_v49 = vld [vmem:[%s3147_s20 + $0x58] sm:$0xff]  ;;  %v2079_v22 = vld [vmem:[#allocation5 + $0x30] sm:$0xff] }
 0x8da   :  { %v2080_v14 = vld [vmem:[#allocation5 + $0x38] sm:$0xff] }
 0x8db   :  { %v1844_v18 = vpop.permute.xlu1 %1843  ;;  %v1857_v43 = vpop.permute.xlu2 %1856 }
 0x8dc   :  { %v1837_v39 = vpop.permute.xlu0 %1836  ;;  %v1849_v26 = vmul.f32 %v2791_v38, %v1844_v18  ;;  %v1860_v1 = vmul.f32 %v1857_v43, %v1850_v21  ;;  %2557 = vmatmul.msk.bf16.gmra.mxu0 %vm1665_vm0, %v2620_v4  ;;  %v2617_v18 = vld [vmem:[%s4118_s21 + $0x10] sm:$0xff] }
 0x8df   :  { %2186 = vperm.xlu2 %2764, %v2110_v32  }
 0x8e3   :  { %v1853_v15 = vpop.permute.xlu1 %1852 }
 0x8e4   :  { %v1859_v61 = vmul.f32 %v1853_v15, %v1849_v26  ;;  %v2085_v15 = vld [vmem:[#allocation5 + $0x60] sm:$0xff] }
 0x8e5   :  { %v1866_v16 = vpop.permute.xlu0 %1865  ;;  %2124 = vmatpush.msrb.mxu2 %v2085_v15  ;;  %v2621_v15 = vld [vmem:[%s3142_s12] sm:$0xff] }
 0x8e7   :  { %2201 = vperm.xlu2 %2764, %v2113_v13   ;;  %2125 = vmatpush.msrb.mxu2 %v2084_v59  ;;  %v2622_v59 = vld [vmem:[%s3142_s12 + $0x8] sm:$0xff] }
 0x8e9   :  { %2126 = vmatpush.msrb.mxu2 %v2083_v54  ;;  %v2623_v54 = vld [vmem:[%s3142_s12 + $0x10] sm:$0xff] }
 0x8eb   :  { %v1730_v57 = vpop.permute.xlu1 %1729  ;;  %2127 = vmatpush.msrb.mxu2 %v2082_v9  ;;  %v2624_v9 = vld [vmem:[%s3142_s12 + $0x18] sm:$0xff] }
 0x8ec   :  { %v1734_v20 = vmul.f32 %v2785_v33, %v1730_v57  ;;  %v2078_v57 = vld [vmem:[#allocation5 + $0x28] sm:$0xff] }
 0x8ed   :  { %2128 = vmatpush.msrb.mxu2 %v2081_v24  ;;  %v2625_v24 = vld [vmem:[%s3142_s12 + $0x20] sm:$0xff] }
 0x8ee   :  { %v1744_v44 = vmul.f32 %v3930_v63, %v1734_v20  ;;  %v2076_v20 = vld [vmem:[#allocation5 + $0x18] sm:$0xff] }
 0x8ef   :  { %2216 = vperm.xlu2 %2764, %v2116_v49   ;;  %2129 = vmatpush.msrb.mxu2 %v2080_v14  ;;  %v2626_v14 = vld [vmem:[%s3142_s12 + $0x28] sm:$0xff] }
 0x8f0   :  { %v1746_v35 = vadd.f32 %v1744_v44, %v1726_v11  ;;  %v2074_v11 = vld [vmem:[#allocation5 + $0x8] sm:$0xff]  ;;  %v2073_v44 = vld [vmem:[#allocation5] sm:$0xff] }
 0x8f1   :  { %2130 = vmatpush.msrb.mxu2 %v2079_v22  ;;  %v2627_v22 = vld [vmem:[%s3142_s12 + $0x30] sm:$0xff] }
 0x8f2   :  { %v1766_v48 = vadd.f32 %v1764_v50, %v1746_v35  ;;  %v1893_v50 = vpop.permute.xlu2 %1892 }
 0x8f3   :  { %v1786_v7 = vpop.permute.xlu1 %1785  ;;  %2131 = vmatpush.msrb.mxu2 %v2078_v57  ;;  %v2628_v57 = vld [vmem:[%s3142_s12 + $0x38] sm:$0xff]  ;;  %s2943_s12 = smov [#allocation7]  }
 0x8f4   :  { %v1782_v0 = vadd.f32 %v3900_v37, %v1766_v48  ;;  %v1790_v33 = vmul.f32 %v2786_v40, %v1786_v7  ;;  %v1841_v37 = vadd.f32 %v1839_v3, %v1821_v8  ;;  %v2615_v8 = vld [vmem:[%s4118_s21] sm:$0xff]  ;;  %s2372_s20 = sshll.u32 %s2943_s12, 4  ;;  %s2373_s20 = int_to_ptr.vmem [resolvable:$true] %s2372_s20 }
 0x8f5   :  { %2132 = vmatpush.msrb.mxu2 %v2077_v62 }
 0x8f6   :  { %v1800_v63 = vmul.f32 %v3939_v23, %v1790_v33  ;;  %v1861_v23 = vadd.f32 %v1859_v61, %v1841_v37 }
 0x8f7   :  { %2231 = vperm.xlu2 %2764, %v2119_v42   ;;  %2133 = vmatpush.msrb.mxu2 %v2076_v20 }
 0x8f8   :  { %v1802_v41 = vadd.f32 %v1800_v63, %v1782_v0  ;;  %v1873_v47 = vadd.f32 %v1866_v16, %v1861_v23 }
 0x8f9   :  { %2134 = vmatpush.msrb.mxu2 %v2075_v31 }
 0x8fa   :  { %v1822_v58 = vadd.f32 %v1820_v34, %v1802_v41  ;;  %v1875_v17 = vmax.f32 %v1873_v47, 0.0 }
 0x8fb   :  { %v1826_v46 = vpop.permute.xlu1 %1825  ;;  %2135 = vmatpush.msrb.mxu2 %v2074_v11 }
 0x8fc   :  { %v1830_v40 = vmul.f32 %v2790_v12, %v1826_v46 }
 0x8fd   :  { %2136 = vmatpush.msrb.mxu2 %v2073_v44 }
 0x8fe   :  { %v1840_v56 = vmul.f32 %v1837_v39, %v1830_v40  ;;  %v2045_v39 = vpop.permute.xlu0 %2044 }
 0x900   :  { %v1842_v55 = vadd.f32 %v1840_v56, %v1822_v58 }
 0x902   :  { %v1862_v2 = vadd.f32 %v1860_v1, %v1842_v55 }
 0x903   :  { %v1871_v5 = vpop.permute.xlu1 %1870 }
 0x904   :  { %v1874_v45 = vadd.f32 %v1871_v5, %v1862_v2 }
 0x906   :  { %v1876_v27 = vmax.f32 %v1874_v45, 0.0  ;;  %v1908_v40 = vpop.permute.xlu0 %1907 }
 0x908   :  { %v1889_v36 = vpack.c.bf16 %v1876_v27, %v1875_v17 }
 0x90a   :  { %v1945_v51 = vsel %vm281_vm1, %v1889_v36, 0 }
 0x90b   :  { %1954 = vmatpush.bf16.msrb.mxu3 %v1945_v51  ;;  %v2040_v7 = vpop.permute.xlu1 %2039 }
 0x90e   :  { %2540 = vmatmul.msk.bf16.vlgmr.msrb.gmra.mxu3 %vm1602_vm15, %v2615_v8  ;;  %v2060_v47 = vpop.permute.xlu0 %2059 }
 0x911   :  { %v1898_v33 = vpop.permute.xlu2 %1897 }
 0x913   :  { %v1903_v26 = vpop.permute.xlu1 %1902 }
 0x916   :  { %v2162_v62 = vpop.permute.xlu0 %2161 }
 0x919   :  { %v2050_v46 = vpop.permute.xlu2 %2049 }
 0x91b   :  { %v2055_v23 = vpop.permute.xlu1 %2054 }
 0x91e   :  { %2541 = vmatmul.msk.bf16.gmra.mxu3 %vm1602_vm15, %v2616_v6 }
 0x921   :  { %v1913_v58 = vpop.permute.xlu2 %1912 }
 0x923   :  { %v1918_v5 = vpop.permute.xlu1 %1917 }
 0x929   :  { %v2065_v36 = vpop.permute.xlu2 %2064 }
 0x92b   :  { %v2167_v11 = vpop.permute.xlu1 %2166 }
 0x92e   :  { %2542 = vmatmul.msk.bf16.gmra.mxu3 %vm1602_vm15, %v2617_v18 }
 0x937   :  { %v2016_v29 = vpop.f32.mrf.mxu0 }
 0x93f   :  { %v2018_v48 = vpop.f32.mrf.mxu0 }
 0x949   :  { %v2021_v30 = vpop.f32.mrf.mxu0 }
 0x951   :  { %v2023_v37 = vpop.f32.mrf.mxu0 }
 0x959   :  { %v2026_v1 = vpop.f32.mrf.mxu0 }
 0x961   :  { %v2028_v27 = vpop.f32.mrf.mxu0 }
 0x991   :  { %v1956_v35 = vpop.f32.mrf.mxu3 }
 0x992   :  { %v1957_v12 = vadd.f32 %v1956_v35, %v1893_v50  ;;  %v2172_v50 = vpop.permute.xlu2 %2171 }
 0x994   :  { %v2031_v28 = vadd.f32 %v2016_v29, %v1957_v12 }
 0x996   :  { %v2067_v0 = vadd.f32 %v2040_v7, %v2031_v28 }
 0x998   :  { %2137 = vmatmul.f32.vlgmr.msrb.gmra.mxu2 %v2067_v0  ;;  %v2182_v0 = vpop.permute.xlu1 %2181 }
 0x999   :  { %v1958_v53 = vpop.f32.mrf.mxu3 }
 0x99a   :  { %v1959_v38 = vadd.f32 %v1958_v53, %v1898_v33 }
 0x99c   :  { %v2032_v63 = vadd.f32 %v2018_v48, %v1959_v38  ;;  %v2177_v48 = vpop.permute.xlu0 %2176  ;;  %v2187_v38 = vpop.permute.xlu2 %2186 }
 0x99e   :  { %v2068_v60 = vadd.f32 %v2045_v39, %v2032_v63 }
 0x9a0   :  { %2140 = vmatmul.f32.gmra.mxu2 %v2068_v60 }
 0x9a1   :  { %v1961_v3 = vpop.f32.mrf.mxu3 }
 0x9a2   :  { %v1962_v61 = vadd.f32 %v1961_v3, %v1903_v26  ;;  %v2197_v3 = vpop.permute.xlu1 %2196 }
 0x9a4   :  { %v2033_v41 = vadd.f32 %v2021_v30, %v1962_v61  ;;  %v2192_v30 = vpop.permute.xlu0 %2191 }
 0x9a6   :  { %v2069_v34 = vadd.f32 %v2050_v46, %v2033_v41  ;;  %v2202_v46 = vpop.permute.xlu2 %2201 }
 0x9a8   :  { %2143 = vmatmul.f32.gmra.mxu2 %v2069_v34 }
 0x9a9   :  { %v1963_v43 = vpop.f32.mrf.mxu3 }
 0x9aa   :  { %v1964_v10 = vadd.f32 %v1963_v43, %v1908_v40 }
 0x9ac   :  { %v2034_v21 = vadd.f32 %v2023_v37, %v1964_v10  ;;  %v2207_v40 = vpop.permute.xlu0 %2206 }
 0x9ae   :  { %v2070_v56 = vadd.f32 %v2055_v23, %v2034_v21  ;;  %v2212_v21 = vpop.permute.xlu1 %2211 }
 0x9b0   :  { %2146 = vmatmul.f32.gmra.mxu2 %v2070_v56 }
 0x9b1   :  { %v1966_v32 = vpop.f32.mrf.mxu3 }
 0x9b2   :  { %v1967_v55 = vadd.f32 %v1966_v32, %v1913_v58  ;;  %v2217_v58 = vpop.permute.xlu2 %2216 }
 0x9b4   :  { %v2035_v16 = vadd.f32 %v2026_v1, %v1967_v55  ;;  %v2222_v55 = vpop.permute.xlu0 %2221 }
 0x9b6   :  { %v2071_v2 = vadd.f32 %v2060_v47, %v2035_v16 }
 0x9b8   :  { %2149 = vmatmul.f32.gmra.mxu2 %v2071_v2  ;;  %v2227_v2 = vpop.permute.xlu1 %2226 }
 0x9b9   :  { %v1968_v45 = vpop.f32.mrf.mxu3 }
 0x9ba   :  { %v1969_v17 = vadd.f32 %v1968_v45, %v1918_v5 }
 0x9bc   :  { %v2036_v13 = vadd.f32 %v2028_v27, %v1969_v17  ;;  %v2232_v17 = vpop.permute.xlu2 %2231 }
 0x9be   :  { %v2072_v51 = vadd.f32 %v2065_v36, %v2036_v13  ;;  %v2237_v36 = vpop.permute.xlu0 %2236 }
 0x9c0   :  { %2152 = vmatmul.f32.gmra.mxu2 %v2072_v51 }
 0xa1b   :  { %v2138_v8 = vpop.f32.mrf.mxu2 }
 0xa23   :  { %v2141_v4 = vpop.f32.mrf.mxu2 }
 0xa24   :  { %v2156_v19 = vpack.c.bf16 %v2141_v4, %v2138_v8 }
 0xa2b   :  { %v2144_v49 = vpop.f32.mrf.mxu2 }
 0xa33   :  { %v2147_v42 = vpop.f32.mrf.mxu2 }
 0xa34   :  { %v2157_v25 = vpack.c.bf16 %v2147_v42, %v2144_v49 }
 0xa3b   :  { %v2150_v6 = vpop.f32.mrf.mxu2 }
 0xa43   :  { %v2153_v18 = vpop.f32.mrf.mxu2 }
 0xa44   :  { %v2158_v52 = vpack.c.bf16 %v2153_v18, %v2150_v6 }
 0xa46   :  { %2308 = vmatpush.bf16.msra.mxu1 %v2158_v52 }
 0xa4a   :  { %2309 = vmatpush.bf16.msra.mxu1 %v2157_v25 }
 0xa4e   :  { %2310 = vmatpush.bf16.msra.mxu1 %v2156_v19 }
 0xa51   :  { %2590 = vmatmul.msk.bf16.vlgmr.msra.gmra.mxu1 %vm1665_vm0, %v2621_v15 }
 0xa61   :  { %2591 = vmatmul.msk.bf16.gmra.mxu1 %vm1665_vm0, %v2622_v59 }
 0xa71   :  { %2592 = vmatmul.msk.bf16.gmra.mxu1 %vm1665_vm0, %v2623_v54 }
 0xa81   :  { %2593 = vmatmul.msk.bf16.gmra.mxu1 %vm1665_vm0, %v2624_v9 }
 0xa91   :  { %2594 = vmatmul.msk.bf16.gmra.mxu1 %vm1665_vm0, %v2625_v24 }
 0xaa1   :  { %2595 = vmatmul.msk.bf16.gmra.mxu1 %vm1665_vm0, %v2626_v14 }
 0xab1   :  { %2596 = vmatmul.msk.bf16.gmra.mxu1 %vm1665_vm0, %v2627_v22 }
 0xac1   :  { %2597 = vmatmul.msk.bf16.gmra.mxu1 %vm1665_vm0, %v2628_v57 }
 0xace   :  { %v2312_v20 = vpop.f32.mrf.mxu1 }
 0xacf   :  { %v2313_v31 = vadd.f32 %v2312_v20, %v2162_v62 }
 0xad1   :  { %2352 = vst [vmem:[#allocation7] sm:$0xff] %v2313_v31 }
 0xad6   :  { %v2314_v44 = vpop.f32.mrf.mxu1 }
 0xad7   :  { %v2315_v29 = vadd.f32 %v2314_v44, %v2167_v11 }
 0xad9   :  { %2353 = vst [vmem:[#allocation7 + $0x8] sm:$0xff] %v2315_v29 }
 0xade   :  { %v2317_v35 = vpop.f32.mrf.mxu1 }
 0xadf   :  { %v2318_v12 = vadd.f32 %v2317_v35, %v2172_v50 }
 0xae1   :  { %2354 = vst [vmem:[#allocation7 + $0x10] sm:$0xff] %v2318_v12 }
 0xae6   :  { %v2319_v28 = vpop.f32.mrf.mxu1 }
 0xae7   :  { %v2320_v7 = vadd.f32 %v2319_v28, %v2177_v48 }
 0xae9   :  { %2355 = vst [vmem:[#allocation7 + $0x18] sm:$0xff] %v2320_v7 }
 0xaee   :  { %v2322_v33 = vpop.f32.mrf.mxu1 }
 0xaef   :  { %v2323_v53 = vadd.f32 %v2322_v33, %v2182_v0 }
 0xaf1   :  { %2356 = vst [vmem:[#allocation7 + $0x20] sm:$0xff] %v2323_v53 }
 0xaf6   :  { %v2324_v63 = vpop.f32.mrf.mxu1 }
 0xaf7   :  { %v2325_v39 = vadd.f32 %v2324_v63, %v2187_v38 }
 0xaf9   :  { %2357 = vst [vmem:[#allocation7 + $0x28] sm:$0xff] %v2325_v39 }
 0xafe   :  { %v2327_v60 = vpop.f32.mrf.mxu1 }
 0xaff   :  { %v2328_v26 = vadd.f32 %v2327_v60, %v2192_v30 }
 0xb01   :  { %2358 = vst [vmem:[#allocation7 + $0x30] sm:$0xff] %v2328_v26 }
 0xb06   :  { %v2329_v61 = vpop.f32.mrf.mxu1 }
 0xb07   :  { %v2330_v41 = vadd.f32 %v2329_v61, %v2197_v3 }
 0xb09   :  { %2359 = vst [vmem:[#allocation7 + $0x38] sm:$0xff] %v2330_v41 }
 0xb0e   :  { %v2332_v34 = vpop.f32.mrf.mxu1 }
 0xb0f   :  { %v2333_v37 = vadd.f32 %v2332_v34, %v2202_v46 }
 0xb11   :  { %2360 = vst [vmem:[#allocation7 + $0x40] sm:$0xff] %v2333_v37 }
 0xb16   :  { %v2334_v43 = vpop.f32.mrf.mxu1 }
 0xb17   :  { %v2335_v10 = vadd.f32 %v2334_v43, %v2207_v40 }
 0xb19   :  { %2361 = vst [vmem:[#allocation7 + $0x48] sm:$0xff] %v2335_v10 }
 0xb1e   :  { %v2337_v23 = vpop.f32.mrf.mxu1 }
 0xb1f   :  { %v2338_v56 = vadd.f32 %v2337_v23, %v2212_v21 }
 0xb21   :  { %2362 = vst [vmem:[#allocation7 + $0x50] sm:$0xff] %v2338_v56 }
 0xb26   :  { %v2339_v32 = vpop.f32.mrf.mxu1 }
 0xb27   :  { %v2340_v1 = vadd.f32 %v2339_v32, %v2217_v58 }
 0xb29   :  { %2363 = vst [vmem:[#allocation7 + $0x58] sm:$0xff] %v2340_v1 }
 0xb2e   :  { %v2342_v16 = vpop.f32.mrf.mxu1 }
 0xb2f   :  { %v2343_v47 = vadd.f32 %v2342_v16, %v2222_v55 }
 0xb31   :  { %2364 = vst [vmem:[#allocation7 + $0x60] sm:$0xff] %v2343_v47 }
 0xb36   :  { %v2344_v5 = vpop.f32.mrf.mxu1 }
 0xb37   :  { %v2345_v45 = vadd.f32 %v2344_v5, %v2227_v2 }
 0xb39   :  { %2365 = vst [vmem:[#allocation7 + $0x68] sm:$0xff] %v2345_v45 }
 0xb3e   :  { %v2347_v27 = vpop.f32.mrf.mxu1 }
 0xb3f   :  { %v2348_v13 = vadd.f32 %v2347_v27, %v2232_v17 }
 0xb41   :  { %2366 = vst [vmem:[#allocation7 + $0x70] sm:$0xff] %v2348_v13 }
 0xb46   :  { %v2349_v51 = vpop.f32.mrf.mxu1 }
 0xb47   :  { %v2350_v8 = vadd.f32 %v2349_v51, %v2237_v36 }
 0xb49   :  { %2367 = vst [vmem:[#allocation7 + $0x78] sm:$0xff] %v2350_v8 }
 0xb4a   :  { %2863 = shalt.err (!%p2860_p0)
}
 0xb4b   :  { %2380 = dma.vmem_to_hbm [thread:$0]  %s2373_s20, 2048, %s2375_s2, [#allocation4], %s2911_s0, %s2911_s0, %s2912_s16  }
 0xb4c   :  { %2868 = dma.done.wait [#allocation4], 2048  }
 0xb4d   :  { %2869 = vsyncadd [#allocation4], 4294965248 }
 0xb4e   :  { %2385 = vsyncpa [#allocation3], 1 }
 0xb4f   :  { %2386 = vsyncpa [#allocation6], 1 }
 0xb50   :  { %2387 = vsyncpa [#allocation4], 1 }

</bundles_post_ra>
